<compile_context>
chip_gen: v7x
topology: tpu7x:2x2x1
jax: 0.10.0
libtpu: 0.0.40
codegen_flags: <defaults>
</compile_context>

<pallas_src>
import functools
import math

import jax
import jax.numpy as jnp
from jax import lax
from jax.experimental import pallas as pl
from jax.experimental.pallas import tpu as pltpu


def _attn_kernel(x_ref, wq_ref, wk_ref, wv_ref, wo_ref, cos_ref, sin_ref,
                 o_ref, k_scr, v_scr, attn_scr, *,
                 num_heads, num_kv_heads, head_dim, block_q):
    qi = pl.program_id(1)
    hd = head_dim
    rep = num_heads // num_kv_heads

    def rope(t, cos, sin):
        # rotate_half(t) = concat(-t[..., hd/2:], t[..., :hd/2])
        rot = jnp.concatenate([-t[:, hd // 2:], t[:, :hd // 2]], axis=-1)
        return t * cos + rot * sin

    # ---- K/V projection + RoPE(K): once per batch row (first query tile). ----
    # NOTE: this scratch-reuse pattern is only correct because the q axis is the
    # innermost, sequential ("arbitrary") grid axis and batch is the only
    # "parallel" axis.  Do not reorder the grid or parallelize q.
    @pl.when(qi == 0)
    def _():
        x_full = x_ref[...]                                   # (S, H) bf16
        cos_f = cos_ref[...]                                  # (S, hd) f32
        sin_f = sin_ref[...]
        for g in range(num_kv_heads):                         # per-group: small f32 temps
            col = slice(g * hd, (g + 1) * hd)
            k_g = jnp.dot(x_full, wk_ref[:, col],
                          preferred_element_type=jnp.float32)  # (S, hd) f32
            v_g = jnp.dot(x_full, wv_ref[:, col],
                          preferred_element_type=jnp.float32)
            k_scr[:, col] = rope(k_g, cos_f, sin_f).astype(jnp.bfloat16)
            v_scr[:, col] = v_g.astype(jnp.bfloat16)

    # ---- Q projection for this tile: slice the resident x block (no extra stream),
    #      all heads at once (lane-dense); 1/sqrt(hd) already folded into Wq. ----
    row0 = qi * block_q
    x_q = x_ref[pl.ds(row0, block_q), :]                      # (bq, H) bf16
    q_all = jnp.dot(x_q, wq_ref[...],
                    preferred_element_type=jnp.float32)       # (bq, nh*hd) f32
    cos_q = cos_ref[pl.ds(row0, block_q), :]                  # (bq, hd)
    sin_q = sin_ref[pl.ds(row0, block_q), :]

    # ---- Attention: group-major so each K/V slice is read once per group. ----
    for g in range(num_kv_heads):
        col = slice(g * hd, (g + 1) * hd)
        k_g = k_scr[:, col]                                   # (S, hd) bf16
        v_g = v_scr[:, col]                                   # (S, hd) bf16
        for r in range(rep):
            h = g * rep + r                                   # query head -> group h//rep
            hcol = slice(h * hd, (h + 1) * hd)
            q_h = rope(q_all[:, hcol], cos_q, sin_q)          # (bq, hd) f32
            # scores: contract head_dim of q and k
            s = lax.dot_general(q_h.astype(jnp.bfloat16), k_g,
                                (((1,), (1,)), ((), ())),
                                preferred_element_type=jnp.float32)  # (bq, S)
            s = s - jnp.max(s, axis=-1, keepdims=True)
            p = jnp.exp(s)
            denom = jnp.sum(p, axis=-1, keepdims=True)
            attn = jnp.dot(p.astype(jnp.bfloat16), v_g,
                           preferred_element_type=jnp.float32) / denom  # (bq, hd)
            attn_scr[:, hcol] = attn.astype(jnp.bfloat16)

    # ---- Fused output projection: one (bq, H) @ (H, H) matmul, one store. ----
    o_ref[...] = jnp.dot(attn_scr[...], wo_ref[...],
                         preferred_element_type=jnp.float32)


def prepare_attention_params(wq, wk, wv, wo, cos, sin, num_heads, num_kv_heads):
    """One-time weight / RoPE-cache layout prep (hoisted out of the forward path).

    nn.Linear weights are (out, in); the kernel consumes x @ W.T, so store W.T
    pre-cast to bf16.  The 1/sqrt(head_dim) attention scale is folded into Wq.
    """
    H = wq.shape[1]
    hd = H // num_heads
    scale = 1.0 / math.sqrt(hd)
    return dict(
        wq=(wq.T * scale).astype(jnp.bfloat16),   # (H, nh*hd), scale folded in
        wk=wk.T.astype(jnp.bfloat16),             # (H, nkv*hd)
        wv=wv.T.astype(jnp.bfloat16),             # (H, nkv*hd)
        wo=wo.T.astype(jnp.bfloat16),             # (H, H)
        cos=cos.astype(jnp.float32),              # (S, hd)
        sin=sin.astype(jnp.float32),              # (S, hd)
    )


def _pick_block_q(S, requested=None):
    """Largest multiple-of-8 divisor of S (<= 256), honoring a valid request."""
    if requested is not None:
        requested = min(requested, S)
        if S % requested == 0 and (requested % 8 == 0 or requested == S):
            return requested
    cap = min(256, S)
    for b in range(cap, 0, -1):
        if S % b == 0 and b % 8 == 0:
            return b
    return S


def _vmem_limit_bytes():
    cap = 128 * 1024 * 1024
    try:
        cap = int(pltpu.get_tpu_info().vmem_capacity_bytes)
    except Exception:
        pass
    # v7x has 64 MiB physical VMEM per core -> leave headroom for the compiler.
    return 40 * 1024 * 1024 if cap <= 64 * 1024 * 1024 else 48 * 1024 * 1024


def custom_attention_pallas(x, params, num_heads, num_kv_heads, block_q=None):
    """x: (B, S, H) f32; params from prepare_attention_params. Returns (B, S, H) f32."""
    B, S, H = x.shape
    hd = H // num_heads
    nkv_dim = num_kv_heads * hd
    block_q = _pick_block_q(S, block_q)
    nq = S // block_q

    # Pre-cast the activation stream to bf16: halves x HBM->VMEM DMA bytes and
    # the (S, H) VMEM residency of the full block.
    x_bf16 = x.astype(jnp.bfloat16)

    kernel = functools.partial(
        _attn_kernel, num_heads=num_heads, num_kv_heads=num_kv_heads,
        head_dim=hd, block_q=block_q)

    return pl.pallas_call(
        kernel,
        out_shape=jax.ShapeDtypeStruct((B, S, H), jnp.float32),
        grid_spec=pltpu.PrefetchScalarGridSpec(
            num_scalar_prefetch=0,
            grid=(B, nq),
            in_specs=[
                pl.BlockSpec((pl.Squeezed(), S, H),
                             lambda b, q: (b, 0, 0)),                  # x (full row, bf16)
                pl.BlockSpec((H, num_heads * hd), lambda b, q: (0, 0)),  # Wq^T * scale (bf16)
                pl.BlockSpec((H, nkv_dim), lambda b, q: (0, 0)),         # Wk^T (bf16)
                pl.BlockSpec((H, nkv_dim), lambda b, q: (0, 0)),         # Wv^T (bf16)
                pl.BlockSpec((H, H), lambda b, q: (0, 0)),               # Wo^T (bf16)
                pl.BlockSpec((S, hd), lambda b, q: (0, 0)),              # cos
                pl.BlockSpec((S, hd), lambda b, q: (0, 0)),              # sin
            ],
            out_specs=pl.BlockSpec((pl.Squeezed(), block_q, H),
                                   lambda b, q: (b, q, 0)),
            scratch_shapes=[
                pltpu.VMEM((S, nkv_dim), jnp.bfloat16),   # RoPE'd K, per batch row
                pltpu.VMEM((S, nkv_dim), jnp.bfloat16),   # V, per batch row
                pltpu.VMEM((block_q, H), jnp.bfloat16),   # per-tile attention output
            ],
        ),
        compiler_params=pltpu.CompilerParams(
            # K/V scratch is filled at q-tile 0 and reused -> the q-tile axis must
            # stay sequential ("arbitrary"); the batch axis shards across cores.
            dimension_semantics=("parallel", "arbitrary"),
            vmem_limit_bytes=_vmem_limit_bytes(),
        ),
    )(x_bf16, params["wq"], params["wk"], params["wv"], params["wo"],
      params["cos"], params["sin"])


def rope_cache(seq_len, head_dim, theta=10000.0):
    inv_freq = 1.0 / (theta ** (jnp.arange(0, head_dim, 2, dtype=jnp.float32) / head_dim))
    t = jnp.arange(seq_len, dtype=jnp.float32)
    freqs = jnp.einsum("i,j->ij", t, inv_freq)           # (S, hd/2)
    emb = jnp.concatenate([freqs, freqs], axis=-1)       # (S, hd)
    return jnp.cos(emb), jnp.sin(emb)


def reference_attention(x, wq, wk, wv, wo, cos, sin, num_heads, num_kv_heads):
    """Pure-JAX f32 mirror of the PyTorch forward, for verification."""
    B, S, H = x.shape
    hd = H // num_heads
    rep = num_heads // num_kv_heads
    q = (x @ wq.T).reshape(B, S, num_heads, hd).transpose(0, 2, 1, 3)
    k = (x @ wk.T).reshape(B, S, num_kv_heads, hd).transpose(0, 2, 1, 3)
    v = (x @ wv.T).reshape(B, S, num_kv_heads, hd).transpose(0, 2, 1, 3)

    def rot_half(t):
        t1, t2 = t[..., : hd // 2], t[..., hd // 2:]
        return jnp.concatenate([-t2, t1], axis=-1)

    c = cos[None, None]
    s = sin[None, None]
    q = q * c + rot_half(q) * s
    k = k * c + rot_half(k) * s
    k = jnp.repeat(k, rep, axis=1)
    v = jnp.repeat(v, rep, axis=1)
    w = jnp.einsum("bhqd,bhkd->bhqk", q, k) / math.sqrt(hd)
    w = jax.nn.softmax(w, axis=-1)
    o = jnp.einsum("bhqk,bhkd->bhqd", w, v)
    o = o.transpose(0, 2, 1, 3).reshape(B, S, H)
    return o @ wo.T


if __name__ == "__main__":
    # Small, TPU-layout-friendly config consistent with the module.
    B, S = 2, 128
    num_heads, num_kv_heads = 4, 2
    head_dim = 128
    H = num_heads * head_dim          # 512
    rope_theta = 10000.0

    key = jax.random.PRNGKey(0)
    kx, kq, kk, kv_, ko = jax.random.split(key, 5)
    lim = 1.0 / math.sqrt(H)
    x = jax.random.normal(kx, (B, S, H), dtype=jnp.float32)
    wq = jax.random.uniform(kq, (num_heads * head_dim, H), jnp.float32, -lim, lim)
    wk = jax.random.uniform(kk, (num_kv_heads * head_dim, H), jnp.float32, -lim, lim)
    wv = jax.random.uniform(kv_, (num_kv_heads * head_dim, H), jnp.float32, -lim, lim)
    wo = jax.random.uniform(ko, (H, H), jnp.float32, -lim, lim)

    cos, sin = rope_cache(S, head_dim, rope_theta)
    params = prepare_attention_params(wq, wk, wv, wo, cos, sin,
                                      num_heads, num_kv_heads)

    out = custom_attention_pallas(x, params, num_heads, num_kv_heads, block_q=64)
    out = jax.block_until_ready(out)

    ref = reference_attention(x, wq, wk, wv, wo, cos, sin,
                              num_heads, num_kv_heads)
    assert out.shape == (B, S, H)
    # bf16 MXU path: check relative Frobenius error against the f32 reference.
    rel_err = float(jnp.linalg.norm(out - ref) / jnp.linalg.norm(ref))
    assert rel_err < 2.5e-2, rel_err

    print("KERNEL_OK")
</pallas_src>

<mosaic_0001>
module attributes {stable_mosaic.version = 11 : i64} {
  func.func @_attn_kernel(%arg0: i32, %arg1: i32, %arg2: memref<1x128x512xbf16, #tpu.memory_space<vmem>>, %arg3: memref<512x512xbf16, #tpu.memory_space<vmem>>, %arg4: memref<512x256xbf16, #tpu.memory_space<vmem>>, %arg5: memref<512x256xbf16, #tpu.memory_space<vmem>>, %arg6: memref<512x512xbf16, #tpu.memory_space<vmem>>, %arg7: memref<128x128xf32, #tpu.memory_space<vmem>>, %arg8: memref<128x128xf32, #tpu.memory_space<vmem>>, %arg9: memref<1x64x512xf32, #tpu.memory_space<vmem>>, %arg10: memref<128x256xbf16, #tpu.memory_space<vmem>>, %arg11: memref<128x256xbf16, #tpu.memory_space<vmem>>, %arg12: memref<64x512xbf16, #tpu.memory_space<vmem>>) attributes {dimension_semantics = [#tpu.dimension_semantics<parallel>, #tpu.dimension_semantics<arbitrary>], iteration_bounds = array<i64: 2, 2>, scalar_prefetch = 0 : i64, scratch_operands = 3 : i64, tpu.core_type = #tpu.core_type<tc>, window_params = [{transform_indices = @transform_0, window_bounds = array<i64: 1, 128, 512>}, {pipeline_mode = #tpu.pipeline_mode<synchronous>, transform_indices = @transform_1, window_bounds = array<i64: 512, 512>}, {pipeline_mode = #tpu.pipeline_mode<synchronous>, transform_indices = @transform_2, window_bounds = array<i64: 512, 256>}, {pipeline_mode = #tpu.pipeline_mode<synchronous>, transform_indices = @transform_3, window_bounds = array<i64: 512, 256>}, {pipeline_mode = #tpu.pipeline_mode<synchronous>, transform_indices = @transform_4, window_bounds = array<i64: 512, 512>}, {pipeline_mode = #tpu.pipeline_mode<synchronous>, transform_indices = @transform_5, window_bounds = array<i64: 128, 128>}, {pipeline_mode = #tpu.pipeline_mode<synchronous>, transform_indices = @transform_6, window_bounds = array<i64: 128, 128>}, {transform_indices = @transform_7, window_bounds = array<i64: 1, 64, 512>}]} {
    %c0_i32 = arith.constant 0 : i32
    %0 = arith.cmpi eq, %arg1, %c0_i32 : i32
    %1 = arith.extui %0 : i1 to i32
    %c0_i32_0 = arith.constant 0 : i32
    %2 = arith.cmpi ne, %1, %c0_i32_0 : i32
    scf.if %2 {
      %c0_47 = arith.constant 0 : index
      %c0_48 = arith.constant 0 : index
      %c0_49 = arith.constant 0 : index
      %119 = vector.load %arg2[%c0_47, %c0_48, %c0_49] : memref<1x128x512xbf16, #tpu.memory_space<vmem>>, vector<1x128x512xbf16>
      %120 = vector.shape_cast %119 : vector<1x128x512xbf16> to vector<128x512xbf16>
      %c0_50 = arith.constant 0 : index
      %c0_51 = arith.constant 0 : index
      %121 = vector.load %arg7[%c0_50, %c0_51] : memref<128x128xf32, #tpu.memory_space<vmem>>, vector<128x128xf32>
      %c0_52 = arith.constant 0 : index
      %c0_53 = arith.constant 0 : index
      %122 = vector.load %arg8[%c0_52, %c0_53] : memref<128x128xf32, #tpu.memory_space<vmem>>, vector<128x128xf32>
      %c0_54 = arith.constant 0 : index
      %c0_55 = arith.constant 0 : index
      %123 = vector.load %arg4[%c0_54, %c0_55] : memref<512x256xbf16, #tpu.memory_space<vmem>>, vector<512x128xbf16>
      %cst_56 = arith.constant dense<0.000000e+00> : vector<128x128xf32>
      %124 = tpu.matmul %120, %123, %cst_56 {dimension_numbers = #tpu.dot_dimension_numbers<[1], [0], [0], [1], [0, 0, 1, 1], [], []>} : vector<128x512xbf16>, vector<512x128xbf16>, vector<128x128xf32> -> vector<128x128xf32>
      %c0_57 = arith.constant 0 : index
      %c0_58 = arith.constant 0 : index
      %125 = vector.load %arg5[%c0_57, %c0_58] : memref<512x256xbf16, #tpu.memory_space<vmem>>, vector<512x128xbf16>
      %cst_59 = arith.constant dense<0.000000e+00> : vector<128x128xf32>
      %126 = tpu.matmul %120, %125, %cst_59 {dimension_numbers = #tpu.dot_dimension_numbers<[1], [0], [0], [1], [0, 0, 1, 1], [], []>} : vector<128x512xbf16>, vector<512x128xbf16>, vector<128x128xf32> -> vector<128x128xf32>
      %127 = vector.extract_strided_slice %124 {offsets = [0, 64], sizes = [128, 64], strides = [1, 1]} : vector<128x128xf32> to vector<128x64xf32>
      %cst_60 = arith.constant 0.000000e+00 : f32
      %128 = vector.broadcast %cst_60 : f32 to vector<128x64xf32>
      %129 = arith.subf %128, %127 : vector<128x64xf32>
      %130 = vector.extract_strided_slice %124 {offsets = [0, 0], sizes = [128, 64], strides = [1, 1]} : vector<128x128xf32> to vector<128x64xf32>
      %131 = tpu.concatenate %129, %130 in 1 : vector<128x64xf32>, vector<128x64xf32> -> vector<128x128xf32>
      %132 = arith.mulf %124, %121 : vector<128x128xf32>
      %133 = arith.mulf %131, %122 : vector<128x128xf32>
      %134 = arith.addf %132, %133 : vector<128x128xf32>
      %135 = arith.truncf %134 : vector<128x128xf32> to vector<128x128xbf16>
      %c0_61 = arith.constant 0 : index
      %c0_62 = arith.constant 0 : index
      %136 = vector.load %arg10[%c0_61, %c0_62] : memref<128x256xbf16, #tpu.memory_space<vmem>>, vector<128x128xbf16>
      tpu.vector_store %arg10[%c0_61, %c0_62], %135 {strides = array<i32>} : memref<128x256xbf16, #tpu.memory_space<vmem>>, vector<128x128xbf16>,
      %137 = arith.truncf %126 : vector<128x128xf32> to vector<128x128xbf16>
      %c0_63 = arith.constant 0 : index
      %c0_64 = arith.constant 0 : index
      %138 = vector.load %arg11[%c0_63, %c0_64] : memref<128x256xbf16, #tpu.memory_space<vmem>>, vector<128x128xbf16>
      tpu.vector_store %arg11[%c0_63, %c0_64], %137 {strides = array<i32>} : memref<128x256xbf16, #tpu.memory_space<vmem>>, vector<128x128xbf16>,
      %c0_65 = arith.constant 0 : index
      %c128_66 = arith.constant 128 : index
      %139 = vector.load %arg4[%c0_65, %c128_66] : memref<512x256xbf16, #tpu.memory_space<vmem>>, vector<512x128xbf16>
      %cst_67 = arith.constant dense<0.000000e+00> : vector<128x128xf32>
      %140 = tpu.matmul %120, %139, %cst_67 {dimension_numbers = #tpu.dot_dimension_numbers<[1], [0], [0], [1], [0, 0, 1, 1], [], []>} : vector<128x512xbf16>, vector<512x128xbf16>, vector<128x128xf32> -> vector<128x128xf32>
      %c0_68 = arith.constant 0 : index
      %c128_69 = arith.constant 128 : index
      %141 = vector.load %arg5[%c0_68, %c128_69] : memref<512x256xbf16, #tpu.memory_space<vmem>>, vector<512x128xbf16>
      %cst_70 = arith.constant dense<0.000000e+00> : vector<128x128xf32>
      %142 = tpu.matmul %120, %141, %cst_70 {dimension_numbers = #tpu.dot_dimension_numbers<[1], [0], [0], [1], [0, 0, 1, 1], [], []>} : vector<128x512xbf16>, vector<512x128xbf16>, vector<128x128xf32> -> vector<128x128xf32>
      %143 = vector.extract_strided_slice %140 {offsets = [0, 64], sizes = [128, 64], strides = [1, 1]} : vector<128x128xf32> to vector<128x64xf32>
      %cst_71 = arith.constant 0.000000e+00 : f32
      %144 = vector.broadcast %cst_71 : f32 to vector<128x64xf32>
      %145 = arith.subf %144, %143 : vector<128x64xf32>
      %146 = vector.extract_strided_slice %140 {offsets = [0, 0], sizes = [128, 64], strides = [1, 1]} : vector<128x128xf32> to vector<128x64xf32>
      %147 = tpu.concatenate %145, %146 in 1 : vector<128x64xf32>, vector<128x64xf32> -> vector<128x128xf32>
      %148 = arith.mulf %140, %121 : vector<128x128xf32>
      %149 = arith.mulf %147, %122 : vector<128x128xf32>
      %150 = arith.addf %148, %149 : vector<128x128xf32>
      %151 = arith.truncf %150 : vector<128x128xf32> to vector<128x128xbf16>
      %c0_72 = arith.constant 0 : index
      %c128_73 = arith.constant 128 : index
      %152 = vector.load %arg10[%c0_72, %c128_73] : memref<128x256xbf16, #tpu.memory_space<vmem>>, vector<128x128xbf16>
      tpu.vector_store %arg10[%c0_72, %c128_73], %151 {strides = array<i32>} : memref<128x256xbf16, #tpu.memory_space<vmem>>, vector<128x128xbf16>,
      %153 = arith.truncf %142 : vector<128x128xf32> to vector<128x128xbf16>
      %c0_74 = arith.constant 0 : index
      %c128_75 = arith.constant 128 : index
      %154 = vector.load %arg11[%c0_74, %c128_75] : memref<128x256xbf16, #tpu.memory_space<vmem>>, vector<128x128xbf16>
      tpu.vector_store %arg11[%c0_74, %c128_75], %153 {strides = array<i32>} : memref<128x256xbf16, #tpu.memory_space<vmem>>, vector<128x128xbf16>,
    } else {
    }
    %c64_i32 = arith.constant 64 : i32
    %3 = arith.muli %arg1, %c64_i32 : i32
    %c0 = arith.constant 0 : index
    %4 = arith.index_cast %3 : i32 to index
    %c0_1 = arith.constant 0 : index
    %5 = vector.load %arg2[%c0, %4, %c0_1] : memref<1x128x512xbf16, #tpu.memory_space<vmem>>, vector<1x64x512xbf16>
    %6 = vector.shape_cast %5 : vector<1x64x512xbf16> to vector<64x512xbf16>
    %c0_2 = arith.constant 0 : index
    %c0_3 = arith.constant 0 : index
    %7 = vector.load %arg3[%c0_2, %c0_3] : memref<512x512xbf16, #tpu.memory_space<vmem>>, vector<512x512xbf16>
    %cst = arith.constant dense<0.000000e+00> : vector<64x512xf32>
    %8 = tpu.matmul %6, %7, %cst {dimension_numbers = #tpu.dot_dimension_numbers<[1], [0], [0], [1], [0, 0, 1, 1], [], []>} : vector<64x512xbf16>, vector<512x512xbf16>, vector<64x512xf32> -> vector<64x512xf32>
    %9 = arith.index_cast %3 : i32 to index
    %c0_4 = arith.constant 0 : index
    %10 = vector.load %arg7[%9, %c0_4] : memref<128x128xf32, #tpu.memory_space<vmem>>, vector<64x128xf32>
    %11 = arith.index_cast %3 : i32 to index
    %c0_5 = arith.constant 0 : index
    %12 = vector.load %arg8[%11, %c0_5] : memref<128x128xf32, #tpu.memory_space<vmem>>, vector<64x128xf32>
    %c0_6 = arith.constant 0 : index
    %c0_7 = arith.constant 0 : index
    %13 = vector.load %arg10[%c0_6, %c0_7] : memref<128x256xbf16, #tpu.memory_space<vmem>>, vector<128x128xbf16>
    %c0_8 = arith.constant 0 : index
    %c0_9 = arith.constant 0 : index
    %14 = vector.load %arg11[%c0_8, %c0_9] : memref<128x256xbf16, #tpu.memory_space<vmem>>, vector<128x128xbf16>
    %15 = vector.extract_strided_slice %8 {offsets = [0, 0], sizes = [64, 128], strides = [1, 1]} : vector<64x512xf32> to vector<64x128xf32>
    %16 = vector.extract_strided_slice %15 {offsets = [0, 64], sizes = [64, 64], strides = [1, 1]} : vector<64x128xf32> to vector<64x64xf32>
    %cst_10 = arith.constant 0.000000e+00 : f32
    %17 = vector.broadcast %cst_10 : f32 to vector<64x64xf32>
    %18 = arith.subf %17, %16 : vector<64x64xf32>
    %19 = vector.extract_strided_slice %15 {offsets = [0, 0], sizes = [64, 64], strides = [1, 1]} : vector<64x128xf32> to vector<64x64xf32>
    %20 = tpu.concatenate %18, %19 in 1 : vector<64x64xf32>, vector<64x64xf32> -> vector<64x128xf32>
    %21 = arith.mulf %15, %10 : vector<64x128xf32>
    %22 = arith.mulf %20, %12 : vector<64x128xf32>
    %23 = arith.addf %21, %22 : vector<64x128xf32>
    %24 = arith.truncf %23 : vector<64x128xf32> to vector<64x128xbf16>
    %cst_11 = arith.constant dense<0.000000e+00> : vector<64x128xf32>
    %25 = tpu.matmul %24, %13, %cst_11 {dimension_numbers = #tpu.dot_dimension_numbers<[1], [1], [0], [0], [0, 0, 1, 0], [], []>} : vector<64x128xbf16>, vector<128x128xbf16>, vector<64x128xf32> -> vector<64x128xf32>
    %cst_12 = arith.constant dense<0xFF800000> : vector<64xf32>
    %26 = vector.multi_reduction <maximumf>, %25, %cst_12 [1] : vector<64x128xf32> to vector<64xf32>
    %27 = vector.shape_cast %26 : vector<64xf32> to vector<64x1xf32>
    %28 = vector.broadcast %27 : vector<64x1xf32> to vector<64x128xf32>
    %29 = arith.subf %25, %28 : vector<64x128xf32>
    %30 = math.exp %29 : vector<64x128xf32>
    %cst_13 = arith.constant dense<0.000000e+00> : vector<64xf32>
    %31 = vector.multi_reduction <add>, %30, %cst_13 [1] : vector<64x128xf32> to vector<64xf32>
    %32 = vector.shape_cast %31 : vector<64xf32> to vector<64x1xf32>
    %33 = arith.truncf %30 : vector<64x128xf32> to vector<64x128xbf16>
    %cst_14 = arith.constant dense<0.000000e+00> : vector<64x128xf32>
    %34 = tpu.matmul %33, %14, %cst_14 {dimension_numbers = #tpu.dot_dimension_numbers<[1], [0], [0], [1], [0, 0, 1, 1], [], []>} : vector<64x128xbf16>, vector<128x128xbf16>, vector<64x128xf32> -> vector<64x128xf32>
    %35 = vector.broadcast %32 : vector<64x1xf32> to vector<64x128xf32>
    %36 = arith.divf %34, %35 : vector<64x128xf32>
    %37 = arith.truncf %36 : vector<64x128xf32> to vector<64x128xbf16>
    %c0_15 = arith.constant 0 : index
    %c0_16 = arith.constant 0 : index
    %38 = vector.load %arg12[%c0_15, %c0_16] : memref<64x512xbf16, #tpu.memory_space<vmem>>, vector<64x128xbf16>
    tpu.vector_store %arg12[%c0_15, %c0_16], %37 {strides = array<i32>} : memref<64x512xbf16, #tpu.memory_space<vmem>>, vector<64x128xbf16>,
    %39 = vector.extract_strided_slice %8 {offsets = [0, 128], sizes = [64, 128], strides = [1, 1]} : vector<64x512xf32> to vector<64x128xf32>
    %40 = vector.extract_strided_slice %39 {offsets = [0, 64], sizes = [64, 64], strides = [1, 1]} : vector<64x128xf32> to vector<64x64xf32>
    %cst_17 = arith.constant 0.000000e+00 : f32
    %41 = vector.broadcast %cst_17 : f32 to vector<64x64xf32>
    %42 = arith.subf %41, %40 : vector<64x64xf32>
    %43 = vector.extract_strided_slice %39 {offsets = [0, 0], sizes = [64, 64], strides = [1, 1]} : vector<64x128xf32> to vector<64x64xf32>
    %44 = tpu.concatenate %42, %43 in 1 : vector<64x64xf32>, vector<64x64xf32> -> vector<64x128xf32>
    %45 = arith.mulf %39, %10 : vector<64x128xf32>
    %46 = arith.mulf %44, %12 : vector<64x128xf32>
    %47 = arith.addf %45, %46 : vector<64x128xf32>
    %48 = arith.truncf %47 : vector<64x128xf32> to vector<64x128xbf16>
    %cst_18 = arith.constant dense<0.000000e+00> : vector<64x128xf32>
    %49 = tpu.matmul %48, %13, %cst_18 {dimension_numbers = #tpu.dot_dimension_numbers<[1], [1], [0], [0], [0, 0, 1, 0], [], []>} : vector<64x128xbf16>, vector<128x128xbf16>, vector<64x128xf32> -> vector<64x128xf32>
    %cst_19 = arith.constant dense<0xFF800000> : vector<64xf32>
    %50 = vector.multi_reduction <maximumf>, %49, %cst_19 [1] : vector<64x128xf32> to vector<64xf32>
    %51 = vector.shape_cast %50 : vector<64xf32> to vector<64x1xf32>
    %52 = vector.broadcast %51 : vector<64x1xf32> to vector<64x128xf32>
    %53 = arith.subf %49, %52 : vector<64x128xf32>
    %54 = math.exp %53 : vector<64x128xf32>
    %cst_20 = arith.constant dense<0.000000e+00> : vector<64xf32>
    %55 = vector.multi_reduction <add>, %54, %cst_20 [1] : vector<64x128xf32> to vector<64xf32>
    %56 = vector.shape_cast %55 : vector<64xf32> to vector<64x1xf32>
    %57 = arith.truncf %54 : vector<64x128xf32> to vector<64x128xbf16>
    %cst_21 = arith.constant dense<0.000000e+00> : vector<64x128xf32>
    %58 = tpu.matmul %57, %14, %cst_21 {dimension_numbers = #tpu.dot_dimension_numbers<[1], [0], [0], [1], [0, 0, 1, 1], [], []>} : vector<64x128xbf16>, vector<128x128xbf16>, vector<64x128xf32> -> vector<64x128xf32>
    %59 = vector.broadcast %56 : vector<64x1xf32> to vector<64x128xf32>
    %60 = arith.divf %58, %59 : vector<64x128xf32>
    %61 = arith.truncf %60 : vector<64x128xf32> to vector<64x128xbf16>
    %c0_22 = arith.constant 0 : index
    %c128 = arith.constant 128 : index
    %62 = vector.load %arg12[%c0_22, %c128] : memref<64x512xbf16, #tpu.memory_space<vmem>>, vector<64x128xbf16>
    tpu.vector_store %arg12[%c0_22, %c128], %61 {strides = array<i32>} : memref<64x512xbf16, #tpu.memory_space<vmem>>, vector<64x128xbf16>,
    %c0_23 = arith.constant 0 : index
    %c128_24 = arith.constant 128 : index
    %63 = vector.load %arg10[%c0_23, %c128_24] : memref<128x256xbf16, #tpu.memory_space<vmem>>, vector<128x128xbf16>
    %c0_25 = arith.constant 0 : index
    %c128_26 = arith.constant 128 : index
    %64 = vector.load %arg11[%c0_25, %c128_26] : memref<128x256xbf16, #tpu.memory_space<vmem>>, vector<128x128xbf16>
    %65 = vector.extract_strided_slice %8 {offsets = [0, 256], sizes = [64, 128], strides = [1, 1]} : vector<64x512xf32> to vector<64x128xf32>
    %66 = vector.extract_strided_slice %65 {offsets = [0, 64], sizes = [64, 64], strides = [1, 1]} : vector<64x128xf32> to vector<64x64xf32>
    %cst_27 = arith.constant 0.000000e+00 : f32
    %67 = vector.broadcast %cst_27 : f32 to vector<64x64xf32>
    %68 = arith.subf %67, %66 : vector<64x64xf32>
    %69 = vector.extract_strided_slice %65 {offsets = [0, 0], sizes = [64, 64], strides = [1, 1]} : vector<64x128xf32> to vector<64x64xf32>
    %70 = tpu.concatenate %68, %69 in 1 : vector<64x64xf32>, vector<64x64xf32> -> vector<64x128xf32>
    %71 = arith.mulf %65, %10 : vector<64x128xf32>
    %72 = arith.mulf %70, %12 : vector<64x128xf32>
    %73 = arith.addf %71, %72 : vector<64x128xf32>
    %74 = arith.truncf %73 : vector<64x128xf32> to vector<64x128xbf16>
    %cst_28 = arith.constant dense<0.000000e+00> : vector<64x128xf32>
    %75 = tpu.matmul %74, %63, %cst_28 {dimension_numbers = #tpu.dot_dimension_numbers<[1], [1], [0], [0], [0, 0, 1, 0], [], []>} : vector<64x128xbf16>, vector<128x128xbf16>, vector<64x128xf32> -> vector<64x128xf32>
    %cst_29 = arith.constant dense<0xFF800000> : vector<64xf32>
    %76 = vector.multi_reduction <maximumf>, %75, %cst_29 [1] : vector<64x128xf32> to vector<64xf32>
    %77 = vector.shape_cast %76 : vector<64xf32> to vector<64x1xf32>
    %78 = vector.broadcast %77 : vector<64x1xf32> to vector<64x128xf32>
    %79 = arith.subf %75, %78 : vector<64x128xf32>
    %80 = math.exp %79 : vector<64x128xf32>
    %cst_30 = arith.constant dense<0.000000e+00> : vector<64xf32>
    %81 = vector.multi_reduction <add>, %80, %cst_30 [1] : vector<64x128xf32> to vector<64xf32>
    %82 = vector.shape_cast %81 : vector<64xf32> to vector<64x1xf32>
    %83 = arith.truncf %80 : vector<64x128xf32> to vector<64x128xbf16>
    %cst_31 = arith.constant dense<0.000000e+00> : vector<64x128xf32>
    %84 = tpu.matmul %83, %64, %cst_31 {dimension_numbers = #tpu.dot_dimension_numbers<[1], [0], [0], [1], [0, 0, 1, 1], [], []>} : vector<64x128xbf16>, vector<128x128xbf16>, vector<64x128xf32> -> vector<64x128xf32>
    %85 = vector.broadcast %82 : vector<64x1xf32> to vector<64x128xf32>
    %86 = arith.divf %84, %85 : vector<64x128xf32>
    %87 = arith.truncf %86 : vector<64x128xf32> to vector<64x128xbf16>
    %c0_32 = arith.constant 0 : index
    %c256 = arith.constant 256 : index
    %88 = vector.load %arg12[%c0_32, %c256] : memref<64x512xbf16, #tpu.memory_space<vmem>>, vector<64x128xbf16>
    tpu.vector_store %arg12[%c0_32, %c256], %87 {strides = array<i32>} : memref<64x512xbf16, #tpu.memory_space<vmem>>, vector<64x128xbf16>,
    %89 = vector.extract_strided_slice %8 {offsets = [0, 384], sizes = [64, 128], strides = [1, 1]} : vector<64x512xf32> to vector<64x128xf32>
    %90 = vector.extract_strided_slice %89 {offsets = [0, 64], sizes = [64, 64], strides = [1, 1]} : vector<64x128xf32> to vector<64x64xf32>
    %cst_33 = arith.constant 0.000000e+00 : f32
    %91 = vector.broadcast %cst_33 : f32 to vector<64x64xf32>
    %92 = arith.subf %91, %90 : vector<64x64xf32>
    %93 = vector.extract_strided_slice %89 {offsets = [0, 0], sizes = [64, 64], strides = [1, 1]} : vector<64x128xf32> to vector<64x64xf32>
    %94 = tpu.concatenate %92, %93 in 1 : vector<64x64xf32>, vector<64x64xf32> -> vector<64x128xf32>
    %95 = arith.mulf %89, %10 : vector<64x128xf32>
    %96 = arith.mulf %94, %12 : vector<64x128xf32>
    %97 = arith.addf %95, %96 : vector<64x128xf32>
    %98 = arith.truncf %97 : vector<64x128xf32> to vector<64x128xbf16>
    %cst_34 = arith.constant dense<0.000000e+00> : vector<64x128xf32>
    %99 = tpu.matmul %98, %63, %cst_34 {dimension_numbers = #tpu.dot_dimension_numbers<[1], [1], [0], [0], [0, 0, 1, 0], [], []>} : vector<64x128xbf16>, vector<128x128xbf16>, vector<64x128xf32> -> vector<64x128xf32>
    %cst_35 = arith.constant dense<0xFF800000> : vector<64xf32>
    %100 = vector.multi_reduction <maximumf>, %99, %cst_35 [1] : vector<64x128xf32> to vector<64xf32>
    %101 = vector.shape_cast %100 : vector<64xf32> to vector<64x1xf32>
    %102 = vector.broadcast %101 : vector<64x1xf32> to vector<64x128xf32>
    %103 = arith.subf %99, %102 : vector<64x128xf32>
    %104 = math.exp %103 : vector<64x128xf32>
    %cst_36 = arith.constant dense<0.000000e+00> : vector<64xf32>
    %105 = vector.multi_reduction <add>, %104, %cst_36 [1] : vector<64x128xf32> to vector<64xf32>
    %106 = vector.shape_cast %105 : vector<64xf32> to vector<64x1xf32>
    %107 = arith.truncf %104 : vector<64x128xf32> to vector<64x128xbf16>
    %cst_37 = arith.constant dense<0.000000e+00> : vector<64x128xf32>
    %108 = tpu.matmul %107, %64, %cst_37 {dimension_numbers = #tpu.dot_dimension_numbers<[1], [0], [0], [1], [0, 0, 1, 1], [], []>} : vector<64x128xbf16>, vector<128x128xbf16>, vector<64x128xf32> -> vector<64x128xf32>
    %109 = vector.broadcast %106 : vector<64x1xf32> to vector<64x128xf32>
    %110 = arith.divf %108, %109 : vector<64x128xf32>
    %111 = arith.truncf %110 : vector<64x128xf32> to vector<64x128xbf16>
    %c0_38 = arith.constant 0 : index
    %c384 = arith.constant 384 : index
    %112 = vector.load %arg12[%c0_38, %c384] : memref<64x512xbf16, #tpu.memory_space<vmem>>, vector<64x128xbf16>
    tpu.vector_store %arg12[%c0_38, %c384], %111 {strides = array<i32>} : memref<64x512xbf16, #tpu.memory_space<vmem>>, vector<64x128xbf16>,
    %c0_39 = arith.constant 0 : index
    %c0_40 = arith.constant 0 : index
    %113 = vector.load %arg12[%c0_39, %c0_40] : memref<64x512xbf16, #tpu.memory_space<vmem>>, vector<64x512xbf16>
    %c0_41 = arith.constant 0 : index
    %c0_42 = arith.constant 0 : index
    %114 = vector.load %arg6[%c0_41, %c0_42] : memref<512x512xbf16, #tpu.memory_space<vmem>>, vector<512x512xbf16>
    %cst_43 = arith.constant dense<0.000000e+00> : vector<64x512xf32>
    %115 = tpu.matmul %113, %114, %cst_43 {dimension_numbers = #tpu.dot_dimension_numbers<[1], [0], [0], [1], [0, 0, 1, 1], [], []>} : vector<64x512xbf16>, vector<512x512xbf16>, vector<64x512xf32> -> vector<64x512xf32>
    %c0_44 = arith.constant 0 : index
    %c0_45 = arith.constant 0 : index
    %c0_46 = arith.constant 0 : index
    %116 = vector.load %arg9[%c0_44, %c0_45, %c0_46] : memref<1x64x512xf32, #tpu.memory_space<vmem>>, vector<1x64x512xf32>
    %117 = vector.shape_cast %116 : vector<1x64x512xf32> to vector<64x512xf32>
    %118 = vector.shape_cast %115 : vector<64x512xf32> to vector<1x64x512xf32>
    tpu.vector_store %arg9[%c0_44, %c0_45, %c0_46], %118 {strides = array<i32>} : memref<1x64x512xf32, #tpu.memory_space<vmem>>, vector<1x64x512xf32>,
    return
  }
  func.func @transform_0(%arg0: i32, %arg1: i32) -> (i32, i32, i32) {
    %c0_i32 = arith.constant 0 : i32
    %c0_i32_0 = arith.constant 0 : i32
    %c0_i32_1 = arith.constant 0 : i32
    return %arg0, %c0_i32, %c0_i32_0 : i32, i32, i32
  }
  func.func @transform_1(%arg0: i32, %arg1: i32) -> (i32, i32) {
    %c0_i32 = arith.constant 0 : i32
    %c0_i32_0 = arith.constant 0 : i32
    %c0_i32_1 = arith.constant 0 : i32
    return %c0_i32, %c0_i32_0 : i32, i32
  }
  func.func @transform_2(%arg0: i32, %arg1: i32) -> (i32, i32) {
    %c0_i32 = arith.constant 0 : i32
    %c0_i32_0 = arith.constant 0 : i32
    %c0_i32_1 = arith.constant 0 : i32
    return %c0_i32, %c0_i32_0 : i32, i32
  }
  func.func @transform_3(%arg0: i32, %arg1: i32) -> (i32, i32) {
    %c0_i32 = arith.constant 0 : i32
    %c0_i32_0 = arith.constant 0 : i32
    %c0_i32_1 = arith.constant 0 : i32
    return %c0_i32, %c0_i32_0 : i32, i32
  }
  func.func @transform_4(%arg0: i32, %arg1: i32) -> (i32, i32) {
    %c0_i32 = arith.constant 0 : i32
    %c0_i32_0 = arith.constant 0 : i32
    %c0_i32_1 = arith.constant 0 : i32
    return %c0_i32, %c0_i32_0 : i32, i32
  }
  func.func @transform_5(%arg0: i32, %arg1: i32) -> (i32, i32) {
    %c0_i32 = arith.constant 0 : i32
    %c0_i32_0 = arith.constant 0 : i32
    %c0_i32_1 = arith.constant 0 : i32
    return %c0_i32, %c0_i32_0 : i32, i32
  }
  func.func @transform_6(%arg0: i32, %arg1: i32) -> (i32, i32) {
    %c0_i32 = arith.constant 0 : i32
    %c0_i32_0 = arith.constant 0 : i32
    %c0_i32_1 = arith.constant 0 : i32
    return %c0_i32, %c0_i32_0 : i32, i32
  }
  func.func @transform_7(%arg0: i32, %arg1: i32) -> (i32, i32, i32) {
    %c0_i32 = arith.constant 0 : i32
    %c0_i32_0 = arith.constant 0 : i32
    return %arg0, %arg1, %c0_i32 : i32, i32, i32
  }
}

</mosaic_0001>

<bundles_post_ra>
// kernel: tpu_custom_call.1
= control target key start
LH: loop header
LB: loop body
LE: loop exit
PB: predicated region body
PF: predicated region fallthrough
CT: control target
= control target key end

     0   :  { %s11254_s0 = inlined_call_operand.hbm [shape: bf16[2,128,512], index: 0, kind: input, shape index: {}]   ;;  %s11255_s1 = inlined_call_operand.hbm [shape: bf16[512,512], index: 1, kind: input, shape index: {}]   ;;  %s11256_s2 = inlined_call_operand.hbm [shape: bf16[512,256], index: 2, kind: input, shape index: {}]   ;;  %s11257_s3 = inlined_call_operand.hbm [shape: bf16[512,256], index: 3, kind: input, shape index: {}]   ;;  %s11258_s4 = inlined_call_operand.hbm [shape: bf16[512,512], index: 4, kind: input, shape index: {}]   ;;  %s11259_s5 = inlined_call_operand.hbm [shape: f32[128,128], index: 5, kind: input, shape index: {}]   ;;  %s11260_s6 = inlined_call_operand.hbm [shape: f32[128,128], index: 6, kind: input, shape index: {}]   ;;  %s11261_s7 = inlined_call_operand.hbm [shape: f32[2,128,512], index: 7, kind: output, shape index: {}]  }
   0x1   :  { %11294 = sst [smem:[#allocation51_spill]] %s11254_s0 }
   0x2   :  { %11295 = sst [smem:[#allocation52_spill]] %s11255_s1 }
   0x3   :  { %11296 = sst [smem:[#allocation53_spill]] %s11256_s2 }
   0x4   :  { %11297 = sst [smem:[#allocation54_spill]] %s11257_s3 }
   0x5   :  { %11298 = sst [smem:[#allocation55_spill]] %s11261_s7 }
   0x6   :  { %12 = vsyncpa [#allocation6], 0 }
   0x7   :  { %14 = vsyncpa [#allocation6 + $0x1], 0 }
   0x8   :  { %15 = vsyncpa [#allocation9], 0 }
   0x9   :  { %16 = vsyncpa [#allocation12], 0 }
   0xa   :  { %17 = vsyncpa [#allocation15], 0 }
   0xb   :  { %18 = vsyncpa [#allocation7], 0 }
   0xc   :  { %20 = vsyncpa [#allocation7 + $0x1], 0  ;;  %s9313_s24 = smov 0   ;;  %s9315_s25 = smov 0  }
   0xd   :  { %s9317_s26 = smov 0   ;;  %s9319_s27 = smov 0  }
   0xe   :  { %s9321_s28 = smov 0   ;;  %s9323_s29 = smov 0  }
   0xf   :  { %s9325_s30 = smov 0   ;;  %s9327_s8 = smov 0  }
  0x10   :  { %s9329_s9 = smov 0   ;;  %s9331_s10 = smov 0  }
  0x11   :  { %s9333_s11 = smov 0  }
  0x12 LB: > { %11299 = sst [smem:[#allocation23_spill]] %s9215_s24  ;;  %s6685_s12 = sadd.s32 4294967295, %s9255_s11   ;;  %s9255_s11 = sphi %s9333_s11, %s26_s11   ;;  %s9251_s10 = sphi %s9331_s10, %s11396_s10   ;;  %s9247_s9 = sphi %s9329_s9, %s11395_s9   ;;  %s9243_s8 = sphi %s9327_s8, %s11394_s8   ;;  %s9239_s30 = sphi %s9325_s30, %s11393_s30   ;;  %s9235_s29 = sphi %s9323_s29, %s11392_s29   ;;  %s9231_s28 = sphi %s9321_s28, %s11391_s28   ;;  %s9227_s27 = sphi %s9319_s27, %s11390_s27   ;;  %s9223_s26 = sphi %s9317_s26, %s11389_s26   ;;  %s9219_s25 = sphi %s9315_s25, %s11388_s25   ;;  %s9215_s24 = sphi %s9313_s24, %s11387_s24  }
  0x13   : > { %11300 = sst [smem:[#allocation24_spill]] %s9219_s25  ;;  %p6687_p0 = scmp.ge.s32.totalorder %s9255_s11, 1 }
  0x14   : > { %11301 = sst [smem:[#allocation25_spill]] %s9239_s30  ;;  %p9370_p1 = scmp.eq.s32.totalorder %s6685_s12, 0 }
  0x15   : > { %11302 = sst [smem:[#allocation26_spill]] %s9243_s8  ;;  %p9374_p2 = scmp.eq.s32.totalorder %s6685_s12, 3 }
  0x16   : > { %s11303_s13 = scalar_select %p9370_p1, 1, 0 }
  0x17   : > { %s11304_s14 = scalar_select %p9374_p2, 1, 0 }
  0x18   : > { %p223_p3 = scmp.lt.s32.totalorder %s9255_s11, 5  ;;  %s9257_s16 = smov [#allocation8]  }
  0x19   : > { %11305 = sst [smem:[#allocation27_spill]] %s11304_s14  ;;  %s235_s17 = sshll.u32 %s9257_s16, 4  ;;  %s236_s17 = int_to_ptr.vmem [resolvable:$true] %s235_s17 }
  0x1a   : > { %p9379_p4 = pnand %p6687_p0, %p223_p3  ;;  %s9258_s19 = smov [#allocation11]  }
  0x1b   : > { %s261_s20 = sshll.u32 %s9258_s19, 4  ;;  %s11309_s1 = sld [smem:[#allocation52_spill]]  ;;  %s9391_s20 = int_to_ptr.vmem [resolvable:$true] %s261_s20 }
  0x1c   : > { %s11306_s15 = scalar_select %p9379_p4, 1, 0 }
  0x1d   : > { %p8045_p5 = pneg %p9379_p4 }
  0x1e   : > { %11307 = sst [smem:[#allocation28_spill]] %s11306_s15 }
  0x1f   : > { %p9387_p6 = pnand %p8045_p5, %p9370_p1 }
  0x21   : > { %s8923_s23 = scalar_lea.hbm %s11309_s1, 16384  ;;  %p9401_p8 = pneg %p9387_p6 }
  0x22   : > { %p8924_p7 = scmp.ne.s32.totalorder %s11309_s1, %s8923_s23  ;;  %p8930_p11 = scmp.lt.u32.totalorder %s8923_s23, %s11309_s1 }
  0x24   : > { %p8926_p9 = pnand %p9401_p8, %p8924_p7 }
  0x26   : > { %p8927_p10 = pneg %p8926_p9 }
  0x28   : > { %p8932_p12 = pnand %p8930_p11, %p8927_p10 }
  0x2a   : > { %8935 = shalt.err (!%p8932_p12)
}
  0x2b   : > { %s8936_s21 = scalar_lea.vmem %s236_s17, 16384  ;;  %p8944_p5 = scmp.lt.s32.totalorder %s236_s17, %s236_s17 }
  0x2c   : > { %p8937_p13 = scmp.ne.s32.totalorder %s236_s17, %s8936_s21  ;;  %p8945_p4 = scmp.lt.s32.totalorder %s8936_s21, %s8936_s21 }
  0x2e   : > { %p8939_p0 = pnand %p8937_p13, %p9401_p8  ;;  %p8946_p2 = por %p8945_p4, %p8944_p5 }
  0x30   : > { %p8940_p3 = pneg %p8939_p0 }
  0x32   : > { %p8947_p1 = pnand %p8946_p2, %p8940_p3 }
  0x34   : > { %8950 = shalt.err (!%p8947_p1)
}
  0x35   : > { %s11270_s7 = smov 256   ;;  %s11272_s22 = smov 16  }
  0x36   : > { %8048 = dma.hbm_to_vmem [thread:$0]  (!%p9387_p6), %s11309_s1, 16384, %s236_s17, [#allocation9], %s11270_s7, %s11270_s7, %s11272_s22  }
  0x37   : > { %s11311_s3 = sld [smem:[#allocation54_spill]] }
  0x3d   : > { %s8951_s30 = scalar_lea.hbm %s11311_s3, 8192 }
  0x3e   : > { %p8952_p1 = scmp.ne.s32.totalorder %s11311_s3, %s8951_s30  ;;  %p8958_p7 = scmp.lt.u32.totalorder %s8951_s30, %s11311_s3 }
  0x40   : > { %p8954_p2 = pnand %p8952_p1, %p9401_p8 }
  0x42   : > { %p8955_p4 = pneg %p8954_p2 }
  0x44   : > { %p8960_p9 = pnand %p8958_p7, %p8955_p4 }
  0x46   : > { %8963 = shalt.err (!%p8960_p9)
}
  0x47   : > { %s8964_s17 = scalar_lea.vmem %s9391_s20, 8192  ;;  %p8972_p13 = scmp.lt.s32.totalorder %s9391_s20, %s9391_s20 }
  0x48   : > { %p8965_p10 = scmp.ne.s32.totalorder %s9391_s20, %s8964_s17  ;;  %p8973_p0 = scmp.lt.s32.totalorder %s8964_s17, %s8964_s17 }
  0x4a   : > { %p8967_p11 = pnand %p8965_p10, %p9401_p8  ;;  %p8974_p3 = por %p8973_p0, %p8972_p13 }
  0x4c   : > { %p8968_p12 = pneg %p8967_p11 }
  0x4e   : > { %p8975_p5 = pnand %p8974_p3, %p8968_p12 }
  0x50   : > { %8978 = shalt.err (!%p8975_p5)
}
  0x51   : > { %s9261_s15 = smov 128   ;;  %s9262_s0 = smov 8  }
  0x52   : > { %8054 = dma.hbm_to_vmem [thread:$0]  (!%p9387_p6), %s11311_s3, 8192, %s9391_s20, [#allocation12], %s9261_s15, %s9261_s15, %s9262_s0  }
  0x53   : > { %s9263_s8 = smov [#allocation14]   ;;  %s9264_s12 = smov [#allocation10]  }
  0x54   : > { %s287_s23 = sshll.u32 %s9263_s8, 4  ;;  %s248_s19 = sshll.u32 %s9264_s12, 4  ;;  %s288_s23 = int_to_ptr.vmem [resolvable:$true] %s287_s23  ;;  %s249_s19 = int_to_ptr.vmem [resolvable:$true] %s248_s19 }
  0x55   : > { %s8979_s7 = scalar_lea.hbm %s11259_s5, 2048 }
  0x56   : > { %p8980_p1 = scmp.ne.s32.totalorder %s11259_s5, %s8979_s7  ;;  %p8986_p7 = scmp.lt.u32.totalorder %s8979_s7, %s11259_s5 }
  0x58   : > { %p8982_p2 = pnand %p8980_p1, %p9401_p8 }
  0x5a   : > { %p8983_p4 = pneg %p8982_p2 }
  0x5c   : > { %p8988_p9 = pnand %p8986_p7, %p8983_p4 }
  0x5e   : > { %8991 = shalt.err (!%p8988_p9)
}
  0x5f   : > { %s8992_s20 = scalar_lea.vmem %s288_s23, 2048  ;;  %p9000_p13 = scmp.lt.s32.totalorder %s288_s23, %s288_s23 }
  0x60   : > { %p8993_p10 = scmp.ne.s32.totalorder %s288_s23, %s8992_s20  ;;  %p9001_p0 = scmp.lt.s32.totalorder %s8992_s20, %s8992_s20 }
  0x62   : > { %p8995_p11 = pnand %p8993_p10, %p9401_p8  ;;  %p9002_p3 = por %p9001_p0, %p9000_p13 }
  0x64   : > { %p8996_p12 = pneg %p8995_p11 }
  0x66   : > { %p9003_p5 = pnand %p9002_p3, %p8996_p12 }
  0x68   : > { %9006 = shalt.err (!%p9003_p5)
}
  0x69   : > { %8060 = dma.hbm_to_vmem [thread:$0]  (!%p9387_p6), %s11259_s5, 2048, %s288_s23, [#allocation15], %s9261_s15, %s9261_s15, %s9262_s0  }
  0x6a   : > { %s11312_s2 = sld [smem:[#allocation53_spill]] }
  0x70   : > { %s9007_s22 = scalar_lea.hbm %s11312_s2, 8192 }
  0x71   : > { %p9008_p1 = scmp.ne.s32.totalorder %s11312_s2, %s9007_s22  ;;  %p9014_p7 = scmp.lt.u32.totalorder %s9007_s22, %s11312_s2 }
  0x73   : > { %p9010_p2 = pnand %p9008_p1, %p9401_p8 }
  0x75   : > { %p9011_p4 = pneg %p9010_p2 }
  0x77   : > { %p9016_p9 = pnand %p9014_p7, %p9011_p4 }
  0x79   : > { %9019 = shalt.err (!%p9016_p9)
}
  0x7a   : > { %s9020_s21 = scalar_lea.vmem %s249_s19, 8192  ;;  %p9028_p13 = scmp.lt.s32.totalorder %s249_s19, %s249_s19 }
  0x7b   : > { %p9021_p10 = scmp.ne.s32.totalorder %s249_s19, %s9020_s21  ;;  %p9029_p0 = scmp.lt.s32.totalorder %s9020_s21, %s9020_s21 }
  0x7d   : > { %p9023_p11 = pnand %p9021_p10, %p9401_p8  ;;  %p9030_p3 = por %p9029_p0, %p9028_p13 }
  0x7f   : > { %p9024_p12 = pneg %p9023_p11 }
  0x81   : > { %p9031_p5 = pnand %p9030_p3, %p9024_p12 }
  0x83   : > { %9034 = shalt.err (!%p9031_p5)
}
  0x84   : > { %8051 = dma.hbm_to_vmem [thread:$0]  (!%p9387_p6), %s11312_s2, 8192, %s249_s19, [#allocation9], %s9261_s15, %s9261_s15, %s9262_s0  }
  0x85   : > { %s9265_s20 = smov [#allocation13]   ;;  %s9266_s24 = smov [#allocation16]  }
  0x86   : > { %s274_s1 = sshll.u32 %s9265_s20, 4  ;;  %s300_s25 = sshll.u32 %s9266_s24, 4  ;;  %s275_s1 = int_to_ptr.vmem [resolvable:$true] %s274_s1  ;;  %s301_s25 = int_to_ptr.vmem [resolvable:$true] %s300_s25 }
  0x87   : > { %s9035_s30 = scalar_lea.hbm %s11258_s4, 16384 }
  0x88   : > { %p9036_p1 = scmp.ne.s32.totalorder %s11258_s4, %s9035_s30  ;;  %p9042_p7 = scmp.lt.u32.totalorder %s9035_s30, %s11258_s4 }
  0x8a   : > { %p9038_p2 = pnand %p9036_p1, %p9401_p8 }
  0x8c   : > { %p9039_p4 = pneg %p9038_p2 }
  0x8e   : > { %p9044_p9 = pnand %p9042_p7, %p9039_p4 }
  0x90   : > { %9047 = shalt.err (!%p9044_p9)
}
  0x91   : > { %s9048_s19 = scalar_lea.vmem %s275_s1, 16384  ;;  %p9056_p13 = scmp.lt.s32.totalorder %s275_s1, %s275_s1 }
  0x92   : > { %p9049_p10 = scmp.ne.s32.totalorder %s275_s1, %s9048_s19  ;;  %p9057_p0 = scmp.lt.s32.totalorder %s9048_s19, %s9048_s19 }
  0x94   : > { %p9051_p11 = pnand %p9049_p10, %p9401_p8  ;;  %p9058_p3 = por %p9057_p0, %p9056_p13 }
  0x96   : > { %p9052_p12 = pneg %p9051_p11 }
  0x98   : > { %p9059_p5 = pnand %p9058_p3, %p9052_p12 }
  0x9a   : > { %9062 = shalt.err (!%p9059_p5)
}
  0x9b   : > { %s11313_s23 = smov 16   ;;  %s11314_s17 = smov 256  }
  0x9c   : > { %8057 = dma.hbm_to_vmem [thread:$0]  (!%p9387_p6), %s11258_s4, 16384, %s275_s1, [#allocation12], %s11314_s17, %s11314_s17, %s11313_s23  }
  0x9d   : > { %s9063_s30 = scalar_lea.hbm %s11260_s6, 2048 }
  0x9e   : > { %p9064_p1 = scmp.ne.s32.totalorder %s11260_s6, %s9063_s30  ;;  %p9070_p7 = scmp.lt.u32.totalorder %s9063_s30, %s11260_s6 }
  0xa0   : > { %p9066_p2 = pnand %p9064_p1, %p9401_p8 }
  0xa2   : > { %p9067_p4 = pneg %p9066_p2 }
  0xa4   : > { %p9072_p9 = pnand %p9070_p7, %p9067_p4 }
  0xa6   : > { %9075 = shalt.err (!%p9072_p9)
}
  0xa7   : > { %s9076_s19 = scalar_lea.vmem %s301_s25, 2048  ;;  %p9084_p13 = scmp.lt.s32.totalorder %s301_s25, %s301_s25 }
  0xa8   : > { %p9077_p10 = scmp.ne.s32.totalorder %s301_s25, %s9076_s19  ;;  %p9085_p0 = scmp.lt.s32.totalorder %s9076_s19, %s9076_s19 }
  0xaa   : > { %p9079_p11 = pnand %p9077_p10, %p9401_p8  ;;  %p9086_p3 = por %p9085_p0, %p9084_p13 }
  0xac   : > { %p9080_p12 = pneg %p9079_p11 }
  0xae   : > { %p9087_p5 = pnand %p9086_p3, %p9080_p12 }
  0xb0   : > { %9090 = shalt.err (!%p9087_p5)
}
  0xb1   : > { %8063 = dma.hbm_to_vmem [thread:$0]  (!%p9387_p6), %s11260_s6, 2048, %s301_s25, [#allocation15], %s9261_s15, %s9261_s15, %s9262_s0  }
  0xb2   : > { %s6686_s18 = sadd.s32 4294967294, %s9255_s11   ;;  %s11315_s16 = sld [smem:[#allocation24_spill]] }
  0xb3   : > { %s35_s24 = sadd.s32 1, %s9247_s9  ;;  %s11316_s7 = sld [smem:[#allocation23_spill]] }
  0xb4   : > { %s38_s22 = sadd.s32 1, %s9251_s10  ;;  %p36_p8 = scmp.ge.s32.totalorder %s35_s24, 2 }
  0xb5   : > { %s45_s30 = sadd.s32 1, %s9235_s29  ;;  %p52_p1 = scmp.ne.s32.totalorder %s9235_s29, %s9231_s28 }
  0xb6   : > { %p53_p2 = scmp.eq.s32.totalorder %s9255_s11, 0  ;;  %s11398_s24 = smov (%p36_p8, %s35_s24), 0 }
  0xb7   : > { %s11317_s14 = sld [smem:[#allocation27_spill]]  ;;  %s11400_s22 = smov (!%p36_p8, %s38_s22), %s9251_s10 }
  0xb8   : > { %p9540_p4 = por %p53_p2, %p52_p1  ;;  %p58_p6 = scmp.ne.s32.totalorder %s9231_s28, %s9227_s27 }
  0xb9   : > { %p40_p7 = scmp.ge.s32.totalorder %s11400_s22, 2  ;;  %s195_s0 = ssub.s32 %s9247_s9, %s11398_s24 }
  0xba   : > { %p11319_p9 = scmp.ne.s32.totalorder %s11303_s13, 0  ;;  %s199_s8 = sadd.s32 1, %s9223_s26 }
  0xbb   : > { %s11402_s22 = smov (%p40_p7, %s11400_s22), 0  ;;  %p209_p11 = scmp.ne.s32.totalorder %s9223_s26, %s11315_s16 }
  0xbc   : > { %p9550_p10 = por %p11319_p9, %p58_p6  ;;  %p215_p12 = scmp.ne.s32.totalorder %s11315_s16, %s11316_s7 }
  0xbd   : > { %s42_s12 = ssub.s32 %s9251_s10, %s11402_s22  ;;  %p216_p13 = scmp.eq.s32.totalorder %s6686_s18, 3 }
  0xbe   : > { %p43_p0 = scmp.eq.s32.totalorder %s42_s12, 0  ;;  %s196_s27 = sor.u32 %s195_s0, %s42_s12 }
  0xbf   : > { %p197_p3 = scmp.eq.s32.totalorder %s196_s27, 0  ;;  %p11321_p5 = scmp.ne.s32.totalorder %s11317_s14, 0 }
  0xc0   : > { %s9570_s19 = scalar_select %p43_p0, %s9235_s29, %s45_s30  }
  0xc1   : > { %p9565_p8 = por %p11321_p5, %p209_p11  ;;  %p9575_p1 = por %p216_p13, %p215_p12 }
  0xc2   : > { %s9573_s1 = scalar_select %p197_p3, %s9223_s26, %s199_s8  }
  0xc3   : > { %s11322_s21 = scalar_select %p9565_p8, 1, 0 }
  0xc4   : > { %s11323_s20 = scalar_select %p9575_p1, 1, 0 }
  0xc5   : > { %p8078_p2 = scmp.lt.s32.totalorder %s9255_s11, 4  ;;  %s314_s16 = sand.u32 1, %s9235_s29  }
  0xc6   : > { %s7150_s7 = sshll.u32 %s9251_s10, 12  ;;  %s6695_s18 = sshll.u32 %s314_s16, 8 }
  0xc7   : > { %s11324_s12 = sld [smem:[#allocation51_spill]]  ;;  %s318_s30 = scalar_lea.vmem [#allocation5], %s6695_s18 }
  0xc8   : > { %s325_s8 = sshll.u32 %s318_s30, 4  ;;  %p9589_p6 = pnand %p8078_p2, %p9540_p4  ;;  %s9593_s8 = int_to_ptr.vmem [resolvable:$true] %s325_s8 }
  0xc9   : > { %s9595_s3 = scalar_lea.sflag [#allocation6], %s314_s16 }
  0xca   : > { %p9093_p9 = pneg %p9589_p6 }
  0xcd   : > { %s9585_s14 = scalar_lea.hbm %s11324_s12, %s7150_s7  ;;  %s9096_s18 = scalar_lea.hbm %s11324_s12, 8192 }
  0xce   : > { %s9091_s2 = scalar_lea.hbm %s9585_s14, 4096  ;;  %p9097_p4 = scmp.lt.u32.totalorder %s9585_s14, %s11324_s12 }
  0xcf   : > { %p9092_p7 = scmp.ne.s32.totalorder %s9585_s14, %s9091_s2  ;;  %p9098_p13 = scmp.lt.u32.totalorder %s9096_s18, %s9091_s2 }
  0xd0   : > { %p9100_p3 = scmp.lt.u32.totalorder %s9091_s2, %s9585_s14 }
  0xd1   : > { %p9094_p11 = pnand %p9093_p9, %p9092_p7  ;;  %p9099_p0 = por %p9098_p13, %p9097_p4 }
  0xd3   : > { %p9095_p12 = pneg %p9094_p11  ;;  %p9101_p5 = por %p9100_p3, %p9099_p0 }
  0xd5   : > { %p9102_p2 = pnand %p9101_p5, %p9095_p12 }
  0xd7   : > { %9105 = shalt.err (!%p9102_p2)
}
  0xd8   : > { %s9106_s16 = scalar_lea.vmem %s9593_s8, 4096  ;;  %s9267_s7 = smov [#allocation5]  }
  0xd9   : > { %p9107_p7 = scmp.ne.s32.totalorder %s9593_s8, %s9106_s16  ;;  %s9111_s15 = sshll.u32 %s9267_s7, 4  ;;  %s9112_s15 = int_to_ptr.vmem [resolvable:$false] %s9111_s15 }
  0xda   : > { %s9113_s0 = scalar_lea.vmem %s9112_s15, 8192  ;;  %p9114_p8 = scmp.lt.s32.totalorder %s9593_s8, %s9112_s15 }
  0xdb   : > { %p9109_p11 = pnand %p9107_p7, %p9093_p9  ;;  %p9115_p4 = scmp.lt.s32.totalorder %s9113_s0, %s9106_s16 }
  0xdd   : > { %p9110_p1 = pneg %p9109_p11  ;;  %p9116_p13 = por %p9115_p4, %p9114_p8 }
  0xdf   : > { %p9117_p0 = pnand %p9116_p13, %p9110_p1 }
  0xe1   : > { %9120 = shalt.err (!%p9117_p0)
}
  0xe2   : > { %8067 = dma.hbm_to_vmem [thread:$0]  (!%p9589_p6), %s9585_s14, 4096, %s9593_s8, %s9595_s3, %s11314_s17, %s11314_s17, %s11313_s23  }
  0xe3   : > { %s11326_s2 = sld [smem:[#allocation28_spill]] }
  0xe9   : > { %p11327_p9 = scmp.ne.s32.totalorder %s11326_s2, 0 }
  0xeb   : > { %337 = sbr.rel (%p11327_p9) target bundleno = 3503 (0xdaf), region = 48 }
  0xf2   : > { %s339_s18 = sand.u32 1, %s9231_s28  }
  0xf3   : > { %s6699_s30 = sshll.u32 %s339_s18, 8  ;;  %s340_s16 = scalar_lea.sflag [#allocation6], %s339_s18 }
  0xf4   : > { %s9629_s7 = scalar_lea.vmem [#allocation5], %s6699_s30 }
  0xf5   : > { %9194 = dma.done.wait (%p9550_p10), %s340_s16, 4096  }
  0xf6   : > { %9196 = vsyncadd (%p9550_p10), %s340_s16, 4294963200  ;;  %p11328_p8 = scmp.ne.s32.totalorder %s11303_s13, 0 }
  0xf8   : > { %9198 = dma.done.wait (%p11328_p8), [#allocation9], 24576  }
  0xf9   : > { %9200 = vsyncadd (%p11328_p8), [#allocation9], 4294942720 }
  0xfa   : > { %9202 = dma.done.wait (%p11328_p8), [#allocation12], 24576  }
  0xfb   : > { %9204 = vsyncadd (%p11328_p8), [#allocation12], 4294942720 }
  0xfc   : > { %9206 = dma.done.wait (%p11328_p8), [#allocation15], 4096  }
  0xfd   : > { %9208 = vsyncadd (%p11328_p8), [#allocation15], 4294963200  ;;  %s11329_s3 = sld [smem:[#allocation24_spill]]  ;;  %s11330_s14 = sld [smem:[#allocation25_spill]] }
 0x103   : > { %s395_s23 = sand.u32 1, %s11329_s3   ;;  %p6707_p10 = scmp.ne.s32.totalorder %s11330_s14, 0 }
 0x104   : > { %s6706_s17 = sshll.u32 %s395_s23, 8 }
 0x105   : > { %s9650_s25 = scalar_lea.vmem [#allocation17], %s6706_s17  ;;  %403 = sbr.rel (%p6707_p10) target bundleno = 835 (0x343), region = 80 }
 0x10c   : > { %v8188_v0 = vld [vmem:[#allocation10 + $0x80] ss:$8 sps:$4 sm:$0xff]   ;;  %v8192_v4 = vld [vmem:[#allocation10 + $0x90] ss:$8 sps:$4 sm:$0xff]   ;;  %v9654_v32 = vld [vmem:[%s9629_s7 + $0x4] ss:$16 sps:$4 sm:$0xff]  }
 0x10d   : > { %v8189_v1 = vld [vmem:[#allocation10 + $0x180] ss:$8 sps:$4 sm:$0xff]   ;;  %7153 = vmatprep.subr.bf16.mxu0 %v8188_v0  ;;  %v8193_v5 = vld [vmem:[#allocation10 + $0x190] ss:$8 sps:$4 sm:$0xff]   ;;  %v9657_v33 = vld [vmem:[%s9629_s7 + $0xc] ss:$16 sps:$4 sm:$0xff]   ;;  %916 = vmatprep.mubr.bf16.mxu0 %v9654_v32 }
 0x10e   : > { %v8190_v2 = vld [vmem:[#allocation10] ss:$8 sps:$4 sm:$0xff]   ;;  %7217 = vmatprep.subr.bf16.mxu1 %v8189_v1  ;;  %v8194_v6 = vld [vmem:[#allocation10 + $0x10] ss:$8 sps:$4 sm:$0xff]   ;;  %1013 = vmatprep.mubr.bf16.mxu1 %v9657_v33  ;;  %v9670_v40 = vld [vmem:[%s9629_s7 + $0x24] ss:$16 sps:$4 sm:$0xff]  }
 0x10f   : > { %v8191_v3 = vld [vmem:[#allocation10 + $0x100] ss:$8 sps:$4 sm:$0xff]   ;;  %7154 = vmatpush3.bf16.msra.mxu0 %v8190_v2  ;;  %v8195_v7 = vld [vmem:[#allocation10 + $0x110] ss:$8 sps:$4 sm:$0xff]   ;;  %v9673_v41 = vld [vmem:[%s9629_s7 + $0x2c] ss:$16 sps:$4 sm:$0xff]  }
 0x110   : > { %7218 = vmatpush3.bf16.msra.mxu1 %v8191_v3  ;;  %7155 = vmatprep.subr.bf16.mxu0 %v8192_v4  ;;  %v8196_v8 = vld [vmem:[#allocation10 + $0xa0] ss:$8 sps:$4 sm:$0xff]   ;;  %v8200_v12 = vld [vmem:[#allocation10 + $0xb0] ss:$8 sps:$4 sm:$0xff]   ;;  %v9686_v48 = vld [vmem:[%s9629_s7 + $0x44] ss:$16 sps:$4 sm:$0xff]  }
 0x111   : > { %7219 = vmatprep.subr.bf16.mxu1 %v8193_v5  ;;  %v8197_v9 = vld [vmem:[#allocation10 + $0x1a0] ss:$8 sps:$4 sm:$0xff]   ;;  %v8201_v13 = vld [vmem:[#allocation10 + $0x1b0] ss:$8 sps:$4 sm:$0xff]   ;;  %v9689_v49 = vld [vmem:[%s9629_s7 + $0x4c] ss:$16 sps:$4 sm:$0xff]  }
 0x112   : > { %v8198_v10 = vld [vmem:[#allocation10 + $0x20] ss:$8 sps:$4 sm:$0xff]   ;;  %v8202_v14 = vld [vmem:[#allocation10 + $0x30] ss:$8 sps:$4 sm:$0xff]   ;;  %v9702_v56 = vld [vmem:[%s9629_s7 + $0x64] ss:$16 sps:$4 sm:$0xff]  }
 0x113   : > { %7156 = vmatpush3.bf16.msra.mxu0 %v8194_v6  ;;  %v8199_v11 = vld [vmem:[#allocation10 + $0x120] ss:$8 sps:$4 sm:$0xff]   ;;  %v8203_v15 = vld [vmem:[#allocation10 + $0x130] ss:$8 sps:$4 sm:$0xff]   ;;  %v9705_v57 = vld [vmem:[%s9629_s7 + $0x6c] ss:$16 sps:$4 sm:$0xff]  }
 0x114   : > { %7220 = vmatpush3.bf16.msra.mxu1 %v8195_v7  ;;  %7157 = vmatprep.subr.bf16.mxu0 %v8196_v8  ;;  %v8204_v16 = vld [vmem:[#allocation10 + $0xc0] ss:$8 sps:$4 sm:$0xff]   ;;  %v8208_v20 = vld [vmem:[#allocation10 + $0xd0] ss:$8 sps:$4 sm:$0xff]   ;;  %v9716_v0 = vld [vmem:[%s9629_s7 + $0x84] ss:$16 sps:$4 sm:$0xff]  }
 0x115   : > { %7221 = vmatprep.subr.bf16.mxu1 %v8197_v9  ;;  %v8205_v17 = vld [vmem:[#allocation10 + $0x1c0] ss:$8 sps:$4 sm:$0xff]   ;;  %v8209_v21 = vld [vmem:[#allocation10 + $0x1d0] ss:$8 sps:$4 sm:$0xff]   ;;  %v9721_v1 = vld [vmem:[%s9629_s7 + $0x8c] ss:$16 sps:$4 sm:$0xff]  }
 0x116   : > { %v8206_v18 = vld [vmem:[#allocation10 + $0x40] ss:$8 sps:$4 sm:$0xff]   ;;  %v8210_v22 = vld [vmem:[#allocation10 + $0x50] ss:$8 sps:$4 sm:$0xff]   ;;  %v9732_v8 = vld [vmem:[%s9629_s7 + $0xa4] ss:$16 sps:$4 sm:$0xff]  }
 0x117   : > { %7158 = vmatpush3.bf16.msra.mxu0 %v8198_v10  ;;  %v8207_v19 = vld [vmem:[#allocation10 + $0x140] ss:$8 sps:$4 sm:$0xff]   ;;  %v8211_v23 = vld [vmem:[#allocation10 + $0x150] ss:$8 sps:$4 sm:$0xff]   ;;  %v9735_v9 = vld [vmem:[%s9629_s7 + $0xac] ss:$16 sps:$4 sm:$0xff]  }
 0x118   : > { %7222 = vmatpush3.bf16.msra.mxu1 %v8199_v11  ;;  %7159 = vmatprep.subr.bf16.mxu0 %v8200_v12  ;;  %v8212_v24 = vld [vmem:[#allocation10 + $0xe0] ss:$8 sps:$4 sm:$0xff]   ;;  %v8216_v28 = vld [vmem:[#allocation10 + $0xf0] ss:$8 sps:$4 sm:$0xff]   ;;  %s9268_s13 = smov 64   ;;  %vm1672_vm0 = vcmask 523264  }
 0x119   : > { %7223 = vmatprep.subr.bf16.mxu1 %v8201_v13  ;;  %v8213_v25 = vld [vmem:[#allocation10 + $0x1e0] ss:$8 sps:$4 sm:$0xff]   ;;  %v8217_v29 = vld [vmem:[#allocation10 + $0x1f0] ss:$8 sps:$4 sm:$0xff]  }
 0x11a   : > { %v8214_v26 = vld [vmem:[#allocation10 + $0x60] ss:$8 sps:$4 sm:$0xff]   ;;  %v8218_v30 = vld [vmem:[#allocation10 + $0x70] ss:$8 sps:$4 sm:$0xff]  }
 0x11b   : > { %7160 = vmatpush3.bf16.msra.mxu0 %v8202_v14  ;;  %v8215_v27 = vld [vmem:[#allocation10 + $0x160] ss:$8 sps:$4 sm:$0xff]   ;;  %v8219_v31 = vld [vmem:[#allocation10 + $0x170] ss:$8 sps:$4 sm:$0xff]  }
 0x11c   : > { %7224 = vmatpush3.bf16.msra.mxu1 %v8203_v15  ;;  %7161 = vmatprep.subr.bf16.mxu0 %v8204_v16  ;;  %v9661_v34 = vld [vmem:[%s9629_s7] ss:$16 sps:$4 sm:$0xff]   ;;  %v9664_v35 = vld [vmem:[%s9629_s7 + $0x8] ss:$16 sps:$4 sm:$0xff]   ;;  %v9748_v16 = vld [vmem:[%s9629_s7 + $0xc4] ss:$16 sps:$4 sm:$0xff]  }
 0x11d   : > { %7225 = vmatprep.subr.bf16.mxu1 %v8205_v17  ;;  %v8226_v36 = vld [vmem:[#allocation11 + $0x80] ss:$8 sps:$4 sm:$0xff]   ;;  %v8236_v44 = vld [vmem:[#allocation11 + $0x90] ss:$8 sps:$4 sm:$0xff]   ;;  %v9751_v17 = vld [vmem:[%s9629_s7 + $0xcc] ss:$16 sps:$4 sm:$0xff]  }
 0x11e   : > { %v8227_v37 = vld [vmem:[#allocation11 + $0x180] ss:$8 sps:$4 sm:$0xff]   ;;  %v8237_v45 = vld [vmem:[#allocation11 + $0x190] ss:$8 sps:$4 sm:$0xff]  }
 0x11f   : > { %7162 = vmatpush3.bf16.msra.mxu0 %v8206_v18  ;;  %v8228_v38 = vld [vmem:[#allocation11] ss:$8 sps:$4 sm:$0xff]   ;;  %v8238_v46 = vld [vmem:[#allocation11 + $0x10] ss:$8 sps:$4 sm:$0xff]  }
 0x120   : > { %7226 = vmatpush3.bf16.msra.mxu1 %v8207_v19  ;;  %7163 = vmatprep.subr.bf16.mxu0 %v8208_v20  ;;  %v8229_v39 = vld [vmem:[#allocation11 + $0x100] ss:$8 sps:$4 sm:$0xff]   ;;  %v8239_v47 = vld [vmem:[#allocation11 + $0x110] ss:$8 sps:$4 sm:$0xff]  }
 0x121   : > { %7227 = vmatprep.subr.bf16.mxu1 %v8209_v21  ;;  %v9676_v42 = vld [vmem:[%s9629_s7 + $0x20] ss:$16 sps:$4 sm:$0xff]   ;;  %v9680_v43 = vld [vmem:[%s9629_s7 + $0x28] ss:$16 sps:$4 sm:$0xff]  }
 0x122   : > { %v9692_v50 = vld [vmem:[%s9629_s7 + $0x40] ss:$16 sps:$4 sm:$0xff]   ;;  %v9695_v51 = vld [vmem:[%s9629_s7 + $0x48] ss:$16 sps:$4 sm:$0xff]  }
 0x123   : > { %7164 = vmatpush3.bf16.msra.mxu0 %v8210_v22  ;;  %v8246_v52 = vld [vmem:[#allocation11 + $0xa0] ss:$8 sps:$4 sm:$0xff]   ;;  %v8256_v60 = vld [vmem:[#allocation11 + $0xb0] ss:$8 sps:$4 sm:$0xff]  }
 0x124   : > { %7228 = vmatpush3.bf16.msra.mxu1 %v8211_v23  ;;  %7165 = vmatprep.subr.bf16.mxu0 %v8212_v24  ;;  %v8247_v53 = vld [vmem:[#allocation11 + $0x1a0] ss:$8 sps:$4 sm:$0xff]   ;;  %v8257_v61 = vld [vmem:[#allocation11 + $0x1b0] ss:$8 sps:$4 sm:$0xff]   ;;  %v9764_v24 = vld [vmem:[%s9629_s7 + $0xe4] ss:$16 sps:$4 sm:$0xff]  }
 0x125   : > { %7229 = vmatprep.subr.bf16.mxu1 %v8213_v25  ;;  %v8248_v54 = vld [vmem:[#allocation11 + $0x20] ss:$8 sps:$4 sm:$0xff]   ;;  %v8258_v62 = vld [vmem:[#allocation11 + $0x30] ss:$8 sps:$4 sm:$0xff]   ;;  %v9767_v25 = vld [vmem:[%s9629_s7 + $0xec] ss:$16 sps:$4 sm:$0xff]  }
 0x126   : > { %v8249_v55 = vld [vmem:[#allocation11 + $0x120] ss:$8 sps:$4 sm:$0xff]   ;;  %v8259_v63 = vld [vmem:[#allocation11 + $0x130] ss:$8 sps:$4 sm:$0xff]  }
 0x127   : > { %7166 = vmatpush3.bf16.msra.mxu0 %v8214_v26  ;;  %v9709_v58 = vld [vmem:[%s9629_s7 + $0x60] ss:$16 sps:$4 sm:$0xff]   ;;  %v9712_v59 = vld [vmem:[%s9629_s7 + $0x68] ss:$16 sps:$4 sm:$0xff]  }
 0x128   : > { %7230 = vmatpush3.bf16.msra.mxu1 %v8215_v27  ;;  %7167 = vmatprep.subr.bf16.mxu0 %v8216_v28  ;;  %v9726_v2 = vld [vmem:[%s9629_s7 + $0x80] ss:$16 sps:$4 sm:$0xff]   ;;  %v9729_v3 = vld [vmem:[%s9629_s7 + $0x88] ss:$16 sps:$4 sm:$0xff]  }
 0x129   : > { %7231 = vmatprep.subr.bf16.mxu1 %v8217_v29  ;;  %v8266_v4 = vld [vmem:[#allocation11 + $0xc0] ss:$8 sps:$4 sm:$0xff]   ;;  %v8276_v10 = vld [vmem:[#allocation11 + $0xd0] ss:$8 sps:$4 sm:$0xff]  }
 0x12a   : > { %v8267_v5 = vld [vmem:[#allocation11 + $0x1c0] ss:$8 sps:$4 sm:$0xff]   ;;  %v8277_v11 = vld [vmem:[#allocation11 + $0x1d0] ss:$8 sps:$4 sm:$0xff]  }
 0x12b   : > { %7168 = vmatpush3.bf16.msra.mxu0 %v8218_v30  ;;  %v8268_v6 = vld [vmem:[#allocation11 + $0x40] ss:$8 sps:$4 sm:$0xff]   ;;  %v8278_v14 = vld [vmem:[#allocation11 + $0x50] ss:$8 sps:$4 sm:$0xff]  }
 0x12c   : > { %7232 = vmatpush3.bf16.msra.mxu1 %v8219_v31  ;;  %7281 = vmatprep.subr.bf16.mxu0 %v8226_v36  ;;  %v8269_v7 = vld [vmem:[#allocation11 + $0x140] ss:$8 sps:$4 sm:$0xff]   ;;  %v8279_v15 = vld [vmem:[#allocation11 + $0x150] ss:$8 sps:$4 sm:$0xff]   ;;  %v8300_v31 = vld [vmem:[#allocation10 + $0x84] ss:$8 sps:$4 sm:$0xff]  }
 0x12d   : > { %7345 = vmatprep.subr.bf16.mxu1 %v8227_v37  ;;  %v9742_v12 = vld [vmem:[%s9629_s7 + $0xa0] ss:$16 sps:$4 sm:$0xff]   ;;  %v9745_v13 = vld [vmem:[%s9629_s7 + $0xa8] ss:$16 sps:$4 sm:$0xff]   ;;  %v8301_v36 = vld [vmem:[#allocation10 + $0x184] ss:$8 sps:$4 sm:$0xff]  }
 0x12e   : > { %917 = vmatmul.mubr.bf16.vlgmr.msra.gmra.mrb[0].mxu0 %v9661_v34  ;;  %v8286_v18 = vld [vmem:[#allocation11 + $0xe0] ss:$8 sps:$4 sm:$0xff]   ;;  %v8296_v26 = vld [vmem:[#allocation11 + $0xf0] ss:$8 sps:$4 sm:$0xff]  }
 0x12f   : > { %1014 = vmatmul.mubr.bf16.vlgmr.msra.gmra.mrb[0].mxu1 %v9664_v35  ;;  %7282 = vmatpush3.bf16.msra.mxu0 %v8228_v38  ;;  %v8287_v19 = vld [vmem:[#allocation11 + $0x1e0] ss:$8 sps:$4 sm:$0xff]   ;;  %v8297_v27 = vld [vmem:[#allocation11 + $0x1f0] ss:$8 sps:$4 sm:$0xff]   ;;  %v8302_v38 = vld [vmem:[#allocation10 + $0x4] ss:$8 sps:$4 sm:$0xff]  }
 0x130   : > { %7346 = vmatpush3.bf16.msra.mxu1 %v8229_v39  ;;  %924 = vmatprep.mubr.bf16.mxu0 %v9670_v40  ;;  %v8288_v20 = vld [vmem:[#allocation11 + $0x60] ss:$8 sps:$4 sm:$0xff]   ;;  %v8298_v28 = vld [vmem:[#allocation11 + $0x70] ss:$8 sps:$4 sm:$0xff]   ;;  %v8303_v39 = vld [vmem:[#allocation10 + $0x104] ss:$8 sps:$4 sm:$0xff]  }
 0x131   : > { %1021 = vmatprep.mubr.bf16.mxu1 %v9673_v41  ;;  %7283 = vmatprep.subr.bf16.mxu0 %v8236_v44  ;;  %v8289_v21 = vld [vmem:[#allocation11 + $0x160] ss:$8 sps:$4 sm:$0xff]   ;;  %v8299_v29 = vld [vmem:[#allocation11 + $0x170] ss:$8 sps:$4 sm:$0xff]   ;;  %v8304_v44 = vld [vmem:[#allocation10 + $0x94] ss:$8 sps:$4 sm:$0xff]  }
 0x132   : > { %7347 = vmatprep.subr.bf16.mxu1 %v8237_v45  ;;  %v9758_v22 = vld [vmem:[%s9629_s7 + $0xc0] ss:$16 sps:$4 sm:$0xff]   ;;  %v9761_v23 = vld [vmem:[%s9629_s7 + $0xc8] ss:$16 sps:$4 sm:$0xff]   ;;  %v8305_v45 = vld [vmem:[#allocation10 + $0x194] ss:$8 sps:$4 sm:$0xff]  }
 0x133   : > { %7284 = vmatpush3.bf16.msra.mxu0 %v8238_v46  ;;  %v9774_v30 = vld [vmem:[%s9629_s7 + $0xe0] ss:$16 sps:$4 sm:$0xff]   ;;  %v9777_v37 = vld [vmem:[%s9629_s7 + $0xe8] ss:$16 sps:$4 sm:$0xff]   ;;  %v8306_v46 = vld [vmem:[#allocation10 + $0x14] ss:$8 sps:$4 sm:$0xff]  }
 0x134   : > { %7348 = vmatpush3.bf16.msra.mxu1 %v8239_v47  ;;  %7285 = vmatprep.subr.bf16.mxu0 %v8246_v52  ;;  %v8307_v47 = vld [vmem:[#allocation10 + $0x114] ss:$8 sps:$4 sm:$0xff]   ;;  %v8308_v52 = vld [vmem:[#allocation10 + $0xa4] ss:$8 sps:$4 sm:$0xff]  }
 0x135   : > { %7349 = vmatprep.subr.bf16.mxu1 %v8247_v53  ;;  %v8309_v53 = vld [vmem:[#allocation10 + $0x1a4] ss:$8 sps:$4 sm:$0xff]  }
 0x136   : > { %925 = vmatmul.mubr.bf16.gmra.mrb[4].mxu0 %v9676_v42 }
 0x137   : > { %1022 = vmatmul.mubr.bf16.gmra.mrb[4].mxu1 %v9680_v43  ;;  %932 = vmatprep.mubr.bf16.mxu0 %v9686_v48 }
 0x138   : > { %1029 = vmatprep.mubr.bf16.mxu1 %v9689_v49  ;;  %7286 = vmatpush3.bf16.msra.mxu0 %v8248_v54  ;;  %v8310_v54 = vld [vmem:[#allocation10 + $0x24] ss:$8 sps:$4 sm:$0xff]  }
 0x139   : > { %7350 = vmatpush3.bf16.msra.mxu1 %v8249_v55  ;;  %7287 = vmatprep.subr.bf16.mxu0 %v8256_v60  ;;  %v8311_v55 = vld [vmem:[#allocation10 + $0x124] ss:$8 sps:$4 sm:$0xff]   ;;  %v8312_v60 = vld [vmem:[#allocation10 + $0xb4] ss:$8 sps:$4 sm:$0xff]  }
 0x13a   : > { %7351 = vmatprep.subr.bf16.mxu1 %v8257_v61  ;;  %v8313_v61 = vld [vmem:[#allocation10 + $0x1b4] ss:$8 sps:$4 sm:$0xff]  }
 0x13c   : > { %7288 = vmatpush3.bf16.msra.mxu0 %v8258_v62  ;;  %v8314_v62 = vld [vmem:[#allocation10 + $0x34] ss:$8 sps:$4 sm:$0xff]  }
 0x13d   : > { %7352 = vmatpush3.bf16.msra.mxu1 %v8259_v63  ;;  %7289 = vmatprep.subr.bf16.mxu0 %v8266_v4  ;;  %v8315_v63 = vld [vmem:[#allocation10 + $0x134] ss:$8 sps:$4 sm:$0xff]   ;;  %v8316_v4 = vld [vmem:[#allocation10 + $0xc4] ss:$8 sps:$4 sm:$0xff]  }
 0x13e   : > { %933 = vmatmul.mubr.bf16.gmra.mrb[8].mxu0 %v9692_v50  ;;  %7353 = vmatprep.subr.bf16.mxu1 %v8267_v5  ;;  %v8317_v5 = vld [vmem:[#allocation10 + $0x1c4] ss:$8 sps:$4 sm:$0xff]  }
 0x13f   : > { %1030 = vmatmul.mubr.bf16.gmra.mrb[8].mxu1 %v9695_v51  ;;  %940 = vmatprep.mubr.bf16.mxu0 %v9702_v56 }
 0x140   : > { %1037 = vmatprep.mubr.bf16.mxu1 %v9705_v57  ;;  %7290 = vmatpush3.bf16.msra.mxu0 %v8268_v6  ;;  %v8318_v6 = vld [vmem:[#allocation10 + $0x44] ss:$8 sps:$4 sm:$0xff]  }
 0x141   : > { %7354 = vmatpush3.bf16.msra.mxu1 %v8269_v7  ;;  %7291 = vmatprep.subr.bf16.mxu0 %v8276_v10  ;;  %v8319_v7 = vld [vmem:[#allocation10 + $0x144] ss:$8 sps:$4 sm:$0xff]   ;;  %v8320_v10 = vld [vmem:[#allocation10 + $0xd4] ss:$8 sps:$4 sm:$0xff]  }
 0x142   : > { %7355 = vmatprep.subr.bf16.mxu1 %v8277_v11  ;;  %v8321_v11 = vld [vmem:[#allocation10 + $0x1d4] ss:$8 sps:$4 sm:$0xff]  }
 0x144   : > { %7292 = vmatpush3.bf16.msra.mxu0 %v8278_v14  ;;  %v8322_v14 = vld [vmem:[#allocation10 + $0x54] ss:$8 sps:$4 sm:$0xff]  }
 0x145   : > { %7356 = vmatpush3.bf16.msra.mxu1 %v8279_v15  ;;  %7293 = vmatprep.subr.bf16.mxu0 %v8286_v18  ;;  %v8323_v15 = vld [vmem:[#allocation10 + $0x154] ss:$8 sps:$4 sm:$0xff]   ;;  %v8324_v18 = vld [vmem:[#allocation10 + $0xe4] ss:$8 sps:$4 sm:$0xff]  }
 0x146   : > { %941 = vmatmul.mubr.bf16.gmra.mrb[12].mxu0 %v9709_v58  ;;  %7357 = vmatprep.subr.bf16.mxu1 %v8287_v19  ;;  %v8325_v19 = vld [vmem:[#allocation10 + $0x1e4] ss:$8 sps:$4 sm:$0xff]  }
 0x147   : > { %1038 = vmatmul.mubr.bf16.gmra.mrb[12].mxu1 %v9712_v59  ;;  %948 = vmatprep.mubr.bf16.mxu0 %v9716_v0 }
 0x148   : > { %1045 = vmatprep.mubr.bf16.mxu1 %v9721_v1  ;;  %7294 = vmatpush3.bf16.msra.mxu0 %v8288_v20  ;;  %v8326_v20 = vld [vmem:[#allocation10 + $0x64] ss:$8 sps:$4 sm:$0xff]  }
 0x149   : > { %7358 = vmatpush3.bf16.msra.mxu1 %v8289_v21  ;;  %7295 = vmatprep.subr.bf16.mxu0 %v8296_v26  ;;  %v8327_v21 = vld [vmem:[#allocation10 + $0x164] ss:$8 sps:$4 sm:$0xff]   ;;  %v8328_v26 = vld [vmem:[#allocation10 + $0xf4] ss:$8 sps:$4 sm:$0xff]  }
 0x14a   : > { %7359 = vmatprep.subr.bf16.mxu1 %v8297_v27  ;;  %v8329_v27 = vld [vmem:[#allocation10 + $0x1f4] ss:$8 sps:$4 sm:$0xff]  }
 0x14c   : > { %7296 = vmatpush3.bf16.msra.mxu0 %v8298_v28  ;;  %v8330_v28 = vld [vmem:[#allocation10 + $0x74] ss:$8 sps:$4 sm:$0xff]  }
 0x14d   : > { %7360 = vmatpush3.bf16.msra.mxu1 %v8299_v29  ;;  %7409 = vmatprep.subr.bf16.mxu0 %v8300_v31  ;;  %v8331_v29 = vld [vmem:[#allocation10 + $0x174] ss:$8 sps:$4 sm:$0xff]   ;;  %v8332_v31 = vld [vmem:[#allocation11 + $0x84] ss:$8 sps:$4 sm:$0xff]  }
 0x14e   : > { %949 = vmatmul.mubr.bf16.gmra.mrb[16].mxu0 %v9726_v2  ;;  %7473 = vmatprep.subr.bf16.mxu1 %v8301_v36  ;;  %v8333_v36 = vld [vmem:[#allocation11 + $0x184] ss:$8 sps:$4 sm:$0xff]  }
 0x14f   : > { %1046 = vmatmul.mubr.bf16.gmra.mrb[16].mxu1 %v9729_v3  ;;  %956 = vmatprep.mubr.bf16.mxu0 %v9732_v8 }
 0x150   : > { %1053 = vmatprep.mubr.bf16.mxu1 %v9735_v9 }
 0x156   : > { %957 = vmatmul.mubr.bf16.gmra.mrb[20].mxu0 %v9742_v12 }
 0x157   : > { %1054 = vmatmul.mubr.bf16.gmra.mrb[20].mxu1 %v9745_v13  ;;  %964 = vmatprep.mubr.bf16.mxu0 %v9748_v16 }
 0x158   : > { %1061 = vmatprep.mubr.bf16.mxu1 %v9751_v17 }
 0x15e   : > { %965 = vmatmul.mubr.bf16.gmra.mrb[24].mxu0 %v9758_v22 }
 0x15f   : > { %1062 = vmatmul.mubr.bf16.gmra.mrb[24].mxu1 %v9761_v23  ;;  %972 = vmatprep.mubr.bf16.mxu0 %v9764_v24 }
 0x160   : > { %1069 = vmatprep.mubr.bf16.mxu1 %v9767_v25 }
 0x166   : > { %973 = vmatmul.mubr.bf16.gmra.mrb[28].mxu0 %v9774_v30 }
 0x167   : > { %1070 = vmatmul.mubr.bf16.gmra.mrb[28].mxu1 %v9777_v37  ;;  %1366 = vmatprep.mubr.bf16.mxu0 %v9654_v32 }
 0x168   : > { %1463 = vmatprep.mubr.bf16.mxu1 %v9657_v33 }
 0x16e   : > { %1367 = vmatmul.mubr.bf16.vlgmr.msra.gmra.mrb[32].mxu0 %v9661_v34 }
 0x16f   : > { %1464 = vmatmul.mubr.bf16.vlgmr.msra.gmra.mrb[32].mxu1 %v9664_v35  ;;  %7410 = vmatpush3.bf16.msra.mxu0 %v8302_v38  ;;  %v8334_v38 = vld [vmem:[#allocation11 + $0x4] ss:$8 sps:$4 sm:$0xff]  }
 0x170   : > { %7474 = vmatpush3.bf16.msra.mxu1 %v8303_v39  ;;  %1374 = vmatprep.mubr.bf16.mxu0 %v9670_v40  ;;  %v8335_v39 = vld [vmem:[#allocation11 + $0x104] ss:$8 sps:$4 sm:$0xff]  }
 0x171   : > { %1471 = vmatprep.mubr.bf16.mxu1 %v9673_v41  ;;  %7411 = vmatprep.subr.bf16.mxu0 %v8304_v44  ;;  %v8336_v44 = vld [vmem:[#allocation11 + $0x94] ss:$8 sps:$4 sm:$0xff]  }
 0x172   : > { %7475 = vmatprep.subr.bf16.mxu1 %v8305_v45  ;;  %v8337_v45 = vld [vmem:[#allocation11 + $0x194] ss:$8 sps:$4 sm:$0xff]  }
 0x173   : > { %7412 = vmatpush3.bf16.msra.mxu0 %v8306_v46  ;;  %v8338_v46 = vld [vmem:[#allocation11 + $0x14] ss:$8 sps:$4 sm:$0xff]  }
 0x174   : > { %7476 = vmatpush3.bf16.msra.mxu1 %v8307_v47  ;;  %7413 = vmatprep.subr.bf16.mxu0 %v8308_v52  ;;  %v8339_v47 = vld [vmem:[#allocation11 + $0x114] ss:$8 sps:$4 sm:$0xff]   ;;  %v8342_v52 = vld [vmem:[#allocation11 + $0x24] ss:$8 sps:$4 sm:$0xff]  }
 0x175   : > { %7477 = vmatprep.subr.bf16.mxu1 %v8309_v53  ;;  %v8343_v53 = vld [vmem:[#allocation11 + $0x124] ss:$8 sps:$4 sm:$0xff]  }
 0x176   : > { %1375 = vmatmul.mubr.bf16.gmra.mrb[36].mxu0 %v9676_v42 }
 0x177   : > { %1472 = vmatmul.mubr.bf16.gmra.mrb[36].mxu1 %v9680_v43  ;;  %1382 = vmatprep.mubr.bf16.mxu0 %v9686_v48 }
 0x178   : > { %1479 = vmatprep.mubr.bf16.mxu1 %v9689_v49  ;;  %7414 = vmatpush3.bf16.msra.mxu0 %v8310_v54  ;;  %v8348_v54 = vld [vmem:[#allocation11 + $0xc4] ss:$8 sps:$4 sm:$0xff]  }
 0x179   : > { %7478 = vmatpush3.bf16.msra.mxu1 %v8311_v55  ;;  %7415 = vmatprep.subr.bf16.mxu0 %v8312_v60  ;;  %v8349_v55 = vld [vmem:[#allocation11 + $0x1c4] ss:$8 sps:$4 sm:$0xff]  }
 0x17a   : > { %7479 = vmatprep.subr.bf16.mxu1 %v8313_v61  ;;  %v8350_v60 = vld [vmem:[#allocation11 + $0x44] ss:$8 sps:$4 sm:$0xff]  }
 0x17b   : > { %v8351_v61 = vld [vmem:[#allocation11 + $0x144] ss:$8 sps:$4 sm:$0xff]  }
 0x17c   : > { %7416 = vmatpush3.bf16.msra.mxu0 %v8314_v62  ;;  %v8354_v62 = vld [vmem:[#allocation11 + $0x54] ss:$8 sps:$4 sm:$0xff]  }
 0x17d   : > { %7480 = vmatpush3.bf16.msra.mxu1 %v8315_v63  ;;  %7417 = vmatprep.subr.bf16.mxu0 %v8316_v4  ;;  %v8355_v63 = vld [vmem:[#allocation11 + $0x154] ss:$8 sps:$4 sm:$0xff]   ;;  %v8356_v4 = vld [vmem:[#allocation11 + $0xe4] ss:$8 sps:$4 sm:$0xff]  }
 0x17e   : > { %7481 = vmatprep.subr.bf16.mxu1 %v8317_v5  ;;  %1383 = vmatmul.mubr.bf16.gmra.mrb[40].mxu0 %v9692_v50  ;;  %v8357_v5 = vld [vmem:[#allocation11 + $0x1e4] ss:$8 sps:$4 sm:$0xff]  }
 0x17f   : > { %1480 = vmatmul.mubr.bf16.gmra.mrb[40].mxu1 %v9695_v51  ;;  %1390 = vmatprep.mubr.bf16.mxu0 %v9702_v56 }
 0x180   : > { %1487 = vmatprep.mubr.bf16.mxu1 %v9705_v57  ;;  %7418 = vmatpush3.bf16.msra.mxu0 %v8318_v6  ;;  %v8358_v6 = vld [vmem:[#allocation11 + $0x64] ss:$8 sps:$4 sm:$0xff]  }
 0x181   : > { %7482 = vmatpush3.bf16.msra.mxu1 %v8319_v7  ;;  %7419 = vmatprep.subr.bf16.mxu0 %v8320_v10  ;;  %v8359_v7 = vld [vmem:[#allocation11 + $0x164] ss:$8 sps:$4 sm:$0xff]   ;;  %v8360_v10 = vld [vmem:[#allocation11 + $0xf4] ss:$8 sps:$4 sm:$0xff]  }
 0x182   : > { %7483 = vmatprep.subr.bf16.mxu1 %v8321_v11  ;;  %v8361_v11 = vld [vmem:[#allocation11 + $0x1f4] ss:$8 sps:$4 sm:$0xff]  }
 0x184   : > { %7420 = vmatpush3.bf16.msra.mxu0 %v8322_v14  ;;  %v8362_v14 = vld [vmem:[#allocation11 + $0x74] ss:$8 sps:$4 sm:$0xff]  }
 0x185   : > { %7484 = vmatpush3.bf16.msra.mxu1 %v8323_v15  ;;  %7421 = vmatprep.subr.bf16.mxu0 %v8324_v18  ;;  %v8363_v15 = vld [vmem:[#allocation11 + $0x174] ss:$8 sps:$4 sm:$0xff]  }
 0x186   : > { %7485 = vmatprep.subr.bf16.mxu1 %v8325_v19  ;;  %1391 = vmatmul.mubr.bf16.gmra.mrb[44].mxu0 %v9709_v58  ;;  %v8364_v18 = vld [vmem:[%s9629_s7 + $0x4] ss:$16 sps:$4 sm:$0xff]   ;;  %v8365_v19 = vld [vmem:[%s9629_s7 + $0xc] ss:$16 sps:$4 sm:$0xff]  }
 0x187   : > { %1488 = vmatmul.mubr.bf16.gmra.mrb[44].mxu1 %v9712_v59  ;;  %1398 = vmatprep.mubr.bf16.mxu0 %v9716_v0 }
 0x188   : > { %1495 = vmatprep.mubr.bf16.mxu1 %v9721_v1  ;;  %7422 = vmatpush3.bf16.msra.mxu0 %v8326_v20  ;;  %v8366_v20 = vld [vmem:[%s9629_s7] ss:$16 sps:$4 sm:$0xff]  }
 0x189   : > { %7486 = vmatpush3.bf16.msra.mxu1 %v8327_v21  ;;  %7423 = vmatprep.subr.bf16.mxu0 %v8328_v26  ;;  %v8367_v21 = vld [vmem:[%s9629_s7 + $0x8] ss:$16 sps:$4 sm:$0xff]   ;;  %v8368_v26 = vld [vmem:[%s9629_s7 + $0x24] ss:$16 sps:$4 sm:$0xff]  }
 0x18a   : > { %7487 = vmatprep.subr.bf16.mxu1 %v8329_v27  ;;  %v8369_v27 = vld [vmem:[%s9629_s7 + $0x2c] ss:$16 sps:$4 sm:$0xff]  }
 0x18c   : > { %7424 = vmatpush3.bf16.msra.mxu0 %v8330_v28  ;;  %v8370_v28 = vld [vmem:[%s9629_s7 + $0x20] ss:$16 sps:$4 sm:$0xff]  }
 0x18d   : > { %7488 = vmatpush3.bf16.msra.mxu1 %v8331_v29  ;;  %7537 = vmatprep.subr.bf16.mxu0 %v8332_v31  ;;  %v8371_v29 = vld [vmem:[%s9629_s7 + $0x28] ss:$16 sps:$4 sm:$0xff]  }
 0x18e   : > { %7601 = vmatprep.subr.bf16.mxu1 %v8333_v36  ;;  %1399 = vmatmul.mubr.bf16.gmra.mrb[48].mxu0 %v9726_v2 }
 0x18f   : > { %1496 = vmatmul.mubr.bf16.gmra.mrb[48].mxu1 %v9729_v3  ;;  %1406 = vmatprep.mubr.bf16.mxu0 %v9732_v8 }
 0x190   : > { %1503 = vmatprep.mubr.bf16.mxu1 %v9735_v9 }
 0x196   : > { %1407 = vmatmul.mubr.bf16.gmra.mrb[52].mxu0 %v9742_v12 }
 0x197   : > { %1504 = vmatmul.mubr.bf16.gmra.mrb[52].mxu1 %v9745_v13  ;;  %1414 = vmatprep.mubr.bf16.mxu0 %v9748_v16 }
 0x198   : > { %1511 = vmatprep.mubr.bf16.mxu1 %v9751_v17 }
 0x19e   : > { %1415 = vmatmul.mubr.bf16.gmra.mrb[56].mxu0 %v9758_v22 }
 0x19f   : > { %1512 = vmatmul.mubr.bf16.gmra.mrb[56].mxu1 %v9761_v23  ;;  %1422 = vmatprep.mubr.bf16.mxu0 %v9764_v24 }
 0x1a0   : > { %1519 = vmatprep.mubr.bf16.mxu1 %v9767_v25 }
 0x1a6   : > { %1423 = vmatmul.mubr.bf16.gmra.mrb[60].mxu0 %v9774_v30 }
 0x1a7   : > { %1520 = vmatmul.mubr.bf16.gmra.mrb[60].mxu1 %v9777_v37  ;;  %2057 = vmatprep.mubr.bf16.mxu0 %v9654_v32  ;;  %v8340_v32 = vld [vmem:[#allocation11 + $0xa4] ss:$8 sps:$4 sm:$0xff]  }
 0x1a8   : > { %2154 = vmatprep.mubr.bf16.mxu1 %v9657_v33  ;;  %v8341_v33 = vld [vmem:[#allocation11 + $0x1a4] ss:$8 sps:$4 sm:$0xff]  }
 0x1ae   : > { %2058 = vmatmul.mubr.bf16.vlgmr.msra.gmra.mrb[64].mxu0 %v9661_v34  ;;  %v8344_v34 = vld [vmem:[#allocation11 + $0xb4] ss:$8 sps:$4 sm:$0xff]  }
 0x1af   : > { %2155 = vmatmul.mubr.bf16.vlgmr.msra.gmra.mrb[64].mxu1 %v9664_v35  ;;  %2065 = vmatprep.mubr.bf16.mxu0 %v9670_v40  ;;  %v8345_v35 = vld [vmem:[#allocation11 + $0x1b4] ss:$8 sps:$4 sm:$0xff]  }
 0x1b0   : > { %2162 = vmatprep.mubr.bf16.mxu1 %v9673_v41  ;;  %7538 = vmatpush3.bf16.msra.mxu0 %v8334_v38  ;;  %v8346_v40 = vld [vmem:[#allocation11 + $0x34] ss:$8 sps:$4 sm:$0xff]  }
 0x1b1   : > { %7602 = vmatpush3.bf16.msra.mxu1 %v8335_v39  ;;  %7539 = vmatprep.subr.bf16.mxu0 %v8336_v44  ;;  %v8347_v41 = vld [vmem:[#allocation11 + $0x134] ss:$8 sps:$4 sm:$0xff]  }
 0x1b2   : > { %7603 = vmatprep.subr.bf16.mxu1 %v8337_v45 }
 0x1b4   : > { %7540 = vmatpush3.bf16.msra.mxu0 %v8338_v46 }
 0x1b5   : > { %7604 = vmatpush3.bf16.msra.mxu1 %v8339_v47  ;;  %7541 = vmatprep.subr.bf16.mxu0 %v8340_v32 }
 0x1b6   : > { %7605 = vmatprep.subr.bf16.mxu1 %v8341_v33  ;;  %2066 = vmatmul.mubr.bf16.gmra.mrb[68].mxu0 %v9676_v42  ;;  %v8352_v42 = vld [vmem:[#allocation11 + $0xd4] ss:$8 sps:$4 sm:$0xff]  }
 0x1b7   : > { %2163 = vmatmul.mubr.bf16.gmra.mrb[68].mxu1 %v9680_v43  ;;  %2073 = vmatprep.mubr.bf16.mxu0 %v9686_v48  ;;  %v8353_v43 = vld [vmem:[#allocation11 + $0x1d4] ss:$8 sps:$4 sm:$0xff]  }
 0x1b8   : > { %2170 = vmatprep.mubr.bf16.mxu1 %v9689_v49  ;;  %7542 = vmatpush3.bf16.msra.mxu0 %v8342_v52 }
 0x1b9   : > { %7606 = vmatpush3.bf16.msra.mxu1 %v8343_v53  ;;  %7543 = vmatprep.subr.bf16.mxu0 %v8344_v34 }
 0x1ba   : > { %7607 = vmatprep.subr.bf16.mxu1 %v8345_v35 }
 0x1bc   : > { %7544 = vmatpush3.bf16.msra.mxu0 %v8346_v40 }
 0x1bd   : > { %7608 = vmatpush3.bf16.msra.mxu1 %v8347_v41  ;;  %7545 = vmatprep.subr.bf16.mxu0 %v8348_v54 }
 0x1be   : > { %7609 = vmatprep.subr.bf16.mxu1 %v8349_v55  ;;  %2074 = vmatmul.mubr.bf16.gmra.mrb[72].mxu0 %v9692_v50 }
 0x1bf   : > { %2171 = vmatmul.mubr.bf16.gmra.mrb[72].mxu1 %v9695_v51  ;;  %2081 = vmatprep.mubr.bf16.mxu0 %v9702_v56 }
 0x1c0   : > { %2178 = vmatprep.mubr.bf16.mxu1 %v9705_v57  ;;  %7546 = vmatpush3.bf16.msra.mxu0 %v8350_v60 }
 0x1c1   : > { %7610 = vmatpush3.bf16.msra.mxu1 %v8351_v61  ;;  %7547 = vmatprep.subr.bf16.mxu0 %v8352_v42 }
 0x1c2   : > { %7611 = vmatprep.subr.bf16.mxu1 %v8353_v43 }
 0x1c4   : > { %7548 = vmatpush3.bf16.msra.mxu0 %v8354_v62 }
 0x1c5   : > { %7612 = vmatpush3.bf16.msra.mxu1 %v8355_v63  ;;  %7549 = vmatprep.subr.bf16.mxu0 %v8356_v4 }
 0x1c6   : > { %7613 = vmatprep.subr.bf16.mxu1 %v8357_v5  ;;  %2082 = vmatmul.mubr.bf16.gmra.mrb[76].mxu0 %v9709_v58 }
 0x1c7   : > { %2179 = vmatmul.mubr.bf16.gmra.mrb[76].mxu1 %v9712_v59  ;;  %2089 = vmatprep.mubr.bf16.mxu0 %v9716_v0 }
 0x1c8   : > { %2186 = vmatprep.mubr.bf16.mxu1 %v9721_v1  ;;  %7550 = vmatpush3.bf16.msra.mxu0 %v8358_v6 }
 0x1c9   : > { %7614 = vmatpush3.bf16.msra.mxu1 %v8359_v7  ;;  %7551 = vmatprep.subr.bf16.mxu0 %v8360_v10 }
 0x1ca   : > { %7615 = vmatprep.subr.bf16.mxu1 %v8361_v11 }
 0x1cc   : > { %7552 = vmatpush3.bf16.msra.mxu0 %v8362_v14 }
 0x1cd   : > { %7616 = vmatpush3.bf16.msra.mxu1 %v8363_v15 }
 0x1ce   : > { %2090 = vmatmul.mubr.bf16.gmra.mrb[80].mxu0 %v9726_v2 }
 0x1cf   : > { %2187 = vmatmul.mubr.bf16.gmra.mrb[80].mxu1 %v9729_v3  ;;  %2097 = vmatprep.mubr.bf16.mxu0 %v9732_v8 }
 0x1d0   : > { %2194 = vmatprep.mubr.bf16.mxu1 %v9735_v9 }
 0x1d6   : > { %2098 = vmatmul.mubr.bf16.gmra.mrb[84].mxu0 %v9742_v12 }
 0x1d7   : > { %2195 = vmatmul.mubr.bf16.gmra.mrb[84].mxu1 %v9745_v13  ;;  %2105 = vmatprep.mubr.bf16.mxu0 %v9748_v16 }
 0x1d8   : > { %2202 = vmatprep.mubr.bf16.mxu1 %v9751_v17 }
 0x1de   : > { %2106 = vmatmul.mubr.bf16.gmra.mrb[88].mxu0 %v9758_v22 }
 0x1df   : > { %2203 = vmatmul.mubr.bf16.gmra.mrb[88].mxu1 %v9761_v23  ;;  %2113 = vmatprep.mubr.bf16.mxu0 %v9764_v24 }
 0x1e0   : > { %2210 = vmatprep.mubr.bf16.mxu1 %v9767_v25 }
 0x1e6   : > { %2114 = vmatmul.mubr.bf16.gmra.mrb[92].mxu0 %v9774_v30 }
 0x1e7   : > { %2211 = vmatmul.mubr.bf16.gmra.mrb[92].mxu1 %v9777_v37  ;;  %2507 = vmatprep.mubr.bf16.mxu0 %v8364_v18 }
 0x1e8   : > { %2604 = vmatprep.mubr.bf16.mxu1 %v8365_v19 }
 0x1ee   : > { %2508 = vmatmul.mubr.bf16.vlgmr.msra.gmra.mrb[96].mxu0 %v8366_v20 }
 0x1ef   : > { %2605 = vmatmul.mubr.bf16.vlgmr.msra.gmra.mrb[96].mxu1 %v8367_v21  ;;  %2515 = vmatprep.mubr.bf16.mxu0 %v8368_v26 }
 0x1f0   : > { %2612 = vmatprep.mubr.bf16.mxu1 %v8369_v27 }
 0x1f6   : > { %2516 = vmatmul.mubr.bf16.gmra.mrb[100].mxu0 %v8370_v28 }
 0x1f7   : > { %2613 = vmatmul.mubr.bf16.gmra.mrb[100].mxu1 %v8371_v29  ;;  %2523 = vmatprep.mubr.bf16.mxu0 %v9686_v48 }
 0x1f8   : > { %2620 = vmatprep.mubr.bf16.mxu1 %v9689_v49 }
 0x1fe   : > { %2524 = vmatmul.mubr.bf16.gmra.mrb[104].mxu0 %v9692_v50 }
 0x1ff   : > { %2621 = vmatmul.mubr.bf16.gmra.mrb[104].mxu1 %v9695_v51  ;;  %2531 = vmatprep.mubr.bf16.mxu0 %v9702_v56 }
 0x200   : > { %2628 = vmatprep.mubr.bf16.mxu1 %v9705_v57 }
 0x201   : > { %v7169_v31 = vpop.f32.mrb[0].mxu0 }
 0x202   : > { %v7233_v36 = vpop.f32.mrb[0].mxu1  ;;  %v7170_v38 = vpop.f32.mrb[1].mxu0 }
 0x203   : > { %v7234_v39 = vpop.f32.mrb[1].mxu1  ;;  %v7171_v44 = vadd.f32 %v7170_v38, %v7169_v31  ;;  %v7172_v46 = vpop.f32.mrb[2].mxu0 }
 0x204   : > { %v7235_v45 = vadd.f32 %v7234_v39, %v7233_v36  ;;  %v7236_v47 = vpop.f32.mrb[2].mxu1  ;;  %v7173_v32 = vpop.f32.mrb[3].mxu0 }
 0x205   : > { %v7237_v48 = vpop.f32.mrb[3].mxu1  ;;  %v7174_v49 = vadd.f32 %v7173_v32, %v7172_v46 }
 0x206   : > { %v9859_v33 = vadd.f32 %v7235_v45, %v7171_v44  ;;  %v7238_v50 = vadd.f32 %v7237_v48, %v7236_v47  ;;  %2532 = vmatmul.mubr.bf16.gmra.mrb[108].mxu0 %v9709_v58 }
 0x207   : > { %2629 = vmatmul.mubr.bf16.gmra.mrb[108].mxu1 %v9712_v59  ;;  %2539 = vmatprep.mubr.bf16.mxu0 %v9716_v0 }
 0x208   : > { %v9863_v51 = vadd.f32 %v7238_v50, %v7174_v49  ;;  %1624 = vrot.lane.b32.xlu0 %v9859_v33, %s9268_s13  ;;  %2636 = vmatprep.mubr.bf16.mxu1 %v9721_v1  ;;  %v1528_v52 = vsub.f32 0.0, %v9859_v33 }
 0x209   : > { %v7175_v56 = vpop.f32.mrb[4].mxu0 }
 0x20a   : > { %v7239_v57 = vpop.f32.mrb[4].mxu1  ;;  %1626 = vrot.lane.b32.xlu1 %v9863_v51, %s9268_s13  ;;  %v7176_v58 = vpop.f32.mrb[5].mxu0  ;;  %v1529_v60 = vsub.f32 0.0, %v9863_v51 }
 0x20b   : > { %v7240_v53 = vpop.f32.mrb[5].mxu1  ;;  %v7177_v59 = vadd.f32 %v7176_v58, %v7175_v56  ;;  %v7178_v35 = vpop.f32.mrb[6].mxu0 }
 0x20c   : > { %v7241_v34 = vadd.f32 %v7240_v53, %v7239_v57  ;;  %v7242_v40 = vpop.f32.mrb[6].mxu1  ;;  %1560 = vrot.lane.b32.xlu0 %v1528_v52, %s9268_s13  ;;  %v7179_v41 = vpop.f32.mrb[7].mxu0 }
 0x20d   : > { %v7243_v54 = vpop.f32.mrb[7].mxu1  ;;  %v7180_v1 = vadd.f32 %v7179_v41, %v7178_v35 }
 0x20e   : > { %v9873_v0 = vadd.f32 %v7241_v34, %v7177_v59  ;;  %v7244_v55 = vadd.f32 %v7243_v54, %v7242_v40  ;;  %2540 = vmatmul.mubr.bf16.gmra.mrb[112].mxu0 %v9726_v2 }
 0x20f   : > { %2637 = vmatmul.mubr.bf16.gmra.mrb[112].mxu1 %v9729_v3  ;;  %2547 = vmatprep.mubr.bf16.mxu0 %v9732_v8 }
 0x210   : > { %v9878_v61 = vadd.f32 %v7244_v55, %v7180_v1  ;;  %1562 = vrot.lane.b32.xlu0 %v1529_v60, %s9268_s13  ;;  %v1530_v42 = vsub.f32 0.0, %v9873_v0  ;;  %2644 = vmatprep.mubr.bf16.mxu1 %v9735_v9 }
 0x211   : > { %v7181_v43 = vpop.f32.mrb[8].mxu0 }
 0x212   : > { %v7245_v62 = vpop.f32.mrb[8].mxu1  ;;  %1564 = vrot.lane.b32.xlu1 %v1530_v42, %s9268_s13  ;;  %v7182_v63 = vpop.f32.mrb[9].mxu0  ;;  %v1531_v15 = vsub.f32 0.0, %v9878_v61 }
 0x213   : > { %v7246_v4 = vpop.f32.mrb[9].mxu1  ;;  %v7183_v5 = vadd.f32 %v7182_v63, %v7181_v43  ;;  %v7184_v6 = vpop.f32.mrb[10].mxu0 }
 0x214   : > { %v7247_v2 = vadd.f32 %v7246_v4, %v7245_v62  ;;  %v7248_v3 = vpop.f32.mrb[10].mxu1  ;;  %1628 = vrot.lane.b32.xlu0 %v9873_v0, %s9268_s13  ;;  %v7185_v7 = vpop.f32.mrb[11].mxu0 }
 0x215   : > { %v7249_v10 = vpop.f32.mrb[11].mxu1  ;;  %v7186_v8 = vadd.f32 %v7185_v7, %v7184_v6 }
 0x216   : > { %v9887_v11 = vadd.f32 %v7247_v2, %v7183_v5  ;;  %v7250_v14 = vadd.f32 %v7249_v10, %v7248_v3  ;;  %1630 = vrot.lane.b32.xlu1 %v9878_v61, %s9268_s13  ;;  %2548 = vmatmul.mubr.bf16.gmra.mrb[116].mxu0 %v9742_v12 }
 0x217   : > { %2645 = vmatmul.mubr.bf16.gmra.mrb[116].mxu1 %v9745_v13  ;;  %2555 = vmatprep.mubr.bf16.mxu0 %v9748_v16 }
 0x218   : > { %v9893_v9 = vadd.f32 %v7250_v14, %v7186_v8  ;;  %1632 = vrot.lane.b32.xlu0 %v9887_v11, %s9268_s13  ;;  %2652 = vmatprep.mubr.bf16.mxu1 %v9751_v17  ;;  %v1532_v20 = vsub.f32 0.0, %v9887_v11 }
 0x219   : > { %v7187_v18 = vpop.f32.mrb[12].mxu0 }
 0x21a   : > { %v7251_v19 = vpop.f32.mrb[12].mxu1  ;;  %1566 = vrot.lane.b32.xlu1 %v1531_v15, %s9268_s13  ;;  %v7188_v12 = vpop.f32.mrb[13].mxu0  ;;  %v1533_v39 = vsub.f32 0.0, %v9893_v9 }
 0x21b   : > { %v7252_v21 = vpop.f32.mrb[13].mxu1  ;;  %v7189_v13 = vadd.f32 %v7188_v12, %v7187_v18  ;;  %v7190_v27 = vpop.f32.mrb[14].mxu0 }
 0x21c   : > { %v7253_v26 = vadd.f32 %v7252_v21, %v7251_v19  ;;  %v7254_v28 = vpop.f32.mrb[14].mxu1  ;;  %1568 = vrot.lane.b32.xlu0 %v1532_v20, %s9268_s13  ;;  %v7191_v29 = vpop.f32.mrb[15].mxu0 }
 0x21d   : > { %v7255_v31 = vpop.f32.mrb[15].mxu1  ;;  %v7192_v16 = vadd.f32 %v7191_v29, %v7190_v27 }
 0x21e   : > { %v9903_v36 = vadd.f32 %v7253_v26, %v7189_v13  ;;  %v7256_v17 = vadd.f32 %v7255_v31, %v7254_v28  ;;  %1634 = vrot.lane.b32.xlu1 %v9893_v9, %s9268_s13  ;;  %2556 = vmatmul.mubr.bf16.gmra.mrb[120].mxu0 %v9758_v22 }
 0x21f   : > { %2653 = vmatmul.mubr.bf16.gmra.mrb[120].mxu1 %v9761_v23  ;;  %2563 = vmatprep.mubr.bf16.mxu0 %v9764_v24 }
 0x220   : > { %v9909_v38 = vadd.f32 %v7256_v17, %v7192_v16  ;;  %1636 = vrot.lane.b32.xlu0 %v9903_v36, %s9268_s13  ;;  %2660 = vmatprep.mubr.bf16.mxu1 %v9767_v25  ;;  %v1534_v46 = vsub.f32 0.0, %v9903_v36 }
 0x221   : > { %v7193_v44 = vpop.f32.mrb[16].mxu0 }
 0x222   : > { %v7257_v45 = vpop.f32.mrb[16].mxu1  ;;  %1570 = vrot.lane.b32.xlu1 %v1533_v39, %s9268_s13  ;;  %v7194_v22 = vpop.f32.mrb[17].mxu0  ;;  %v1535_v58 = vsub.f32 0.0, %v9909_v38 }
 0x223   : > { %v7258_v47 = vpop.f32.mrb[17].mxu1  ;;  %v7195_v23 = vadd.f32 %v7194_v22, %v7193_v44  ;;  %v7196_v48 = vpop.f32.mrb[18].mxu0 }
 0x224   : > { %v7259_v32 = vadd.f32 %v7258_v47, %v7257_v45  ;;  %v7260_v49 = vpop.f32.mrb[18].mxu1  ;;  %1572 = vrot.lane.b32.xlu0 %v1534_v46, %s9268_s13  ;;  %v7197_v50 = vpop.f32.mrb[19].mxu0 }
 0x225   : > { %v7261_v56 = vpop.f32.mrb[19].mxu1  ;;  %v7198_v24 = vadd.f32 %v7197_v50, %v7196_v48 }
 0x226   : > { %v9919_v57 = vadd.f32 %v7259_v32, %v7195_v23  ;;  %v7262_v25 = vadd.f32 %v7261_v56, %v7260_v49  ;;  %1638 = vrot.lane.b32.xlu1 %v9909_v38, %s9268_s13  ;;  %2564 = vmatmul.mubr.bf16.gmra.mrb[124].mxu0 %v9774_v30 }
 0x227   : > { %2661 = vmatmul.mubr.bf16.gmra.mrb[124].mxu1 %v9777_v37 }
 0x228   : > { %v9925_v52 = vadd.f32 %v7262_v25, %v7198_v24  ;;  %1640 = vrot.lane.b32.xlu0 %v9919_v57, %s9268_s13  ;;  %v1536_v34 = vsub.f32 0.0, %v9919_v57 }
 0x229   : > { %v7199_v53 = vpop.f32.mrb[20].mxu0 }
 0x22a   : > { %v7263_v59 = vpop.f32.mrb[20].mxu1  ;;  %1574 = vrot.lane.b32.xlu1 %v1535_v58, %s9268_s13  ;;  %v7200_v35 = vpop.f32.mrb[21].mxu0  ;;  %v1537_v63 = vsub.f32 0.0, %v9925_v52 }
 0x22b   : > { %v7264_v40 = vpop.f32.mrb[21].mxu1  ;;  %v7201_v41 = vadd.f32 %v7200_v35, %v7199_v53  ;;  %v7202_v30 = vpop.f32.mrb[22].mxu0 }
 0x22c   : > { %v7265_v54 = vadd.f32 %v7264_v40, %v7263_v59  ;;  %v7266_v1 = vpop.f32.mrb[22].mxu1  ;;  %1576 = vrot.lane.b32.xlu0 %v1536_v34, %s9268_s13  ;;  %v7203_v37 = vpop.f32.mrb[23].mxu0 }
 0x22d   : > { %v7267_v55 = vpop.f32.mrb[23].mxu1  ;;  %v7204_v42 = vadd.f32 %v7203_v37, %v7202_v30 }
 0x22e   : > { %v9933_v60 = vadd.f32 %v7265_v54, %v7201_v41  ;;  %v7268_v43 = vadd.f32 %v7267_v55, %v7266_v1  ;;  %1642 = vrot.lane.b32.xlu1 %v9925_v52, %s9268_s13 }
 0x230   : > { %v9937_v62 = vadd.f32 %v7268_v43, %v7204_v42  ;;  %1644 = vrot.lane.b32.xlu0 %v9933_v60, %s9268_s13  ;;  %v1538_v2 = vsub.f32 0.0, %v9933_v60 }
 0x231   : > { %v7205_v4 = vpop.f32.mrb[24].mxu0 }
 0x232   : > { %v7269_v5 = vpop.f32.mrb[24].mxu1  ;;  %1578 = vrot.lane.b32.xlu1 %v1537_v63, %s9268_s13  ;;  %v7206_v6 = vpop.f32.mrb[25].mxu0  ;;  %v1539_v13 = vsub.f32 0.0, %v9937_v62 }
 0x233   : > { %v7270_v3 = vpop.f32.mrb[25].mxu1  ;;  %v7207_v7 = vadd.f32 %v7206_v6, %v7205_v4  ;;  %v7208_v8 = vpop.f32.mrb[26].mxu0 }
 0x234   : > { %v7271_v10 = vadd.f32 %v7270_v3, %v7269_v5  ;;  %v7272_v14 = vpop.f32.mrb[26].mxu1  ;;  %1580 = vrot.lane.b32.xlu0 %v1538_v2, %s9268_s13  ;;  %v7209_v15 = vpop.f32.mrb[27].mxu0 }
 0x235   : > { %v7273_v18 = vpop.f32.mrb[27].mxu1  ;;  %v7210_v20 = vadd.f32 %v7209_v15, %v7208_v8 }
 0x236   : > { %v9945_v19 = vadd.f32 %v7271_v10, %v7207_v7  ;;  %v7274_v12 = vadd.f32 %v7273_v18, %v7272_v14  ;;  %1646 = vrot.lane.b32.xlu1 %v9937_v62, %s9268_s13 }
 0x238   : > { %v9949_v21 = vadd.f32 %v7274_v12, %v7210_v20  ;;  %1648 = vrot.lane.b32.xlu0 %v9945_v19, %s9268_s13  ;;  %v1540_v28 = vsub.f32 0.0, %v9945_v19 }
 0x239   : > { %v7211_v26 = vpop.f32.mrb[28].mxu0 }
 0x23a   : > { %v7275_v27 = vpop.f32.mrb[28].mxu1  ;;  %1582 = vrot.lane.b32.xlu1 %v1539_v13, %s9268_s13  ;;  %v7212_v29 = vpop.f32.mrb[29].mxu0  ;;  %v1541_v48 = vsub.f32 0.0, %v9949_v21 }
 0x23b   : > { %v7276_v31 = vpop.f32.mrb[29].mxu1  ;;  %v7213_v16 = vadd.f32 %v7212_v29, %v7211_v26  ;;  %v7214_v39 = vpop.f32.mrb[30].mxu0 }
 0x23c   : > { %v7277_v17 = vadd.f32 %v7276_v31, %v7275_v27  ;;  %v7278_v44 = vpop.f32.mrb[30].mxu1  ;;  %1584 = vrot.lane.b32.xlu0 %v1540_v28, %s9268_s13  ;;  %v7215_v45 = vpop.f32.mrb[31].mxu0 }
 0x23d   : > { %v7279_v46 = vpop.f32.mrb[31].mxu1  ;;  %v7216_v47 = vadd.f32 %v7215_v45, %v7214_v39 }
 0x23e   : > { %v9957_v22 = vadd.f32 %v7277_v17, %v7213_v16  ;;  %v7280_v23 = vadd.f32 %v7279_v46, %v7278_v44  ;;  %1650 = vrot.lane.b32.xlu1 %v9949_v21, %s9268_s13 }
 0x240   : > { %v9961_v32 = vadd.f32 %v7280_v23, %v7216_v47  ;;  %1652 = vrot.lane.b32.xlu0 %v9957_v22, %s9268_s13  ;;  %v1542_v56 = vsub.f32 0.0, %v9957_v22 }
 0x241   : > { %v7297_v49 = vpop.f32.mrb[32].mxu0 }
 0x242   : > { %v7361_v50 = vpop.f32.mrb[32].mxu1  ;;  %1586 = vrot.lane.b32.xlu1 %v1541_v48, %s9268_s13  ;;  %v7298_v24 = vpop.f32.mrb[33].mxu0  ;;  %v1543_v37 = vsub.f32 0.0, %v9961_v32 }
 0x243   : > { %v7362_v25 = vpop.f32.mrb[33].mxu1  ;;  %v7299_v58 = vadd.f32 %v7298_v24, %v7297_v49  ;;  %v7300_v59 = vpop.f32.mrb[34].mxu0 }
 0x244   : > { %v7363_v53 = vadd.f32 %v7362_v25, %v7361_v50  ;;  %v7364_v34 = vpop.f32.mrb[34].mxu1  ;;  %1588 = vrot.lane.b32.xlu0 %v1542_v56, %s9268_s13  ;;  %v7301_v35 = vpop.f32.mrb[35].mxu0 }
 0x245   : > { %v7365_v40 = vpop.f32.mrb[35].mxu1  ;;  %v7302_v54 = vadd.f32 %v7301_v35, %v7300_v59 }
 0x246   : > { %v1466_v41 = vadd.f32 %v7363_v53, %v7299_v58  ;;  %v7366_v30 = vadd.f32 %v7365_v40, %v7364_v34  ;;  %1654 = vrot.lane.b32.xlu1 %v9961_v32, %s9268_s13 }
 0x248   : > { %v1469_v1 = vadd.f32 %v7366_v30, %v7302_v54 }
 0x249   : > { %v7303_v42 = vpop.f32.mrb[36].mxu0 }
 0x24a   : > { %v1753_v55 = vpack.c.bf16 %v1469_v1, %v1466_v41  ;;  %v7367_v43 = vpop.f32.mrb[36].mxu1  ;;  %1590 = vrot.lane.b32.xlu1 %v1543_v37, %s9268_s13  ;;  %v7304_v63 = vpop.f32.mrb[37].mxu0 }
 0x24b   : > { %v7368_v4 = vpop.f32.mrb[37].mxu1  ;;  %v7305_v5 = vadd.f32 %v7304_v63, %v7303_v42  ;;  %v7306_v6 = vpop.f32.mrb[38].mxu0 }
 0x24c   : > { %1761 = vst [vmem:[#allocation3] sm:$0xff] %v1753_v55  ;;  %v7369_v2 = vadd.f32 %v7368_v4, %v7367_v43  ;;  %v7370_v3 = vpop.f32.mrb[38].mxu1  ;;  %v7307_v7 = vpop.f32.mrb[39].mxu0 }
 0x24d   : > { %v7371_v10 = vpop.f32.mrb[39].mxu1  ;;  %v7308_v14 = vadd.f32 %v7307_v7, %v7306_v6 }
 0x24e   : > { %v1474_v8 = vadd.f32 %v7369_v2, %v7305_v5  ;;  %v7372_v15 = vadd.f32 %v7371_v10, %v7370_v3 }
 0x250   : > { %v1477_v18 = vadd.f32 %v7372_v15, %v7308_v14 }
 0x251   : > { %v7309_v12 = vpop.f32.mrb[40].mxu0 }
 0x252   : > { %v1754_v20 = vpack.c.bf16 %v1477_v18, %v1474_v8  ;;  %v7373_v13 = vpop.f32.mrb[40].mxu1  ;;  %v7310_v26 = vpop.f32.mrb[41].mxu0 }
 0x253   : > { %v7374_v27 = vpop.f32.mrb[41].mxu1  ;;  %v7311_v28 = vadd.f32 %v7310_v26, %v7309_v12  ;;  %v7312_v31 = vpop.f32.mrb[42].mxu0 }
 0x254   : > { %1762 = vst [vmem:[#allocation3 + $0x10] sm:$0xff] %v1754_v20  ;;  %v7375_v29 = vadd.f32 %v7374_v27, %v7373_v13  ;;  %v7376_v16 = vpop.f32.mrb[42].mxu1  ;;  %v7313_v17 = vpop.f32.mrb[43].mxu0 }
 0x255   : > { %v7377_v39 = vpop.f32.mrb[43].mxu1  ;;  %v7314_v45 = vadd.f32 %v7313_v17, %v7312_v31 }
 0x256   : > { %v1482_v44 = vadd.f32 %v7375_v29, %v7311_v28  ;;  %v7378_v46 = vadd.f32 %v7377_v39, %v7376_v16 }
 0x258   : > { %v1485_v47 = vadd.f32 %v7378_v46, %v7314_v45 }
 0x259   : > { %v7315_v48 = vpop.f32.mrb[44].mxu0 }
 0x25a   : > { %v1755_v23 = vpack.c.bf16 %v1485_v47, %v1482_v44  ;;  %v7379_v49 = vpop.f32.mrb[44].mxu1  ;;  %v7316_v50 = vpop.f32.mrb[45].mxu0 }
 0x25b   : > { %v7380_v56 = vpop.f32.mrb[45].mxu1  ;;  %v7317_v24 = vadd.f32 %v7316_v50, %v7315_v48  ;;  %v7318_v58 = vpop.f32.mrb[46].mxu0 }
 0x25c   : > { %1763 = vst [vmem:[#allocation3 + $0x20] sm:$0xff] %v1755_v23  ;;  %v7381_v25 = vadd.f32 %v7380_v56, %v7379_v49  ;;  %v7382_v53 = vpop.f32.mrb[46].mxu1  ;;  %v7319_v59 = vpop.f32.mrb[47].mxu0 }
 0x25d   : > { %v7383_v34 = vpop.f32.mrb[47].mxu1  ;;  %v7320_v40 = vadd.f32 %v7319_v59, %v7318_v58 }
 0x25e   : > { %v1490_v35 = vadd.f32 %v7381_v25, %v7317_v24  ;;  %v7384_v41 = vadd.f32 %v7383_v34, %v7382_v53 }
 0x260   : > { %v1493_v54 = vadd.f32 %v7384_v41, %v7320_v40 }
 0x261   : > { %v7321_v1 = vpop.f32.mrb[48].mxu0 }
 0x262   : > { %v1756_v30 = vpack.c.bf16 %v1493_v54, %v1490_v35  ;;  %v7385_v37 = vpop.f32.mrb[48].mxu1  ;;  %v7322_v55 = vpop.f32.mrb[49].mxu0 }
 0x263   : > { %v7386_v42 = vpop.f32.mrb[49].mxu1  ;;  %v7323_v43 = vadd.f32 %v7322_v55, %v7321_v1  ;;  %v7324_v4 = vpop.f32.mrb[50].mxu0 }
 0x264   : > { %1764 = vst [vmem:[#allocation3 + $0x30] sm:$0xff] %v1756_v30  ;;  %v7387_v63 = vadd.f32 %v7386_v42, %v7385_v37  ;;  %v7388_v5 = vpop.f32.mrb[50].mxu1  ;;  %v7325_v2 = vpop.f32.mrb[51].mxu0 }
 0x265   : > { %v7389_v6 = vpop.f32.mrb[51].mxu1  ;;  %v7326_v7 = vadd.f32 %v7325_v2, %v7324_v4 }
 0x266   : > { %v1498_v3 = vadd.f32 %v7387_v63, %v7323_v43  ;;  %v7390_v10 = vadd.f32 %v7389_v6, %v7388_v5 }
 0x268   : > { %v1501_v8 = vadd.f32 %v7390_v10, %v7326_v7  ;;  %v9973_v7 = vld [vmem:[#allocation16] sm:$0xff] }
 0x269   : > { %v7327_v15 = vpop.f32.mrb[52].mxu0 }
 0x26a   : > { %v1757_v14 = vpack.c.bf16 %v1501_v8, %v1498_v3  ;;  %v7391_v18 = vpop.f32.mrb[52].mxu1  ;;  %v7328_v20 = vpop.f32.mrb[53].mxu0 }
 0x26b   : > { %v7392_v12 = vpop.f32.mrb[53].mxu1  ;;  %v7329_v13 = vadd.f32 %v7328_v20, %v7327_v15  ;;  %v7330_v27 = vpop.f32.mrb[54].mxu0 }
 0x26c   : > { %1765 = vst [vmem:[#allocation3 + $0x40] sm:$0xff] %v1757_v14  ;;  %v7393_v26 = vadd.f32 %v7392_v12, %v7391_v18  ;;  %v7394_v28 = vpop.f32.mrb[54].mxu1  ;;  %v7331_v29 = vpop.f32.mrb[55].mxu0  ;;  %v9976_v18 = vld [vmem:[#allocation14] sm:$0xff] }
 0x26d   : > { %v7395_v31 = vpop.f32.mrb[55].mxu1  ;;  %v7332_v17 = vadd.f32 %v7331_v29, %v7330_v27  ;;  %v9981_v27 = vld [vmem:[#allocation16 + $0x8] sm:$0xff] }
 0x26e   : > { %v1506_v16 = vadd.f32 %v7393_v26, %v7329_v13  ;;  %v7396_v39 = vadd.f32 %v7395_v31, %v7394_v28  ;;  %v9979_v26 = vld [vmem:[#allocation14 + $0x8] sm:$0xff] }
 0x270   : > { %v1509_v44 = vadd.f32 %v7396_v39, %v7332_v17 }
 0x271   : > { %v7333_v46 = vpop.f32.mrb[56].mxu0 }
 0x272   : > { %v1758_v45 = vpack.c.bf16 %v1509_v44, %v1506_v16  ;;  %v7397_v47 = vpop.f32.mrb[56].mxu1  ;;  %v7334_v23 = vpop.f32.mrb[57].mxu0  ;;  %v1689_v16 = vmul.f32 %v9859_v33, %v9976_v18 }
 0x273   : > { %v7398_v48 = vpop.f32.mrb[57].mxu1  ;;  %v7335_v49 = vadd.f32 %v7334_v23, %v7333_v46  ;;  %v7336_v56 = vpop.f32.mrb[58].mxu0  ;;  %v1690_v46 = vmul.f32 %v9863_v51, %v9979_v26  ;;  %v9995_v51 = vld [vmem:[#allocation16 + $0x10] sm:$0xff] }
 0x274   : > { %1766 = vst [vmem:[#allocation3 + $0x50] sm:$0xff] %v1758_v45  ;;  %v7399_v50 = vadd.f32 %v7398_v48, %v7397_v47  ;;  %v7400_v24 = vpop.f32.mrb[58].mxu1  ;;  %v7337_v25 = vpop.f32.mrb[59].mxu0 }
 0x275   : > { %v7401_v58 = vpop.f32.mrb[59].mxu1  ;;  %v7338_v59 = vadd.f32 %v7337_v25, %v7336_v56 }
 0x276   : > { %v1514_v53 = vadd.f32 %v7399_v50, %v7335_v49  ;;  %v7402_v34 = vadd.f32 %v7401_v58, %v7400_v24 }
 0x278   : > { %v1517_v35 = vadd.f32 %v7402_v34, %v7338_v59 }
 0x279   : > { %v7339_v41 = vpop.f32.mrb[60].mxu0 }
 0x27a   : > { %v1759_v40 = vpack.c.bf16 %v1517_v35, %v1514_v53  ;;  %v7403_v54 = vpop.f32.mrb[60].mxu1  ;;  %v1625_v30 = vpop.permute.xlu0 %1624 }
 0x27b   : > { %v7340_v1 = vpop.f32.mrb[61].mxu0  ;;  %v7404_v55 = vpop.f32.mrb[61].mxu1 }
 0x27c   : > { %1767 = vst [vmem:[#allocation3 + $0x60] sm:$0xff] %v1759_v40  ;;  %v7341_v37 = vadd.f32 %v7340_v1, %v7339_v41  ;;  %v7342_v42 = vpop.f32.mrb[62].mxu0  ;;  %v7405_v43 = vadd.f32 %v7404_v55, %v7403_v54  ;;  %v7406_v63 = vpop.f32.mrb[62].mxu1  ;;  %v9998_v1 = vld [vmem:[#allocation14 + $0x10] sm:$0xff] }
 0x27d   : > { %v7343_v4 = vpop.f32.mrb[63].mxu0  ;;  %v7407_v5 = vpop.f32.mrb[63].mxu1 }
 0x27e   : > { %v1522_v2 = vadd.f32 %v7405_v43, %v7341_v37  ;;  %v7344_v6 = vadd.f32 %v7343_v4, %v7342_v42  ;;  %v7408_v3 = vadd.f32 %v7407_v5, %v7406_v63  ;;  %v1561_v10 = vpop.permute.xlu0 %1560  ;;  %v1627_v14 = vpop.permute.xlu1 %1626  ;;  %v10002_v42 = vld [vmem:[#allocation14 + $0x18] sm:$0xff] }
 0x27f   : > { %v1673_v8 = vsel %vm1672_vm0, %v1561_v10, %v1625_v30 }
 0x280   : > { %v1525_v15 = vadd.f32 %v7408_v3, %v7344_v6  ;;  %v1705_v20 = vmul.f32 %v1673_v8, %v9973_v7 }
 0x281   : > { %v7425_v12 = vpop.f32.mrb[64].mxu0 }
 0x282   : > { %v7489_v13 = vpop.f32.mrb[64].mxu1  ;;  %v1760_v28 = vpack.c.bf16 %v1525_v15, %v1522_v2  ;;  %v1563_v29 = vpop.permute.xlu0 %1562  ;;  %v1721_v50 = vadd.f32 %v1705_v20, %v1689_v16  ;;  %v10005_v2 = vld [vmem:[#allocation16 + $0x18] sm:$0xff]  ;;  %v1691_v15 = vmul.f32 %v9873_v0, %v9998_v1  ;;  %v1692_v20 = vmul.f32 %v9878_v61, %v10002_v42  ;;  %v10023_v61 = vld [vmem:[#allocation16 + $0x20] sm:$0xff] }
 0x283   : > { %v7426_v31 = vpop.f32.mrb[65].mxu0  ;;  %v1674_v17 = vsel %vm1672_vm0, %v1563_v29, %v1627_v14  ;;  %v7490_v44 = vpop.f32.mrb[65].mxu1 }
 0x284   : > { %v7427_v39 = vadd.f32 %v7426_v31, %v7425_v12  ;;  %v7428_v45 = vpop.f32.mrb[66].mxu0  ;;  %1768 = vst [vmem:[#allocation3 + $0x70] sm:$0xff] %v1760_v28  ;;  %v1706_v47 = vmul.f32 %v1674_v17, %v9981_v27  ;;  %v7491_v23 = vadd.f32 %v7490_v44, %v7489_v13  ;;  %v7492_v48 = vpop.f32.mrb[66].mxu1 }
 0x285   : > { %v1565_v49 = vpop.permute.xlu1 %1564  ;;  %v7429_v56 = vpop.f32.mrb[67].mxu0 }
 0x286   : > { %v7493_v24 = vpop.f32.mrb[67].mxu1  ;;  %v1722_v25 = vadd.f32 %v1706_v47, %v1690_v46  ;;  %v9989_v58 = vadd.f32 %v7491_v23, %v7427_v39  ;;  %v7430_v33 = vadd.f32 %v7429_v56, %v7428_v45  ;;  %v1629_v59 = vpop.permute.xlu0 %1628 }
 0x287   : > { %v7494_v53 = vadd.f32 %v7493_v24, %v7492_v48  ;;  %v1675_v41 = vsel %vm1672_vm0, %v1565_v49, %v1629_v59 }
 0x288   : > { %v1737_v34 = vpack.c.bf16 %v1722_v25, %v1721_v50  ;;  %2765 = vrot.lane.b32.xlu0 %v9989_v58, %s9268_s13  ;;  %v2669_v43 = vsub.f32 0.0, %v9989_v58  ;;  %v1707_v6 = vmul.f32 %v1675_v41, %v9995_v51  ;;  %v10026_v50 = vld [vmem:[#allocation14 + $0x20] sm:$0xff]  ;;  %v10030_v25 = vld [vmem:[#allocation14 + $0x28] sm:$0xff] }
 0x289   : > { %v9991_v35 = vadd.f32 %v7494_v53, %v7430_v33  ;;  %v1631_v40 = vpop.permute.xlu1 %1630  ;;  %v7431_v54 = vpop.f32.mrb[68].mxu0 }
 0x28a   : > { %v7495_v30 = vpop.f32.mrb[68].mxu1  ;;  %1745 = vst [vmem:[#allocation2] sm:$0xff] %v1737_v34  ;;  %v1633_v37 = vpop.permute.xlu0 %1632  ;;  %v1723_v44 = vadd.f32 %v1707_v6, %v1691_v15 }
 0x28b   : > { %2767 = vrot.lane.b32.xlu1 %v9991_v35, %s9268_s13  ;;  %v7432_v55 = vpop.f32.mrb[69].mxu0  ;;  %v7496_v4 = vpop.f32.mrb[69].mxu1  ;;  %v2670_v14 = vsub.f32 0.0, %v9991_v35 }
 0x28c   : > { %v7433_v63 = vadd.f32 %v7432_v55, %v7431_v54  ;;  %v7434_v5 = vpop.f32.mrb[70].mxu0  ;;  %v7497_v3 = vadd.f32 %v7496_v4, %v7495_v30  ;;  %v7498_v10 = vpop.f32.mrb[70].mxu1  ;;  %2701 = vrot.lane.b32.xlu0 %v2669_v43, %s9268_s13  ;;  %v1693_v43 = vmul.f32 %v9887_v11, %v10026_v50 }
 0x28d   : > { %v1567_v8 = vpop.permute.xlu1 %1566  ;;  %v7435_v13 = vpop.f32.mrb[71].mxu0 }
 0x28e   : > { %v1676_v12 = vsel %vm1672_vm0, %v1567_v8, %v1631_v40  ;;  %v7499_v28 = vpop.f32.mrb[71].mxu1  ;;  %v10015_v29 = vadd.f32 %v7497_v3, %v7433_v63  ;;  %v7436_v16 = vadd.f32 %v7435_v13, %v7434_v5  ;;  %v1569_v39 = vpop.permute.xlu0 %1568  ;;  %v10033_v40 = vld [vmem:[#allocation16 + $0x28] sm:$0xff]  ;;  %v1694_v63 = vmul.f32 %v9893_v9, %v10030_v25  ;;  %v10051_v9 = vld [vmem:[#allocation16 + $0x30] sm:$0xff] }
 0x28f   : > { %v1708_v31 = vmul.f32 %v1676_v12, %v10005_v2  ;;  %v7500_v17 = vadd.f32 %v7499_v28, %v7498_v10  ;;  %2703 = vrot.lane.b32.xlu1 %v2670_v14, %s9268_s13  ;;  %v1677_v47 = vsel %vm1672_vm0, %v1569_v39, %v1633_v37  ;;  %v10054_v39 = vld [vmem:[#allocation14 + $0x30] sm:$0xff] }
 0x290   : > { %2769 = vrot.lane.b32.xlu0 %v10015_v29, %s9268_s13  ;;  %v2671_v33 = vsub.f32 0.0, %v10015_v29  ;;  %v1709_v41 = vmul.f32 %v1677_v47, %v10023_v61 }
 0x291   : > { %v1724_v45 = vadd.f32 %v1708_v31, %v1692_v20  ;;  %v10019_v46 = vadd.f32 %v7500_v17, %v7436_v16  ;;  %v1635_v0 = vpop.permute.xlu1 %1634  ;;  %v7437_v23 = vpop.f32.mrb[72].mxu0 }
 0x292   : > { %v7501_v48 = vpop.f32.mrb[72].mxu1  ;;  %v1637_v56 = vpop.permute.xlu0 %1636  ;;  %v1725_v20 = vadd.f32 %v1709_v41, %v1693_v43  ;;  %v1695_v41 = vmul.f32 %v9903_v36, %v10054_v39 }
 0x293   : > { %v1738_v49 = vpack.c.bf16 %v1724_v45, %v1723_v44  ;;  %2771 = vrot.lane.b32.xlu1 %v10019_v46, %s9268_s13  ;;  %v7438_v24 = vpop.f32.mrb[73].mxu0  ;;  %v7502_v59 = vpop.f32.mrb[73].mxu1  ;;  %v2672_v55 = vsub.f32 0.0, %v10019_v46 }
 0x294   : > { %v7439_v53 = vadd.f32 %v7438_v24, %v7437_v23  ;;  %v7440_v34 = vpop.f32.mrb[74].mxu0  ;;  %v7503_v54 = vadd.f32 %v7502_v59, %v7501_v48  ;;  %v7504_v30 = vpop.f32.mrb[74].mxu1  ;;  %2705 = vrot.lane.b32.xlu0 %v2671_v33, %s9268_s13  ;;  %v10061_v24 = vld [vmem:[#allocation16 + $0x38] sm:$0xff] }
 0x295   : > { %1746 = vst [vmem:[#allocation2 + $0x10] sm:$0xff] %v1738_v49  ;;  %v1571_v37 = vpop.permute.xlu1 %1570  ;;  %v7441_v5 = vpop.f32.mrb[75].mxu0 }
 0x296   : > { %v1678_v4 = vsel %vm1672_vm0, %v1571_v37, %v1635_v0  ;;  %v7505_v6 = vpop.f32.mrb[75].mxu1  ;;  %v10043_v3 = vadd.f32 %v7503_v54, %v7439_v53  ;;  %v7442_v8 = vadd.f32 %v7441_v5, %v7440_v34  ;;  %v1573_v15 = vpop.permute.xlu0 %1572  ;;  %v10058_v0 = vld [vmem:[#allocation14 + $0x38] sm:$0xff] }
 0x297   : > { %v1710_v10 = vmul.f32 %v1678_v4, %v10033_v40  ;;  %v7506_v14 = vadd.f32 %v7505_v6, %v7504_v30  ;;  %2707 = vrot.lane.b32.xlu1 %v2672_v55, %s9268_s13  ;;  %v1679_v28 = vsel %vm1672_vm0, %v1573_v15, %v1637_v56  ;;  %v1696_v54 = vmul.f32 %v9909_v38, %v10058_v0  ;;  %v10079_v38 = vld [vmem:[#allocation16 + $0x40] sm:$0xff] }
 0x298   : > { %2773 = vrot.lane.b32.xlu0 %v10043_v3, %s9268_s13  ;;  %v2673_v47 = vsub.f32 0.0, %v10043_v3  ;;  %v1711_v56 = vmul.f32 %v1679_v28, %v10051_v9  ;;  %v10082_v28 = vld [vmem:[#allocation14 + $0x40] sm:$0xff] }
 0x299   : > { %v1726_v12 = vadd.f32 %v1710_v10, %v1694_v63  ;;  %v10047_v13 = vadd.f32 %v7506_v14, %v7442_v8  ;;  %v1639_v11 = vpop.permute.xlu1 %1638  ;;  %v7443_v31 = vpop.f32.mrb[76].mxu0 }
 0x29a   : > { %v7507_v16 = vpop.f32.mrb[76].mxu1  ;;  %v1641_v44 = vpop.permute.xlu0 %1640  ;;  %v1727_v10 = vadd.f32 %v1711_v56, %v1695_v41 }
 0x29b   : > { %v1739_v17 = vpack.c.bf16 %v1726_v12, %v1725_v20  ;;  %2775 = vrot.lane.b32.xlu1 %v10047_v13, %s9268_s13  ;;  %v7444_v45 = vpop.f32.mrb[77].mxu0  ;;  %v7508_v48 = vpop.f32.mrb[77].mxu1  ;;  %v2674_v34 = vsub.f32 0.0, %v10047_v13 }
 0x29c   : > { %v7445_v23 = vadd.f32 %v7444_v45, %v7443_v31  ;;  %v7446_v49 = vpop.f32.mrb[78].mxu0  ;;  %v7509_v33 = vadd.f32 %v7508_v48, %v7507_v16  ;;  %v7510_v53 = vpop.f32.mrb[78].mxu1  ;;  %2709 = vrot.lane.b32.xlu0 %v2673_v47, %s9268_s13 }
 0x29d   : > { %1747 = vst [vmem:[#allocation2 + $0x20] sm:$0xff] %v1739_v17  ;;  %v1575_v59 = vpop.permute.xlu1 %1574  ;;  %v7447_v37 = vpop.f32.mrb[79].mxu0  ;;  %v10086_v17 = vld [vmem:[#allocation14 + $0x48] sm:$0xff] }
 0x29e   : > { %v1680_v30 = vsel %vm1672_vm0, %v1575_v59, %v1639_v11  ;;  %v7511_v55 = vpop.f32.mrb[79].mxu1  ;;  %v10071_v43 = vadd.f32 %v7509_v33, %v7445_v23  ;;  %v7448_v4 = vadd.f32 %v7447_v37, %v7446_v49  ;;  %v1577_v6 = vpop.permute.xlu0 %1576  ;;  %v10089_v49 = vld [vmem:[#allocation16 + $0x48] sm:$0xff]  ;;  %v1698_v41 = vmul.f32 %v9925_v52, %v10086_v17  ;;  %v10107_v52 = vld [vmem:[#allocation16 + $0x50] sm:$0xff] }
 0x29f   : > { %v1712_v63 = vmul.f32 %v1680_v30, %v10061_v24  ;;  %v7512_v5 = vadd.f32 %v7511_v55, %v7510_v53  ;;  %2711 = vrot.lane.b32.xlu1 %v2674_v34, %s9268_s13  ;;  %v1681_v15 = vsel %vm1672_vm0, %v1577_v6, %v1641_v44  ;;  %v1697_v34 = vmul.f32 %v9919_v57, %v10082_v28 }
 0x2a0   : > { %2777 = vrot.lane.b32.xlu0 %v10071_v43, %s9268_s13  ;;  %v2675_v45 = vsub.f32 0.0, %v10071_v43  ;;  %v1713_v44 = vmul.f32 %v1681_v15, %v10079_v38 }
 0x2a1   : > { %v1728_v8 = vadd.f32 %v1712_v63, %v1696_v54  ;;  %v10075_v14 = vadd.f32 %v7512_v5, %v7448_v4  ;;  %v1643_v36 = vpop.permute.xlu1 %1642  ;;  %v7449_v20 = vpop.f32.mrb[80].mxu0 }
 0x2a2   : > { %v7513_v12 = vpop.f32.mrb[80].mxu1  ;;  %v1645_v31 = vpop.permute.xlu0 %1644 }
 0x2a3   : > { %v1740_v11 = vpack.c.bf16 %v1728_v8, %v1727_v10  ;;  %2779 = vrot.lane.b32.xlu1 %v10075_v14, %s9268_s13  ;;  %v7450_v16 = vpop.f32.mrb[81].mxu0  ;;  %v7514_v23 = vpop.f32.mrb[81].mxu1  ;;  %v2676_v59 = vsub.f32 0.0, %v10075_v14  ;;  %v1729_v10 = vadd.f32 %v1713_v44, %v1697_v34 }
 0x2a4   : > { %v7451_v47 = vadd.f32 %v7450_v16, %v7449_v20  ;;  %v7452_v48 = vpop.f32.mrb[82].mxu0  ;;  %v7515_v56 = vadd.f32 %v7514_v23, %v7513_v12  ;;  %v7516_v33 = vpop.f32.mrb[82].mxu1  ;;  %2713 = vrot.lane.b32.xlu0 %v2675_v45, %s9268_s13  ;;  %v10110_v16 = vld [vmem:[#allocation14 + $0x50] sm:$0xff]  ;;  %v10114_v23 = vld [vmem:[#allocation14 + $0x58] sm:$0xff] }
 0x2a5   : > { %1748 = vst [vmem:[#allocation2 + $0x30] sm:$0xff] %v1740_v11  ;;  %v1579_v53 = vpop.permute.xlu1 %1578  ;;  %v7453_v30 = vpop.f32.mrb[83].mxu0 }
 0x2a6   : > { %v1682_v54 = vsel %vm1672_vm0, %v1579_v53, %v1643_v36  ;;  %v7517_v37 = vpop.f32.mrb[83].mxu1  ;;  %v10099_v55 = vadd.f32 %v7515_v56, %v7451_v47  ;;  %v7454_v4 = vadd.f32 %v7453_v30, %v7452_v48  ;;  %v1581_v6 = vpop.permute.xlu0 %1580  ;;  %v10117_v53 = vld [vmem:[#allocation16 + $0x58] sm:$0xff]  ;;  %v1699_v30 = vmul.f32 %v9933_v60, %v10110_v16 }
 0x2a7   : > { %v1714_v63 = vmul.f32 %v1682_v54, %v10089_v49  ;;  %v7518_v5 = vadd.f32 %v7517_v37, %v7516_v33  ;;  %2715 = vrot.lane.b32.xlu1 %v2676_v59, %s9268_s13  ;;  %v1683_v36 = vsel %vm1672_vm0, %v1581_v6, %v1645_v31  ;;  %11331 = vst [vmem:[#allocation29_spill] sm:$0xff] %v10117_v53 }
 0x2a8   : > { %2781 = vrot.lane.b32.xlu0 %v10099_v55, %s9268_s13  ;;  %v2677_v48 = vsub.f32 0.0, %v10099_v55  ;;  %v1715_v31 = vmul.f32 %v1683_v36, %v10107_v52  ;;  %v1700_v37 = vmul.f32 %v9937_v62, %v10114_v23  ;;  %v10135_v62 = vld [vmem:[#allocation16 + $0x60] sm:$0xff] }
 0x2a9   : > { %v1730_v8 = vadd.f32 %v1714_v63, %v1698_v41  ;;  %v10103_v15 = vadd.f32 %v7518_v5, %v7454_v4  ;;  %v1647_v57 = vpop.permute.xlu1 %1646  ;;  %v7455_v20 = vpop.f32.mrb[84].mxu0  ;;  %11332 = vst [vmem:[#allocation30_spill] sm:$0xff] %v10135_v62 }
 0x2aa   : > { %v7519_v12 = vpop.f32.mrb[84].mxu1  ;;  %v1649_v45 = vpop.permute.xlu0 %1648 }
 0x2ab   : > { %v1741_v11 = vpack.c.bf16 %v1730_v8, %v1729_v10  ;;  %2783 = vrot.lane.b32.xlu1 %v10103_v15, %s9268_s13  ;;  %v7456_v47 = vpop.f32.mrb[85].mxu0  ;;  %v7520_v56 = vpop.f32.mrb[85].mxu1  ;;  %v2678_v54 = vsub.f32 0.0, %v10103_v15 }
 0x2ac   : > { %v7457_v44 = vadd.f32 %v7456_v47, %v7455_v20  ;;  %v7458_v33 = vpop.f32.mrb[86].mxu0  ;;  %v7521_v59 = vadd.f32 %v7520_v56, %v7519_v12  ;;  %v7522_v34 = vpop.f32.mrb[86].mxu1  ;;  %2717 = vrot.lane.b32.xlu0 %v2677_v48, %s9268_s13  ;;  %v1731_v12 = vadd.f32 %v1715_v31, %v1699_v30 }
 0x2ad   : > { %1749 = vst [vmem:[#allocation2 + $0x40] sm:$0xff] %v1741_v11  ;;  %v1583_v41 = vpop.permute.xlu1 %1582  ;;  %v7459_v4 = vpop.f32.mrb[87].mxu0 }
 0x2ae   : > { %v1684_v63 = vsel %vm1672_vm0, %v1583_v41, %v1647_v57  ;;  %v7523_v5 = vpop.f32.mrb[87].mxu1  ;;  %v10127_v6 = vadd.f32 %v7521_v59, %v7457_v44  ;;  %v7460_v8 = vadd.f32 %v7459_v4, %v7458_v33  ;;  %v1585_v20 = vpop.permute.xlu0 %1584  ;;  %v10138_v33 = vld [vmem:[#allocation14 + $0x60] sm:$0xff] }
 0x2af   : > { %v1716_v10 = vmul.f32 %v1684_v63, %v10117_v53  ;;  %v7524_v36 = vadd.f32 %v7523_v5, %v7522_v34  ;;  %2719 = vrot.lane.b32.xlu1 %v2678_v54, %s9268_s13  ;;  %v1685_v57 = vsel %vm1672_vm0, %v1585_v20, %v1649_v45  ;;  %v10142_v34 = vld [vmem:[#allocation14 + $0x68] sm:$0xff] }
 0x2b0   : > { %2785 = vrot.lane.b32.xlu0 %v10127_v6, %s9268_s13  ;;  %v2679_v41 = vsub.f32 0.0, %v10127_v6  ;;  %v10145_v63 = vld [vmem:[#allocation16 + $0x68] sm:$0xff]  ;;  %v1717_v45 = vmul.f32 %v1685_v57, %v10135_v62  ;;  %v1702_v20 = vmul.f32 %v9949_v21, %v10142_v34  ;;  %v10163_v21 = vld [vmem:[#allocation16 + $0x70] sm:$0xff] }
 0x2b1   : > { %v1732_v11 = vadd.f32 %v1716_v10, %v1700_v37  ;;  %v10131_v47 = vadd.f32 %v7524_v36, %v7460_v8  ;;  %v1651_v60 = vpop.permute.xlu1 %1650  ;;  %v7461_v48 = vpop.f32.mrb[88].mxu0  ;;  %11333 = vst [vmem:[#allocation31_spill] sm:$0xff] %v10145_v63  ;;  %v1701_v36 = vmul.f32 %v9945_v19, %v10138_v33  ;;  %11334 = vst [vmem:[#allocation32_spill] sm:$0xff] %v10163_v21 }
 0x2b2   : > { %v7525_v44 = vpop.f32.mrb[88].mxu1  ;;  %v1653_v31 = vpop.permute.xlu0 %1652 }
 0x2b3   : > { %v1742_v56 = vpack.c.bf16 %v1732_v11, %v1731_v12  ;;  %2787 = vrot.lane.b32.xlu1 %v10131_v47, %s9268_s13  ;;  %v7462_v59 = vpop.f32.mrb[89].mxu0  ;;  %v7526_v30 = vpop.f32.mrb[89].mxu1  ;;  %v2680_v8 = vsub.f32 0.0, %v10131_v47 }
 0x2b4   : > { %v7463_v54 = vadd.f32 %v7462_v59, %v7461_v48  ;;  %v7464_v37 = vpop.f32.mrb[90].mxu0  ;;  %v7527_v4 = vadd.f32 %v7526_v30, %v7525_v44  ;;  %v7528_v5 = vpop.f32.mrb[90].mxu1  ;;  %2721 = vrot.lane.b32.xlu0 %v2679_v41, %s9268_s13  ;;  %v1733_v30 = vadd.f32 %v1717_v45, %v1701_v36 }
 0x2b5   : > { %1750 = vst [vmem:[#allocation2 + $0x50] sm:$0xff] %v1742_v56  ;;  %v1587_v10 = vpop.permute.xlu1 %1586  ;;  %v7465_v11 = vpop.f32.mrb[91].mxu0 }
 0x2b6   : > { %v1686_v12 = vsel %vm1672_vm0, %v1587_v10, %v1651_v60  ;;  %v7529_v48 = vpop.f32.mrb[91].mxu1  ;;  %v10155_v56 = vadd.f32 %v7527_v4, %v7463_v54  ;;  %v7466_v44 = vadd.f32 %v7465_v11, %v7464_v37  ;;  %v1589_v41 = vpop.permute.xlu0 %1588 }
 0x2b7   : > { %v1718_v57 = vmul.f32 %v1686_v12, %v10145_v63  ;;  %v7530_v59 = vadd.f32 %v7529_v48, %v7528_v5  ;;  %2723 = vrot.lane.b32.xlu1 %v2680_v8, %s9268_s13  ;;  %v1687_v60 = vsel %vm1672_vm0, %v1589_v41, %v1653_v31  ;;  %v10169_v8 = vld [vmem:[#allocation14 + $0x70] sm:$0xff]  ;;  %v10171_v48 = vld [vmem:[#allocation14 + $0x78] sm:$0xff] }
 0x2b8   : > { %2789 = vrot.lane.b32.xlu0 %v10155_v56, %s9268_s13  ;;  %v2681_v45 = vsub.f32 0.0, %v10155_v56  ;;  %11335 = vst [vmem:[#allocation33_spill] sm:$0xff] %v10169_v8  ;;  %11336 = vst [vmem:[#allocation34_spill] sm:$0xff] %v10171_v48 }
 0x2b9   : > { %v1734_v62 = vadd.f32 %v1718_v57, %v1702_v20  ;;  %v10159_v53 = vadd.f32 %v7530_v59, %v7466_v44  ;;  %v1655_v19 = vpop.permute.xlu1 %1654  ;;  %v7467_v54 = vpop.f32.mrb[92].mxu0  ;;  %v10173_v57 = vld [vmem:[#allocation16 + $0x78] sm:$0xff] }
 0x2ba   : > { %v7531_v4 = vpop.f32.mrb[92].mxu1  ;;  %v7468_v37 = vpop.f32.mrb[93].mxu0  ;;  %11337 = vst [vmem:[#allocation35_spill] sm:$0xff] %v10173_v57 }
 0x2bb   : > { %v1743_v10 = vpack.c.bf16 %v1734_v62, %v1733_v30  ;;  %2791 = vrot.lane.b32.xlu1 %v10159_v53, %s9268_s13  ;;  %v7532_v5 = vpop.f32.mrb[93].mxu1  ;;  %v7469_v36 = vadd.f32 %v7468_v37, %v7467_v54  ;;  %v7470_v12 = vpop.f32.mrb[94].mxu0  ;;  %v1719_v62 = vmul.f32 %v1687_v60, %v10163_v21  ;;  %v2682_v59 = vsub.f32 0.0, %v10159_v53 }
 0x2bc   : > { %v7533_v20 = vadd.f32 %v7532_v5, %v7531_v4  ;;  %v7534_v11 = vpop.f32.mrb[94].mxu1  ;;  %2725 = vrot.lane.b32.xlu0 %v2681_v45, %s9268_s13  ;;  %v7471_v44 = vpop.f32.mrb[95].mxu0  ;;  %v1703_v37 = vmul.f32 %v9957_v22, %v10169_v8 }
 0x2bd   : > { %1751 = vst [vmem:[#allocation2 + $0x60] sm:$0xff] %v1743_v10  ;;  %v1591_v31 = vpop.permute.xlu1 %1590  ;;  %v7472_v54 = vadd.f32 %v7471_v44, %v7470_v12  ;;  %v7535_v4 = vpop.f32.mrb[95].mxu1  ;;  %v1704_v10 = vmul.f32 %v9961_v32, %v10171_v48 }
 0x2be   : > { %v10178_v41 = vadd.f32 %v7533_v20, %v7469_v36  ;;  %v1688_v30 = vsel %vm1672_vm0, %v1591_v31, %v1655_v19  ;;  %v7536_v5 = vadd.f32 %v7535_v4, %v7534_v11  ;;  %v1735_v21 = vadd.f32 %v1719_v62, %v1703_v37 }
 0x2bf   : > { %v1720_v60 = vmul.f32 %v1688_v30, %v10173_v57  ;;  %2727 = vrot.lane.b32.xlu1 %v2682_v59, %s9268_s13 }
 0x2c0   : > { %11338 = vst [vmem:[#allocation36_spill] sm:$0xff] %v10178_v41  ;;  %v2683_v45 = vsub.f32 0.0, %v10178_v41  ;;  %v10188_v20 = vadd.f32 %v7536_v5, %v7472_v54 }
 0x2c1   : > { %v1736_v36 = vadd.f32 %v1720_v60, %v1704_v10  ;;  %v7553_v19 = vpop.f32.mrb[96].mxu0 }
 0x2c2   : > { %11339 = vst [vmem:[#allocation37_spill] sm:$0xff] %v10188_v20  ;;  %2729 = vrot.lane.b32.xlu0 %v2683_v45, %s9268_s13  ;;  %v7617_v12 = vpop.f32.mrb[96].mxu1  ;;  %v2684_v22 = vsub.f32 0.0, %v10188_v20  ;;  %v7554_v44 = vpop.f32.mrb[97].mxu0 }
 0x2c3   : > { %v1744_v31 = vpack.c.bf16 %v1736_v36, %v1735_v21  ;;  %v7618_v32 = vpop.f32.mrb[97].mxu1  ;;  %v7555_v48 = vadd.f32 %v7554_v44, %v7553_v19  ;;  %v7556_v11 = vpop.f32.mrb[98].mxu0 }
 0x2c4   : > { %v7619_v30 = vadd.f32 %v7618_v32, %v7617_v12  ;;  %v7620_v4 = vpop.f32.mrb[98].mxu1  ;;  %2731 = vrot.lane.b32.xlu1 %v2684_v22, %s9268_s13  ;;  %v7557_v62 = vpop.f32.mrb[99].mxu0 }
 0x2c5   : > { %1752 = vst [vmem:[#allocation2 + $0x70] sm:$0xff] %v1744_v31  ;;  %v7621_v59 = vpop.f32.mrb[99].mxu1  ;;  %v7558_v37 = vadd.f32 %v7557_v62, %v7556_v11 }
 0x2c6   : > { %2793 = vrot.lane.b32.xlu0 %v10178_v41, %s9268_s13  ;;  %v2607_v54 = vadd.f32 %v7619_v30, %v7555_v48  ;;  %v7622_v10 = vadd.f32 %v7621_v59, %v7620_v4 }
 0x2c8   : > { %v2610_v21 = vadd.f32 %v7622_v10, %v7558_v37  ;;  %2795 = vrot.lane.b32.xlu1 %v10188_v20, %s9268_s13 }
 0x2c9   : > { %v7559_v5 = vpop.f32.mrb[100].mxu0 }
 0x2ca   : > { %v2893_v60 = vpack.c.bf16 %v2610_v21, %v2607_v54  ;;  %v7623_v45 = vpop.f32.mrb[100].mxu1  ;;  %v7560_v36 = vpop.f32.mrb[101].mxu0 }
 0x2cb   : > { %v7624_v19 = vpop.f32.mrb[101].mxu1  ;;  %v7561_v12 = vadd.f32 %v7560_v36, %v7559_v5  ;;  %v7562_v22 = vpop.f32.mrb[102].mxu0 }
 0x2cc   : > { %2901 = vst [vmem:[#allocation3 + $0x8] sm:$0xff] %v2893_v60  ;;  %v7625_v31 = vadd.f32 %v7624_v19, %v7623_v45  ;;  %v7626_v44 = vpop.f32.mrb[102].mxu1  ;;  %v7563_v32 = vpop.f32.mrb[103].mxu0 }
 0x2cd   : > { %v7627_v57 = vpop.f32.mrb[103].mxu1  ;;  %v7564_v48 = vadd.f32 %v7563_v32, %v7562_v22 }
 0x2ce   : > { %v2615_v41 = vadd.f32 %v7625_v31, %v7561_v12  ;;  %v7628_v30 = vadd.f32 %v7627_v57, %v7626_v44 }
 0x2d0   : > { %v2618_v11 = vadd.f32 %v7628_v30, %v7564_v48 }
 0x2d1   : > { %v7565_v62 = vpop.f32.mrb[104].mxu0 }
 0x2d2   : > { %v2894_v4 = vpack.c.bf16 %v2618_v11, %v2615_v41  ;;  %v7629_v59 = vpop.f32.mrb[104].mxu1  ;;  %v7566_v37 = vpop.f32.mrb[105].mxu0 }
 0x2d3   : > { %v7630_v54 = vpop.f32.mrb[105].mxu1  ;;  %v7567_v10 = vadd.f32 %v7566_v37, %v7565_v62  ;;  %v7568_v20 = vpop.f32.mrb[106].mxu0 }
 0x2d4   : > { %2902 = vst [vmem:[#allocation3 + $0x18] sm:$0xff] %v2894_v4  ;;  %v7631_v21 = vadd.f32 %v7630_v54, %v7629_v59  ;;  %v7632_v60 = vpop.f32.mrb[106].mxu1  ;;  %v7569_v5 = vpop.f32.mrb[107].mxu0 }
 0x2d5   : > { %v7633_v45 = vpop.f32.mrb[107].mxu1  ;;  %v7570_v19 = vadd.f32 %v7569_v5, %v7568_v20 }
 0x2d6   : > { %v2623_v36 = vadd.f32 %v7631_v21, %v7567_v10  ;;  %v7634_v8 = vadd.f32 %v7633_v45, %v7632_v60 }
 0x2d8   : > { %v2626_v63 = vadd.f32 %v7634_v8, %v7570_v19 }
 0x2d9   : > { %v7571_v31 = vpop.f32.mrb[108].mxu0 }
 0x2da   : > { %v2895_v12 = vpack.c.bf16 %v2626_v63, %v2623_v36  ;;  %v7635_v57 = vpop.f32.mrb[108].mxu1  ;;  %v7572_v22 = vpop.f32.mrb[109].mxu0 }
 0x2db   : > { %v7636_v41 = vpop.f32.mrb[109].mxu1  ;;  %v7573_v44 = vadd.f32 %v7572_v22, %v7571_v31  ;;  %v7574_v48 = vpop.f32.mrb[110].mxu0 }
 0x2dc   : > { %2903 = vst [vmem:[#allocation3 + $0x28] sm:$0xff] %v2895_v12  ;;  %v7637_v32 = vadd.f32 %v7636_v41, %v7635_v57  ;;  %v7638_v30 = vpop.f32.mrb[110].mxu1  ;;  %v7575_v11 = vpop.f32.mrb[111].mxu0 }
 0x2dd   : > { %v7639_v4 = vpop.f32.mrb[111].mxu1  ;;  %v7576_v59 = vadd.f32 %v7575_v11, %v7574_v48 }
 0x2de   : > { %v2631_v62 = vadd.f32 %v7637_v32, %v7573_v44  ;;  %v7640_v37 = vadd.f32 %v7639_v4, %v7638_v30 }
 0x2e0   : > { %v2634_v54 = vadd.f32 %v7640_v37, %v7576_v59 }
 0x2e1   : > { %v7577_v20 = vpop.f32.mrb[112].mxu0 }
 0x2e2   : > { %v2896_v10 = vpack.c.bf16 %v2634_v54, %v2631_v62  ;;  %v7641_v21 = vpop.f32.mrb[112].mxu1  ;;  %v7578_v8 = vpop.f32.mrb[113].mxu0 }
 0x2e3   : > { %v7642_v63 = vpop.f32.mrb[113].mxu1  ;;  %v7579_v60 = vadd.f32 %v7578_v8, %v7577_v20  ;;  %v7580_v45 = vpop.f32.mrb[114].mxu0 }
 0x2e4   : > { %2904 = vst [vmem:[#allocation3 + $0x38] sm:$0xff] %v2896_v10  ;;  %v7643_v5 = vadd.f32 %v7642_v63, %v7641_v21  ;;  %v7644_v36 = vpop.f32.mrb[114].mxu1  ;;  %v7581_v19 = vpop.f32.mrb[115].mxu0 }
 0x2e5   : > { %v7645_v12 = vpop.f32.mrb[115].mxu1  ;;  %v7582_v57 = vadd.f32 %v7581_v19, %v7580_v45 }
 0x2e6   : > { %v2639_v31 = vadd.f32 %v7643_v5, %v7579_v60  ;;  %v7646_v22 = vadd.f32 %v7645_v12, %v7644_v36 }
 0x2e8   : > { %v2642_v41 = vadd.f32 %v7646_v22, %v7582_v57 }
 0x2e9   : > { %v7583_v32 = vpop.f32.mrb[116].mxu0 }
 0x2ea   : > { %v2897_v44 = vpack.c.bf16 %v2642_v41, %v2639_v31  ;;  %v7647_v48 = vpop.f32.mrb[116].mxu1  ;;  %v7584_v30 = vpop.f32.mrb[117].mxu0 }
 0x2eb   : > { %v7648_v11 = vpop.f32.mrb[117].mxu1  ;;  %v7585_v4 = vadd.f32 %v7584_v30, %v7583_v32  ;;  %v7586_v59 = vpop.f32.mrb[118].mxu0 }
 0x2ec   : > { %2905 = vst [vmem:[#allocation3 + $0x48] sm:$0xff] %v2897_v44  ;;  %v7649_v62 = vadd.f32 %v7648_v11, %v7647_v48  ;;  %v7650_v37 = vpop.f32.mrb[118].mxu1  ;;  %v7587_v54 = vpop.f32.mrb[119].mxu0 }
 0x2ed   : > { %v7651_v10 = vpop.f32.mrb[119].mxu1  ;;  %v7588_v21 = vadd.f32 %v7587_v54, %v7586_v59 }
 0x2ee   : > { %v2647_v20 = vadd.f32 %v7649_v62, %v7585_v4  ;;  %v7652_v8 = vadd.f32 %v7651_v10, %v7650_v37 }
 0x2f0   : > { %v2650_v63 = vadd.f32 %v7652_v8, %v7588_v21 }
 0x2f1   : > { %v7589_v5 = vpop.f32.mrb[120].mxu0 }
 0x2f2   : > { %v2898_v60 = vpack.c.bf16 %v2650_v63, %v2647_v20  ;;  %v7653_v45 = vpop.f32.mrb[120].mxu1  ;;  %v7590_v36 = vpop.f32.mrb[121].mxu0 }
 0x2f3   : > { %v7654_v19 = vpop.f32.mrb[121].mxu1  ;;  %v7591_v12 = vadd.f32 %v7590_v36, %v7589_v5  ;;  %v7592_v57 = vpop.f32.mrb[122].mxu0 }
 0x2f4   : > { %2906 = vst [vmem:[#allocation3 + $0x58] sm:$0xff] %v2898_v60  ;;  %v7655_v31 = vadd.f32 %v7654_v19, %v7653_v45  ;;  %v7656_v22 = vpop.f32.mrb[122].mxu1  ;;  %v7593_v41 = vpop.f32.mrb[123].mxu0 }
 0x2f5   : > { %v7657_v44 = vpop.f32.mrb[123].mxu1  ;;  %v7594_v48 = vadd.f32 %v7593_v41, %v7592_v57 }
 0x2f6   : > { %v2655_v32 = vadd.f32 %v7655_v31, %v7591_v12  ;;  %v7658_v30 = vadd.f32 %v7657_v44, %v7656_v22 }
 0x2f8   : > { %v2658_v11 = vadd.f32 %v7658_v30, %v7594_v48  ;;  %v2829_v48 = vmul.f32 %v9989_v58, %v9976_v18  ;;  %v2830_v30 = vmul.f32 %v9991_v35, %v9979_v26  ;;  %v2831_v26 = vmul.f32 %v10015_v29, %v9998_v1 }
 0x2f9   : > { %v7595_v62 = vpop.f32.mrb[124].mxu0  ;;  %v2833_v1 = vmul.f32 %v10043_v3, %v10026_v50  ;;  %v2835_v50 = vmul.f32 %v10071_v43, %v10054_v39  ;;  %v2837_v39 = vmul.f32 %v10099_v55, %v10082_v28  ;;  %v2839_v28 = vmul.f32 %v10127_v6, %v10110_v16  ;;  %v11342_v6 = vld [vmem:[#allocation31_spill] sm:$0xff] }
 0x2fa   : > { %v2899_v4 = vpack.c.bf16 %v2658_v11, %v2655_v32  ;;  %v7659_v59 = vpop.f32.mrb[124].mxu1  ;;  %v2766_v37 = vpop.permute.xlu0 %2765  ;;  %v2841_v16 = vmul.f32 %v10155_v56, %v10138_v33  ;;  %v11344_v33 = vld [vmem:[#allocation33_spill] sm:$0xff]  ;;  %v11345_v56 = vld [vmem:[#allocation36_spill] sm:$0xff] }
 0x2fb   : > { %v7596_v54 = vpop.f32.mrb[125].mxu0  ;;  %v7660_v20 = vpop.f32.mrb[125].mxu1 }
 0x2fc   : > { %2907 = vst [vmem:[#allocation3 + $0x68] sm:$0xff] %v2899_v4  ;;  %v7597_v10 = vadd.f32 %v7596_v54, %v7595_v62  ;;  %v7598_v21 = vpop.f32.mrb[126].mxu0  ;;  %v7661_v63 = vadd.f32 %v7660_v20, %v7659_v59  ;;  %v7662_v60 = vpop.f32.mrb[126].mxu1 }
 0x2fd   : > { %v2768_v8 = vpop.permute.xlu1 %2767  ;;  %v7599_v5 = vpop.f32.mrb[127].mxu0 }
 0x2fe   : > { %v7663_v45 = vpop.f32.mrb[127].mxu1  ;;  %v2702_v36 = vpop.permute.xlu0 %2701  ;;  %v2663_v19 = vadd.f32 %v7661_v63, %v7597_v10  ;;  %v7600_v12 = vadd.f32 %v7599_v5, %v7598_v21 }
 0x2ff   : > { %v7664_v31 = vadd.f32 %v7663_v45, %v7662_v60  ;;  %v2813_v57 = vsel %vm1672_vm0, %v2702_v36, %v2766_v37 }
 0x300   : > { %v2845_v22 = vmul.f32 %v2813_v57, %v9973_v7 }
 0x301   : > { %v2704_v41 = vpop.permute.xlu1 %2703  ;;  %v2666_v44 = vadd.f32 %v7664_v31, %v7600_v12 }
 0x302   : > { %v2814_v32 = vsel %vm1672_vm0, %v2704_v41, %v2768_v8  ;;  %v2770_v4 = vpop.permute.xlu0 %2769  ;;  %v2861_v59 = vadd.f32 %v2845_v22, %v2829_v48 }
 0x303   : > { %v2846_v11 = vmul.f32 %v2814_v32, %v9981_v27  ;;  %v2900_v62 = vpack.c.bf16 %v2666_v44, %v2663_v19  ;;  %v2832_v27 = vmul.f32 %v10019_v46, %v10002_v42  ;;  %v2834_v42 = vmul.f32 %v10047_v13, %v10030_v25 }
 0x304   : > { %v2836_v25 = vmul.f32 %v10075_v14, %v10058_v0  ;;  %v2838_v0 = vmul.f32 %v10103_v15, %v10086_v17  ;;  %v2840_v17 = vmul.f32 %v10131_v47, %v10114_v23  ;;  %v2842_v23 = vmul.f32 %v10159_v53, %v10142_v34  ;;  %v11346_v53 = vld [vmem:[#allocation34_spill] sm:$0xff]  ;;  %v11347_v34 = vld [vmem:[#allocation37_spill] sm:$0xff] }
 0x305   : > { %v2862_v54 = vadd.f32 %v2846_v11, %v2830_v30  ;;  %v2772_v10 = vpop.permute.xlu1 %2771  ;;  %2908 = vst [vmem:[#allocation3 + $0x78] sm:$0xff] %v2900_v62 }
 0x306   : > { %v2706_v7 = vpop.permute.xlu0 %2705 }
 0x307   : > { %v2877_v37 = vpack.c.bf16 %v2862_v54, %v2861_v59  ;;  %v2815_v20 = vsel %vm1672_vm0, %v2706_v7, %v2770_v4 }
 0x308   : > { %v2847_v21 = vmul.f32 %v2815_v20, %v9995_v51 }
 0x309   : > { %2885 = vst [vmem:[#allocation2 + $0x8] sm:$0xff] %v2877_v37  ;;  %v2708_v8 = vpop.permute.xlu1 %2707 }
 0x30a   : > { %v2816_v18 = vsel %vm1672_vm0, %v2708_v8, %v2772_v10  ;;  %v2774_v35 = vpop.permute.xlu0 %2773  ;;  %v2863_v63 = vadd.f32 %v2847_v21, %v2831_v26 }
 0x30b   : > { %v2848_v58 = vmul.f32 %v2816_v18, %v10005_v2 }
 0x30d   : > { %v2864_v60 = vadd.f32 %v2848_v58, %v2832_v27  ;;  %v2776_v5 = vpop.permute.xlu1 %2775 }
 0x30e   : > { %v2710_v36 = vpop.permute.xlu0 %2709 }
 0x30f   : > { %v2878_v45 = vpack.c.bf16 %v2864_v60, %v2863_v63  ;;  %v2817_v19 = vsel %vm1672_vm0, %v2710_v36, %v2774_v35 }
 0x310   : > { %v2849_v51 = vmul.f32 %v2817_v19, %v10023_v61 }
 0x311   : > { %2886 = vst [vmem:[#allocation2 + $0x18] sm:$0xff] %v2878_v45  ;;  %v2712_v12 = vpop.permute.xlu1 %2711 }
 0x312   : > { %v2818_v31 = vsel %vm1672_vm0, %v2712_v12, %v2776_v5  ;;  %v2778_v29 = vpop.permute.xlu0 %2777  ;;  %v2865_v46 = vadd.f32 %v2849_v51, %v2833_v1 }
 0x313   : > { %v2850_v2 = vmul.f32 %v2818_v31, %v10033_v40 }
 0x315   : > { %v2866_v57 = vadd.f32 %v2850_v2, %v2834_v42  ;;  %v2780_v22 = vpop.permute.xlu1 %2779 }
 0x316   : > { %v2714_v44 = vpop.permute.xlu0 %2713 }
 0x317   : > { %v2879_v41 = vpack.c.bf16 %v2866_v57, %v2865_v46  ;;  %v2819_v32 = vsel %vm1672_vm0, %v2714_v44, %v2778_v29  ;;  %v11343_v57 = vld [vmem:[#allocation32_spill] sm:$0xff] }
 0x318   : > { %v2851_v61 = vmul.f32 %v2819_v32, %v10051_v9  ;;  %v2843_v32 = vmul.f32 %v11345_v56, %v11344_v33 }
 0x319   : > { %2887 = vst [vmem:[#allocation2 + $0x28] sm:$0xff] %v2879_v41  ;;  %v2716_v48 = vpop.permute.xlu1 %2715 }
 0x31a   : > { %v2820_v30 = vsel %vm1672_vm0, %v2716_v48, %v2780_v22  ;;  %v2782_v3 = vpop.permute.xlu0 %2781  ;;  %v2867_v13 = vadd.f32 %v2851_v61, %v2835_v50  ;;  %v2844_v61 = vmul.f32 %v11347_v34, %v11346_v53  ;;  %v11348_v48 = vld [vmem:[#allocation35_spill] sm:$0xff] }
 0x31b   : > { %v2852_v40 = vmul.f32 %v2820_v30, %v10061_v24 }
 0x31d   : > { %v2868_v11 = vadd.f32 %v2852_v40, %v2836_v25  ;;  %v2784_v4 = vpop.permute.xlu1 %2783 }
 0x31e   : > { %v2718_v59 = vpop.permute.xlu0 %2717 }
 0x31f   : > { %v2880_v62 = vpack.c.bf16 %v2868_v11, %v2867_v13  ;;  %v2821_v54 = vsel %vm1672_vm0, %v2718_v59, %v2782_v3 }
 0x320   : > { %v2853_v9 = vmul.f32 %v2821_v54, %v10079_v38 }
 0x321   : > { %2888 = vst [vmem:[#allocation2 + $0x38] sm:$0xff] %v2880_v62  ;;  %v2720_v10 = vpop.permute.xlu1 %2719 }
 0x322   : > { %v2822_v37 = vsel %vm1672_vm0, %v2720_v10, %v2784_v4  ;;  %v2786_v43 = vpop.permute.xlu0 %2785  ;;  %v2869_v14 = vadd.f32 %v2853_v9, %v2837_v39 }
 0x323   : > { %v2854_v24 = vmul.f32 %v2822_v37, %v10089_v49  ;;  %v11340_v49 = vld [vmem:[#allocation29_spill] sm:$0xff] }
 0x325   : > { %v2870_v7 = vadd.f32 %v2854_v24, %v2838_v0  ;;  %v2788_v20 = vpop.permute.xlu1 %2787 }
 0x326   : > { %v2722_v8 = vpop.permute.xlu0 %2721 }
 0x327   : > { %v2881_v21 = vpack.c.bf16 %v2870_v7, %v2869_v14  ;;  %v2823_v18 = vsel %vm1672_vm0, %v2722_v8, %v2786_v43 }
 0x328   : > { %v2855_v38 = vmul.f32 %v2823_v18, %v10107_v52  ;;  %v11341_v52 = vld [vmem:[#allocation30_spill] sm:$0xff] }
 0x329   : > { %2889 = vst [vmem:[#allocation2 + $0x48] sm:$0xff] %v2881_v21  ;;  %v2724_v26 = vpop.permute.xlu1 %2723 }
 0x32a   : > { %v2824_v27 = vsel %vm1672_vm0, %v2724_v26, %v2788_v20  ;;  %v2790_v15 = vpop.permute.xlu0 %2789  ;;  %v2871_v58 = vadd.f32 %v2855_v38, %v2839_v28 }
 0x32b   : > { %v2856_v55 = vmul.f32 %v2824_v27, %v11340_v49 }
 0x32d   : > { %v2872_v35 = vadd.f32 %v2856_v55, %v2840_v17  ;;  %v2792_v63 = vpop.permute.xlu1 %2791 }
 0x32e   : > { %v2726_v5 = vpop.permute.xlu0 %2725 }
 0x32f   : > { %v2882_v60 = vpack.c.bf16 %v2872_v35, %v2871_v58  ;;  %v2825_v45 = vsel %vm1672_vm0, %v2726_v5, %v2790_v15 }
 0x330   : > { %v2857_v36 = vmul.f32 %v2825_v45, %v11341_v52 }
 0x331   : > { %2890 = vst [vmem:[#allocation2 + $0x58] sm:$0xff] %v2882_v60  ;;  %v2728_v19 = vpop.permute.xlu1 %2727 }
 0x332   : > { %v2826_v51 = vsel %vm1672_vm0, %v2728_v19, %v2792_v63  ;;  %v2873_v31 = vadd.f32 %v2857_v36, %v2841_v16 }
 0x333   : > { %v2858_v47 = vmul.f32 %v2826_v51, %v11342_v6 }
 0x334   : > { %v2730_v12 = vpop.permute.xlu0 %2729 }
 0x335   : > { %v2874_v1 = vadd.f32 %v2858_v47, %v2842_v23 }
 0x336   : > { %v2732_v2 = vpop.permute.xlu1 %2731 }
 0x337   : > { %v2883_v42 = vpack.c.bf16 %v2874_v1, %v2873_v31 }
 0x338   : > { %v2794_v29 = vpop.permute.xlu0 %2793 }
 0x339   : > { %2891 = vst [vmem:[#allocation2 + $0x68] sm:$0xff] %v2883_v42  ;;  %v2827_v46 = vsel %vm1672_vm0, %v2730_v12, %v2794_v29 }
 0x33a   : > { %v2859_v22 = vmul.f32 %v2827_v46, %v11343_v57  ;;  %v2796_v41 = vpop.permute.xlu1 %2795 }
 0x33b   : > { %v2828_v44 = vsel %vm1672_vm0, %v2732_v2, %v2796_v41 }
 0x33c   : > { %v2860_v30 = vmul.f32 %v2828_v44, %v11348_v48  ;;  %v2875_v50 = vadd.f32 %v2859_v22, %v2843_v32 }
 0x33e   : > { %v2876_v25 = vadd.f32 %v2860_v30, %v2844_v61 }
 0x340   : > { %v2884_v40 = vpack.c.bf16 %v2876_v25, %v2875_v50 }
 0x342   : > { %2892 = vst [vmem:[#allocation2 + $0x78] sm:$0xff] %v2884_v40 }
 0x343 PF: > { %v8372_v3 = vld [vmem:[#allocation8 + $0x4] ss:$16 sps:$4 sm:$0xff]   ;;  %s11349_s8 = sld [smem:[#allocation25_spill]]  ;;  %v8374_v13 = vld [vmem:[#allocation8] ss:$16 sps:$4 sm:$0xff]   ;;  %s9269_s18 = smov 64  }
 0x344   : > { %3779 = vmatprep.subr.bf16.mxu0 %v8372_v3  ;;  %v8375_v11 = vld [vmem:[#allocation8 + $0x24] ss:$16 sps:$4 sm:$0xff]   ;;  %v8377_v4 = vld [vmem:[#allocation8 + $0x20] ss:$16 sps:$4 sm:$0xff]   ;;  %vm4177_vm1 = vcmask 523264   ;;  %p11382_p6 = scmp.ne.s32.totalorder %s11322_s21, 0 }
 0x345   : > { %3780 = vmatpush1.bf16.msra.mxu0 %v8374_v13  ;;  %v8378_v62 = vld [vmem:[#allocation8 + $0x44] ss:$16 sps:$4 sm:$0xff]   ;;  %v8380_v59 = vld [vmem:[#allocation8 + $0x40] ss:$16 sps:$4 sm:$0xff]  }
 0x346   : > { %3781 = vmatprep.subr.bf16.mxu0 %v8375_v11  ;;  %v8381_v54 = vld [vmem:[#allocation8 + $0x64] ss:$16 sps:$4 sm:$0xff]   ;;  %v8383_v9 = vld [vmem:[#allocation8 + $0x60] ss:$16 sps:$4 sm:$0xff]  }
 0x347   : > { %v8384_v10 = vld [vmem:[#allocation8 + $0x84] ss:$16 sps:$4 sm:$0xff]   ;;  %v8386_v37 = vld [vmem:[#allocation8 + $0x80] ss:$16 sps:$4 sm:$0xff]  }
 0x348   : > { %v8387_v39 = vld [vmem:[#allocation8 + $0xa4] ss:$16 sps:$4 sm:$0xff]   ;;  %v8389_v0 = vld [vmem:[#allocation8 + $0xa0] ss:$16 sps:$4 sm:$0xff]  }
 0x349   : > { %3782 = vmatpush1.bf16.msra.mxu0 %v8377_v4  ;;  %s10262_s27 = sshll.u32 %s11349_s8, 6  ;;  %v8390_v24 = vld [vmem:[#allocation8 + $0xc4] ss:$16 sps:$4 sm:$0xff]   ;;  %v8392_v14 = vld [vmem:[#allocation8 + $0xc0] ss:$16 sps:$4 sm:$0xff]   ;;  %s7152_s3 = sshll.u32 %s11349_s8, 5 }
 0x34a   : > { %3783 = vmatprep.subr.bf16.mxu0 %v8378_v62  ;;  %s2910_s15 = sshra.s32 %s10262_s27, 3  ;;  %v8393_v7 = vld [vmem:[#allocation8 + $0xe4] ss:$16 sps:$4 sm:$0xff]   ;;  %v8395_v20 = vld [vmem:[#allocation8 + $0xe0] ss:$16 sps:$4 sm:$0xff]   ;;  %s10436_s30 = scalar_lea.vmem [#allocation16], %s10262_s27 }
 0x34b   : > { %s7151_s0 = sshll.u32 %s2910_s15, 4  ;;  %v8396_v21 = vld [vmem:[#allocation8 + $0x104] ss:$16 sps:$4 sm:$0xff]   ;;  %v8398_v8 = vld [vmem:[#allocation8 + $0x100] ss:$16 sps:$4 sm:$0xff]   ;;  %s10443_s16 = scalar_lea.vmem [#allocation14], %s10262_s27 }
 0x34c   : > { %s10266_s2 = scalar_lea.vmem %s9629_s7, %s7151_s0 [#allocation5]  ;;  %v8399_v18 = vld [vmem:[#allocation8 + $0x124] ss:$16 sps:$4 sm:$0xff]   ;;  %v8401_v38 = vld [vmem:[#allocation8 + $0x120] ss:$16 sps:$4 sm:$0xff]   ;;  %s11379_s7 = sld [smem:[#allocation26_spill]] }
 0x34d   : > { %3784 = vmatpush1.bf16.msra.mxu0 %v8380_v59  ;;  %v8422_v43 = vld [vmem:[%s10266_s2 + $0x4] ss:$16 sps:$4 sm:$0xff]   ;;  %v8404_v27 = vld [vmem:[#allocation8 + $0x140] ss:$16 sps:$4 sm:$0xff]   ;;  %v10297_v56 = vld [vmem:[%s10266_s2 + $0xc] ss:$16 sps:$4 sm:$0xff]  }
 0x34e   : > { %3785 = vmatprep.subr.bf16.mxu0 %v8381_v54  ;;  %3811 = vmatprep.mubr.bf16.mxu0 %v8422_v43  ;;  %v8402_v26 = vld [vmem:[#allocation8 + $0x144] ss:$16 sps:$4 sm:$0xff]   ;;  %v8407_v17 = vld [vmem:[#allocation8 + $0x160] ss:$16 sps:$4 sm:$0xff]   ;;  %s6535_s8 = sshll.u32 %s9650_s25, 4  ;;  %s11183_s8 = int_to_ptr.vmem [resolvable:$true] %s6535_s8 }
 0x34f   : > { %3957 = vmatprep.mubr.bf16.mxu1 %v8422_v43  ;;  %v8405_v28 = vld [vmem:[#allocation8 + $0x164] ss:$16 sps:$4 sm:$0xff]   ;;  %v8410_v55 = vld [vmem:[#allocation8 + $0x180] ss:$16 sps:$4 sm:$0xff]   ;;  %v10318_v43 = vld [vmem:[%s10266_s2 + $0x48] ss:$16 sps:$4 sm:$0xff]  }
 0x350   : > { %v8408_v49 = vld [vmem:[#allocation8 + $0x184] ss:$16 sps:$4 sm:$0xff]   ;;  %v8413_v58 = vld [vmem:[#allocation8 + $0x1a0] ss:$16 sps:$4 sm:$0xff]  }
 0x351   : > { %3786 = vmatpush1.bf16.msra.mxu0 %v8383_v9  ;;  %v8411_v15 = vld [vmem:[#allocation8 + $0x1a4] ss:$16 sps:$4 sm:$0xff]   ;;  %v8416_v63 = vld [vmem:[#allocation8 + $0x1c0] ss:$16 sps:$4 sm:$0xff]  }
 0x352   : > { %3787 = vmatprep.subr.bf16.mxu0 %v8384_v10  ;;  %v8414_v35 = vld [vmem:[#allocation8 + $0x1c4] ss:$16 sps:$4 sm:$0xff]   ;;  %v8419_v5 = vld [vmem:[#allocation8 + $0x1e0] ss:$16 sps:$4 sm:$0xff]   ;;  %s7146_s17 = sshll.u32 %s11379_s7, 6  ;;  %s9270_s7 = smov [#allocation17]  }
 0x353   : > { %v8417_v60 = vld [vmem:[#allocation8 + $0x1e4] ss:$16 sps:$4 sm:$0xff]   ;;  %v10270_v52 = vld [vmem:[%s10266_s2] ss:$16 sps:$4 sm:$0xff]   ;;  %s6532_s14 = sadd.s32 %s7152_s3, %s7146_s17  ;;  %s9125_s3 = sshll.u32 %s9270_s7, 4  ;;  %s9126_s3 = int_to_ptr.vmem [resolvable:$false] %s9125_s3 }
 0x354   : > { %v8425_v45 = vld [vmem:[#allocation8 + $0x204] ss:$16 sps:$4 sm:$0xff]   ;;  %v8423_v36 = vld [vmem:[#allocation8 + $0x200] ss:$16 sps:$4 sm:$0xff]   ;;  %s7147_s13 = sshll.u32 %s6532_s14, 7  ;;  %s9127_s17 = scalar_lea.vmem %s9126_s3, 8192 }
 0x355   : > { %3788 = vmatpush1.bf16.msra.mxu0 %v8386_v37  ;;  %v10273_v19 = vld [vmem:[%s10266_s2 + $0x24] ss:$16 sps:$4 sm:$0xff]   ;;  %v8426_v16 = vld [vmem:[#allocation8 + $0x220] ss:$16 sps:$4 sm:$0xff]   ;;  %v10302_v37 = vld [vmem:[%s10266_s2 + $0x8] ss:$16 sps:$4 sm:$0xff]   ;;  %p9128_p5 = scmp.lt.s32.totalorder %s11183_s8, %s9126_s3 }
 0x356   : > { %3789 = vmatprep.subr.bf16.mxu0 %v8387_v39  ;;  %v8428_v51 = vld [vmem:[#allocation8 + $0x224] ss:$16 sps:$4 sm:$0xff]   ;;  %v10278_v6 = vld [vmem:[%s10266_s2 + $0x20] ss:$16 sps:$4 sm:$0xff]   ;;  %v10305_v39 = vld [vmem:[%s10266_s2 + $0x2c] ss:$16 sps:$4 sm:$0xff]  }
 0x357   : > { %v8431_v23 = vld [vmem:[#allocation8 + $0x244] ss:$16 sps:$4 sm:$0xff]   ;;  %v8429_v47 = vld [vmem:[#allocation8 + $0x240] ss:$16 sps:$4 sm:$0xff]  }
 0x358   : > { %v10281_v12 = vld [vmem:[%s10266_s2 + $0x44] ss:$16 sps:$4 sm:$0xff]   ;;  %v8432_v1 = vld [vmem:[#allocation8 + $0x260] ss:$16 sps:$4 sm:$0xff]  }
 0x359   : > { %3790 = vmatpush1.bf16.msra.mxu0 %v8389_v0  ;;  %v8434_v31 = vld [vmem:[#allocation8 + $0x264] ss:$16 sps:$4 sm:$0xff]   ;;  %v10286_v2 = vld [vmem:[%s10266_s2 + $0x40] ss:$16 sps:$4 sm:$0xff]   ;;  %v10310_v0 = vld [vmem:[%s10266_s2 + $0x28] ss:$16 sps:$4 sm:$0xff]  }
 0x35a   : > { %3791 = vmatprep.subr.bf16.mxu0 %v8390_v24  ;;  %v8437_v42 = vld [vmem:[#allocation8 + $0x284] ss:$16 sps:$4 sm:$0xff]   ;;  %v8435_v29 = vld [vmem:[#allocation8 + $0x280] ss:$16 sps:$4 sm:$0xff]   ;;  %v10313_v24 = vld [vmem:[%s10266_s2 + $0x4c] ss:$16 sps:$4 sm:$0xff]  }
 0x35b   : > { %v10289_v46 = vld [vmem:[%s10266_s2 + $0x64] ss:$16 sps:$4 sm:$0xff]   ;;  %v8438_v22 = vld [vmem:[#allocation8 + $0x2a0] ss:$16 sps:$4 sm:$0xff]  }
 0x35c   : > { %v8440_v57 = vld [vmem:[#allocation8 + $0x2a4] ss:$16 sps:$4 sm:$0xff]   ;;  %v10294_v44 = vld [vmem:[%s10266_s2 + $0x60] ss:$16 sps:$4 sm:$0xff]  }
 0x35d   : > { %3792 = vmatpush1.bf16.msra.mxu0 %v8392_v14  ;;  %v8443_v41 = vld [vmem:[#allocation8 + $0x2c4] ss:$16 sps:$4 sm:$0xff]   ;;  %v8441_v33 = vld [vmem:[#allocation8 + $0x2c0] ss:$16 sps:$4 sm:$0xff]   ;;  %v10321_v14 = vld [vmem:[%s10266_s2 + $0x6c] ss:$16 sps:$4 sm:$0xff]  }
 0x35e   : > { %3793 = vmatprep.subr.bf16.mxu0 %v8393_v7  ;;  %v8446_v32 = vld [vmem:[#allocation8 + $0x2e4] ss:$16 sps:$4 sm:$0xff]   ;;  %v8444_v53 = vld [vmem:[#allocation8 + $0x2e0] ss:$16 sps:$4 sm:$0xff]   ;;  %v10326_v7 = vld [vmem:[%s10266_s2 + $0x68] ss:$16 sps:$4 sm:$0xff]  }
 0x35f   : > { %v8449_v34 = vld [vmem:[#allocation8 + $0x304] ss:$16 sps:$4 sm:$0xff]   ;;  %v8447_v61 = vld [vmem:[#allocation8 + $0x300] ss:$16 sps:$4 sm:$0xff]   ;;  %s11381_s2 = sld [smem:[#allocation55_spill]] }
 0x360   : > { %v8452_v48 = vld [vmem:[#allocation8 + $0x324] ss:$16 sps:$4 sm:$0xff]   ;;  %v8450_v30 = vld [vmem:[#allocation8 + $0x320] ss:$16 sps:$4 sm:$0xff]  }
 0x361   : > { %3794 = vmatpush1.bf16.msra.mxu0 %v8395_v20  ;;  %v8458_v50 = vld [vmem:[#allocation8 + $0x344] ss:$16 sps:$4 sm:$0xff]   ;;  %v8456_v25 = vld [vmem:[#allocation8 + $0x340] ss:$16 sps:$4 sm:$0xff]  }
 0x362   : > { %3795 = vmatprep.subr.bf16.mxu0 %v8396_v21  ;;  %v8461_v40 = vld [vmem:[#allocation8 + $0x364] ss:$16 sps:$4 sm:$0xff]   ;;  %v8459_v3 = vld [vmem:[#allocation8 + $0x360] ss:$16 sps:$4 sm:$0xff]  }
 0x363   : > { %v8467_v13 = vld [vmem:[#allocation8 + $0x384] ss:$16 sps:$4 sm:$0xff]   ;;  %v8465_v11 = vld [vmem:[#allocation8 + $0x380] ss:$16 sps:$4 sm:$0xff]  }
 0x364   : > { %v8470_v4 = vld [vmem:[#allocation8 + $0x3a4] ss:$16 sps:$4 sm:$0xff]   ;;  %v8468_v62 = vld [vmem:[#allocation8 + $0x3a0] ss:$16 sps:$4 sm:$0xff]  }
 0x365   : > { %3796 = vmatpush1.bf16.msra.mxu0 %v8398_v8  ;;  %v8476_v59 = vld [vmem:[#allocation8 + $0x3c4] ss:$16 sps:$4 sm:$0xff]   ;;  %v8474_v54 = vld [vmem:[#allocation8 + $0x3c0] ss:$16 sps:$4 sm:$0xff]  }
 0x366   : > { %3797 = vmatprep.subr.bf16.mxu0 %v8399_v18  ;;  %v8479_v9 = vld [vmem:[#allocation8 + $0x3e4] ss:$16 sps:$4 sm:$0xff]   ;;  %v8477_v10 = vld [vmem:[#allocation8 + $0x3e0] ss:$16 sps:$4 sm:$0xff]  }
 0x367   : > { %v10329_v20 = vld [vmem:[#allocation2] sm:$0xff]  ;;  %v10331_v21 = vld [vmem:[#allocation2 + $0x10] sm:$0xff] }
 0x368   : > { %v10336_v8 = vld [vmem:[#allocation2 + $0x20] sm:$0xff]  ;;  %v10340_v18 = vld [vmem:[#allocation2 + $0x30] sm:$0xff] }
 0x369   : > { %3798 = vmatpush1.bf16.msra.mxu0 %v8401_v38  ;;  %v10344_v38 = vld [vmem:[#allocation2 + $0x40] sm:$0xff] }
 0x36a   : > { %3799 = vmatprep.subr.bf16.mxu0 %v8402_v26  ;;  %v10348_v26 = vld [vmem:[#allocation2 + $0x50] sm:$0xff] }
 0x36d   : > { %3800 = vmatpush1.bf16.msra.mxu0 %v8404_v27  ;;  %v10353_v27 = vld [vmem:[#allocation2 + $0x60] sm:$0xff] }
 0x36e   : > { %3801 = vmatprep.subr.bf16.mxu0 %v8405_v28 }
 0x371   : > { %3802 = vmatpush1.bf16.msra.mxu0 %v8407_v17 }
 0x372   : > { %3803 = vmatprep.subr.bf16.mxu0 %v8408_v49 }
 0x375   : > { %3804 = vmatpush1.bf16.msra.mxu0 %v8410_v55 }
 0x376   : > { %3805 = vmatprep.subr.bf16.mxu0 %v8411_v15  ;;  %v10366_v15 = vld [vmem:[#allocation2 + $0x70] sm:$0xff] }
 0x379   : > { %3806 = vmatpush1.bf16.msra.mxu0 %v8413_v58 }
 0x37a   : > { %3807 = vmatprep.subr.bf16.mxu0 %v8414_v35 }
 0x37d   : > { %3808 = vmatpush1.bf16.msra.mxu0 %v8416_v63 }
 0x37e   : > { %3809 = vmatprep.subr.bf16.mxu0 %v8417_v60 }
 0x381   : > { %3810 = vmatpush1.bf16.msra.mxu0 %v8419_v5 }
 0x382   : > { %3852 = vmatprep.subr.bf16.mxu0 %v8425_v45 }
 0x384   : > { %3812 = vmatmul.mubr.bf16.vlgmr.msra.gmra.mrb[0].mxu0 %v10270_v52 }
 0x385   : > { %3853 = vmatpush1.bf16.msra.mxu0 %v8423_v36  ;;  %3821 = vmatprep.mubr.bf16.mxu0 %v10273_v19 }
 0x386   : > { %3854 = vmatprep.subr.bf16.mxu0 %v8428_v51 }
 0x389   : > { %3855 = vmatpush1.bf16.msra.mxu0 %v8426_v16 }
 0x38a   : > { %3856 = vmatprep.subr.bf16.mxu0 %v8431_v23 }
 0x38c   : > { %3822 = vmatmul.mubr.bf16.gmra.mrb[4].mxu0 %v10278_v6 }
 0x38d   : > { %3857 = vmatpush1.bf16.msra.mxu0 %v8429_v47  ;;  %3831 = vmatprep.mubr.bf16.mxu0 %v10281_v12 }
 0x38e   : > { %3858 = vmatprep.subr.bf16.mxu0 %v8434_v31 }
 0x391   : > { %3859 = vmatpush1.bf16.msra.mxu0 %v8432_v1 }
 0x392   : > { %3860 = vmatprep.subr.bf16.mxu0 %v8437_v42 }
 0x394   : > { %3832 = vmatmul.mubr.bf16.gmra.mrb[8].mxu0 %v10286_v2 }
 0x395   : > { %3861 = vmatpush1.bf16.msra.mxu0 %v8435_v29  ;;  %3841 = vmatprep.mubr.bf16.mxu0 %v10289_v46 }
 0x396   : > { %3862 = vmatprep.subr.bf16.mxu0 %v8440_v57 }
 0x399   : > { %3863 = vmatpush1.bf16.msra.mxu0 %v8438_v22 }
 0x39a   : > { %3864 = vmatprep.subr.bf16.mxu0 %v8443_v41 }
 0x39c   : > { %3842 = vmatmul.mubr.bf16.gmra.mrb[12].mxu0 %v10294_v44 }
 0x39d   : > { %3865 = vmatpush1.bf16.msra.mxu0 %v8441_v33  ;;  %3884 = vmatprep.mubr.bf16.mxu0 %v10297_v56 }
 0x39e   : > { %3866 = vmatprep.subr.bf16.mxu0 %v8446_v32 }
 0x3a1   : > { %3867 = vmatpush1.bf16.msra.mxu0 %v8444_v53  ;;  %v8492_v53 = vld [vmem:[#allocation8 + $0xc] ss:$16 sps:$4 sm:$0xff]  }
 0x3a2   : > { %3868 = vmatprep.subr.bf16.mxu0 %v8449_v34  ;;  %v8494_v34 = vld [vmem:[#allocation8 + $0x8] ss:$16 sps:$4 sm:$0xff]   ;;  %3925 = vmatprep.subr.bf16.mxu1 %v8492_v53  ;;  %v8528_v53 = vld [vmem:[#allocation8 + $0x18c] ss:$16 sps:$4 sm:$0xff]  }
 0x3a3   : > { %3926 = vmatpush1.bf16.msra.mxu1 %v8494_v34  ;;  %v8530_v34 = vld [vmem:[#allocation8 + $0x188] ss:$16 sps:$4 sm:$0xff]  }
 0x3a5   : > { %3869 = vmatpush1.bf16.msra.mxu0 %v8447_v61  ;;  %v8495_v61 = vld [vmem:[#allocation8 + $0x2c] ss:$16 sps:$4 sm:$0xff]  }
 0x3a6   : > { %3870 = vmatprep.subr.bf16.mxu0 %v8452_v48  ;;  %v8497_v48 = vld [vmem:[#allocation8 + $0x28] ss:$16 sps:$4 sm:$0xff]   ;;  %3927 = vmatprep.subr.bf16.mxu1 %v8495_v61  ;;  %v8531_v61 = vld [vmem:[#allocation8 + $0x1ac] ss:$16 sps:$4 sm:$0xff]  }
 0x3a7   : > { %3928 = vmatpush1.bf16.msra.mxu1 %v8497_v48  ;;  %v8533_v48 = vld [vmem:[#allocation8 + $0x1a8] ss:$16 sps:$4 sm:$0xff]  }
 0x3a9   : > { %3871 = vmatpush1.bf16.msra.mxu0 %v8450_v30 }
 0x3aa   : > { %3872 = vmatprep.subr.bf16.mxu0 %v8458_v50  ;;  %v8498_v50 = vld [vmem:[#allocation8 + $0x4c] ss:$16 sps:$4 sm:$0xff]  }
 0x3ab   : > { %3929 = vmatprep.subr.bf16.mxu1 %v8498_v50  ;;  %v8536_v50 = vld [vmem:[#allocation8 + $0x1c8] ss:$16 sps:$4 sm:$0xff]  }
 0x3ad   : > { %3873 = vmatpush1.bf16.msra.mxu0 %v8456_v25  ;;  %v8500_v25 = vld [vmem:[#allocation8 + $0x48] ss:$16 sps:$4 sm:$0xff]  }
 0x3ae   : > { %3874 = vmatprep.subr.bf16.mxu0 %v8461_v40  ;;  %v8501_v40 = vld [vmem:[#allocation8 + $0x6c] ss:$16 sps:$4 sm:$0xff]   ;;  %3930 = vmatpush1.bf16.msra.mxu1 %v8500_v25 }
 0x3af   : > { %3931 = vmatprep.subr.bf16.mxu1 %v8501_v40  ;;  %v8537_v25 = vld [vmem:[#allocation8 + $0x1ec] ss:$16 sps:$4 sm:$0xff]   ;;  %v8539_v40 = vld [vmem:[#allocation8 + $0x1e8] ss:$16 sps:$4 sm:$0xff]  }
 0x3b1   : > { %3875 = vmatpush1.bf16.msra.mxu0 %v8459_v3  ;;  %v8503_v3 = vld [vmem:[#allocation8 + $0x68] ss:$16 sps:$4 sm:$0xff]  }
 0x3b2   : > { %3876 = vmatprep.subr.bf16.mxu0 %v8467_v13  ;;  %v8504_v13 = vld [vmem:[#allocation8 + $0x8c] ss:$16 sps:$4 sm:$0xff]   ;;  %3932 = vmatpush1.bf16.msra.mxu1 %v8503_v3 }
 0x3b3   : > { %3933 = vmatprep.subr.bf16.mxu1 %v8504_v13  ;;  %v8542_v3 = vld [vmem:[#allocation8 + $0x20c] ss:$16 sps:$4 sm:$0xff]   ;;  %v8540_v13 = vld [vmem:[#allocation8 + $0x208] ss:$16 sps:$4 sm:$0xff]  }
 0x3b5   : > { %3877 = vmatpush1.bf16.msra.mxu0 %v8465_v11  ;;  %v8506_v11 = vld [vmem:[#allocation8 + $0x88] ss:$16 sps:$4 sm:$0xff]  }
 0x3b6   : > { %3878 = vmatprep.subr.bf16.mxu0 %v8470_v4  ;;  %v8507_v4 = vld [vmem:[#allocation8 + $0xac] ss:$16 sps:$4 sm:$0xff]   ;;  %3934 = vmatpush1.bf16.msra.mxu1 %v8506_v11 }
 0x3b7   : > { %3935 = vmatprep.subr.bf16.mxu1 %v8507_v4  ;;  %v8545_v11 = vld [vmem:[#allocation8 + $0x22c] ss:$16 sps:$4 sm:$0xff]   ;;  %v8543_v4 = vld [vmem:[#allocation8 + $0x228] ss:$16 sps:$4 sm:$0xff]  }
 0x3b9   : > { %3879 = vmatpush1.bf16.msra.mxu0 %v8468_v62  ;;  %v8509_v62 = vld [vmem:[#allocation8 + $0xa8] ss:$16 sps:$4 sm:$0xff]  }
 0x3ba   : > { %3880 = vmatprep.subr.bf16.mxu0 %v8476_v59  ;;  %v8510_v59 = vld [vmem:[#allocation8 + $0xcc] ss:$16 sps:$4 sm:$0xff]   ;;  %3936 = vmatpush1.bf16.msra.mxu1 %v8509_v62 }
 0x3bb   : > { %3937 = vmatprep.subr.bf16.mxu1 %v8510_v59  ;;  %v8548_v62 = vld [vmem:[#allocation8 + $0x24c] ss:$16 sps:$4 sm:$0xff]   ;;  %v8546_v59 = vld [vmem:[#allocation8 + $0x248] ss:$16 sps:$4 sm:$0xff]  }
 0x3bd   : > { %3881 = vmatpush1.bf16.msra.mxu0 %v8474_v54  ;;  %v8512_v54 = vld [vmem:[#allocation8 + $0xc8] ss:$16 sps:$4 sm:$0xff]  }
 0x3be   : > { %3882 = vmatprep.subr.bf16.mxu0 %v8479_v9  ;;  %v8513_v9 = vld [vmem:[#allocation8 + $0xec] ss:$16 sps:$4 sm:$0xff]   ;;  %3938 = vmatpush1.bf16.msra.mxu1 %v8512_v54 }
 0x3bf   : > { %3939 = vmatprep.subr.bf16.mxu1 %v8513_v9  ;;  %v8551_v54 = vld [vmem:[#allocation8 + $0x26c] ss:$16 sps:$4 sm:$0xff]   ;;  %v8549_v9 = vld [vmem:[#allocation8 + $0x268] ss:$16 sps:$4 sm:$0xff]  }
 0x3c1   : > { %3883 = vmatpush1.bf16.msra.mxu0 %v8477_v10  ;;  %v8515_v10 = vld [vmem:[#allocation8 + $0xe8] ss:$16 sps:$4 sm:$0xff]  }
 0x3c2   : > { %7761 = vmatprep.subr.bf16.mxu0 %v10329_v20  ;;  %3940 = vmatpush1.bf16.msra.mxu1 %v8515_v10  ;;  %v8554_v10 = vld [vmem:[#allocation8 + $0x28c] ss:$16 sps:$4 sm:$0xff]  }
 0x3c4   : > { %3885 = vmatmul.mubr.bf16.vlgmr.msra.gmra.mrb[0].mxu0 %v10302_v37 }
 0x3c5   : > { %3894 = vmatprep.mubr.bf16.mxu0 %v10305_v39 }
 0x3ca   : > { %7762 = vmatpush3.bf16.xpose.msra.mxu0 %v10329_v20 }
 0x3cb   : > { %7763 = vmatprep.subr.bf16.mxu0 %v10331_v21 }
 0x3cc   : > { %3895 = vmatmul.mubr.bf16.gmra.mrb[4].mxu0 %v10310_v0 }
 0x3cd   : > { %3904 = vmatprep.mubr.bf16.mxu0 %v10313_v24 }
 0x3d2   : > { %7764 = vmatpush3.bf16.xpose.msra.mxu0 %v10331_v21 }
 0x3d3   : > { %7765 = vmatprep.subr.bf16.mxu0 %v10336_v8 }
 0x3d4   : > { %3905 = vmatmul.mubr.bf16.gmra.mrb[8].mxu0 %v10318_v43 }
 0x3d5   : > { %3914 = vmatprep.mubr.bf16.mxu0 %v10321_v14 }
 0x3da   : > { %7766 = vmatpush3.bf16.xpose.msra.mxu0 %v10336_v8 }
 0x3db   : > { %7767 = vmatprep.subr.bf16.mxu0 %v10340_v18 }
 0x3dc   : > { %3915 = vmatmul.mubr.bf16.gmra.mrb[12].mxu0 %v10326_v7 }
 0x3e2   : > { %7768 = vmatpush3.bf16.xpose.msra.mxu0 %v10340_v18 }
 0x3e3   : > { %7769 = vmatprep.subr.bf16.mxu0 %v10344_v38 }
 0x3ea   : > { %7770 = vmatpush3.bf16.xpose.msra.mxu0 %v10344_v38 }
 0x3eb   : > { %7771 = vmatprep.subr.bf16.mxu0 %v10348_v26 }
 0x3f2   : > { %7772 = vmatpush3.bf16.xpose.msra.mxu0 %v10348_v26 }
 0x3f3   : > { %7773 = vmatprep.subr.bf16.mxu0 %v10353_v27 }
 0x3fa   : > { %7774 = vmatpush3.bf16.xpose.msra.mxu0 %v10353_v27 }
 0x3fb   : > { %7775 = vmatprep.subr.bf16.mxu0 %v10366_v15 }
 0x402   : > { %7776 = vmatpush3.bf16.xpose.msra.mxu0 %v10366_v15 }
 0x497   : > { %v10357_v28 = vpop.f32.mrb[0].mxu0 }
 0x498   : > { %4153 = vrot.lane.b32.xlu1 %v10357_v28, %s9269_s18  ;;  %v10361_v17 = vpop.f32.mrb[1].mxu0  ;;  %v4105_v49 = vsub.f32 0.0, %v10357_v28 }
 0x499   : > { %v10364_v55 = vpop.f32.mrb[2].mxu0  ;;  %v4428_v30 = vsub.f32 0.0, %v10361_v17 }
 0x49a   : > { %4121 = vrot.lane.b32.xlu0 %v4105_v49, %s9269_s18  ;;  %v10369_v58 = vpop.f32.mrb[3].mxu0  ;;  %v4106_v35 = vsub.f32 0.0, %v10364_v55  ;;  %v8516_v49 = vld [vmem:[#allocation8 + $0x10c] ss:$16 sps:$4 sm:$0xff]  }
 0x49b   : > { %3941 = vmatprep.subr.bf16.mxu1 %v8516_v49  ;;  %v8557_v49 = vld [vmem:[#allocation8 + $0x2ac] ss:$16 sps:$4 sm:$0xff]  }
 0x49c   : > { %4155 = vrot.lane.b32.xlu1 %v10364_v55, %s9269_s18 }
 0x49e   : > { %4123 = vrot.lane.b32.xlu0 %v4106_v35, %s9269_s18  ;;  %v8518_v35 = vld [vmem:[#allocation8 + $0x108] ss:$16 sps:$4 sm:$0xff]  }
 0x49f   : > { %v10377_v63 = vpop.f32.mrb[4].mxu0  ;;  %3942 = vmatpush1.bf16.msra.mxu1 %v8518_v35 }
 0x4a0   : > { %v4107_v60 = vsub.f32 0.0, %v10377_v63  ;;  %v10380_v5 = vpop.f32.mrb[5].mxu0 }
 0x4a1   : > { %v10382_v45 = vpop.f32.mrb[6].mxu0 }
 0x4a2   : > { %v4108_v36 = vsub.f32 0.0, %v10382_v45  ;;  %4125 = vrot.lane.b32.xlu0 %v4107_v60, %s9269_s18  ;;  %v10386_v51 = vpop.f32.mrb[7].mxu0  ;;  %v8519_v60 = vld [vmem:[#allocation8 + $0x12c] ss:$16 sps:$4 sm:$0xff]  }
 0x4a3   : > { %3943 = vmatprep.subr.bf16.mxu1 %v8519_v60 }
 0x4a4   : > { %4127 = vrot.lane.b32.xlu1 %v4108_v36, %s9269_s18  ;;  %v8521_v36 = vld [vmem:[#allocation8 + $0x128] ss:$16 sps:$4 sm:$0xff]  }
 0x4a5   : > { %3944 = vmatpush1.bf16.msra.mxu1 %v8521_v36 }
 0x4a6   : > { %4157 = vrot.lane.b32.xlu0 %v10377_v63, %s9269_s18 }
 0x4a7   : > { %v10391_v16 = vpop.f32.mrb[8].mxu0 }
 0x4a8   : > { %4159 = vrot.lane.b32.xlu1 %v10382_v45, %s9269_s18  ;;  %v10395_v23 = vpop.f32.mrb[9].mxu0  ;;  %v4109_v1 = vsub.f32 0.0, %v10391_v16 }
 0x4a9   : > { %v10397_v47 = vpop.f32.mrb[10].mxu0 }
 0x4aa   : > { %4161 = vrot.lane.b32.xlu0 %v10391_v16, %s9269_s18  ;;  %v10401_v31 = vpop.f32.mrb[11].mxu0  ;;  %v4110_v42 = vsub.f32 0.0, %v10397_v47 }
 0x4ac   : > { %4163 = vrot.lane.b32.xlu1 %v10397_v47, %s9269_s18 }
 0x4ae   : > { %4129 = vrot.lane.b32.xlu0 %v4109_v1, %s9269_s18  ;;  %v8522_v1 = vld [vmem:[#allocation8 + $0x14c] ss:$16 sps:$4 sm:$0xff]  }
 0x4af   : > { %v10408_v29 = vpop.f32.mrb[12].mxu0  ;;  %3945 = vmatprep.subr.bf16.mxu1 %v8522_v1  ;;  %v8563_v1 = vld [vmem:[#allocation8 + $0x2ec] ss:$16 sps:$4 sm:$0xff]  }
 0x4b0   : > { %v4111_v57 = vsub.f32 0.0, %v10408_v29  ;;  %4131 = vrot.lane.b32.xlu1 %v4110_v42, %s9269_s18  ;;  %v10412_v22 = vpop.f32.mrb[13].mxu0  ;;  %v8524_v42 = vld [vmem:[#allocation8 + $0x148] ss:$16 sps:$4 sm:$0xff]  }
 0x4b1   : > { %v10414_v41 = vpop.f32.mrb[14].mxu0  ;;  %3946 = vmatpush1.bf16.msra.mxu1 %v8524_v42  ;;  %v10449_v42 = vld [vmem:[%s10443_s16 + $0x8] sm:$0xff] }
 0x4b2   : > { %v4112_v33 = vsub.f32 0.0, %v10414_v41  ;;  %4133 = vrot.lane.b32.xlu0 %v4111_v57, %s9269_s18  ;;  %v10418_v32 = vpop.f32.mrb[15].mxu0  ;;  %v8525_v57 = vld [vmem:[#allocation8 + $0x16c] ss:$16 sps:$4 sm:$0xff]  }
 0x4b3   : > { %3947 = vmatprep.subr.bf16.mxu1 %v8525_v57  ;;  %v10452_v57 = vld [vmem:[%s10436_s30 + $0x8] sm:$0xff] }
 0x4b4   : > { %4135 = vrot.lane.b32.xlu1 %v4112_v33, %s9269_s18  ;;  %v8527_v33 = vld [vmem:[#allocation8 + $0x168] ss:$16 sps:$4 sm:$0xff]  }
 0x4b5   : > { %3948 = vmatpush1.bf16.msra.mxu1 %v8527_v33 }
 0x4b6   : > { %4165 = vrot.lane.b32.xlu0 %v10408_v29, %s9269_s18  ;;  %3949 = vmatprep.subr.bf16.mxu1 %v8528_v53 }
 0x4b8   : > { %4167 = vrot.lane.b32.xlu1 %v10414_v41, %s9269_s18 }
 0x4b9   : > { %3950 = vmatpush1.bf16.msra.mxu1 %v8530_v34 }
 0x4ba   : > { %3951 = vmatprep.subr.bf16.mxu1 %v8531_v61 }
 0x4bc   : > { %4444 = vrot.lane.b32.xlu1 %v4428_v30, %s9269_s18  ;;  %v8534_v30 = vld [vmem:[#allocation8 + $0x1cc] ss:$16 sps:$4 sm:$0xff]  }
 0x4bd   : > { %3952 = vmatpush1.bf16.msra.mxu1 %v8533_v48  ;;  %v8561_v48 = vld [vmem:[#allocation8 + $0x2e8] ss:$16 sps:$4 sm:$0xff]  }
 0x4be   : > { %3953 = vmatprep.subr.bf16.mxu1 %v8534_v30 }
 0x4c0   : > { %4476 = vrot.lane.b32.xlu1 %v10361_v17, %s9269_s18 }
 0x4c1   : > { %3954 = vmatpush1.bf16.msra.mxu1 %v8536_v50  ;;  %v4187_v50 = vmul.f32 %v10449_v42, %v10364_v55 }
 0x4c2   : > { %3955 = vmatprep.subr.bf16.mxu1 %v8537_v25 }
 0x4c5   : > { %3956 = vmatpush1.bf16.msra.mxu1 %v8539_v40  ;;  %v8566_v40 = vld [vmem:[#allocation8 + $0x30c] ss:$16 sps:$4 sm:$0xff]  }
 0x4c6   : > { %3998 = vmatprep.subr.bf16.mxu1 %v8542_v3 }
 0x4c8   : > { %3958 = vmatmul.mubr.bf16.vlgmr.msra.gmra.mrb[0].mxu1 %v10270_v52  ;;  %v8552_v52 = vld [vmem:[#allocation8 + $0x288] ss:$16 sps:$4 sm:$0xff]  }
 0x4c9   : > { %3999 = vmatpush1.bf16.msra.mxu1 %v8540_v13  ;;  %3967 = vmatprep.mubr.bf16.mxu1 %v10273_v19  ;;  %v8555_v19 = vld [vmem:[#allocation8 + $0x2a8] ss:$16 sps:$4 sm:$0xff]  }
 0x4ca   : > { %4000 = vmatprep.subr.bf16.mxu1 %v8545_v11  ;;  %v8564_v11 = vld [vmem:[#allocation8 + $0x308] ss:$16 sps:$4 sm:$0xff]  }
 0x4cd   : > { %4001 = vmatpush1.bf16.msra.mxu1 %v8543_v4 }
 0x4ce   : > { %4002 = vmatprep.subr.bf16.mxu1 %v8548_v62  ;;  %v8569_v62 = vld [vmem:[#allocation8 + $0x32c] ss:$16 sps:$4 sm:$0xff]  }
 0x4d0   : > { %3968 = vmatmul.mubr.bf16.gmra.mrb[4].mxu1 %v10278_v6  ;;  %v8560_v6 = vld [vmem:[#allocation8 + $0x2cc] ss:$16 sps:$4 sm:$0xff]  }
 0x4d1   : > { %4003 = vmatpush1.bf16.msra.mxu1 %v8546_v59  ;;  %3977 = vmatprep.mubr.bf16.mxu1 %v10281_v12  ;;  %v10439_v12 = vld [vmem:[%s10436_s30] sm:$0xff]  ;;  %v10464_v59 = vld [vmem:[%s10436_s30 + $0x10] sm:$0xff] }
 0x4d2   : > { %4004 = vmatprep.subr.bf16.mxu1 %v8551_v54  ;;  %v10470_v54 = vld [vmem:[%s10443_s16 + $0x18] sm:$0xff] }
 0x4d5   : > { %4005 = vmatpush1.bf16.msra.mxu1 %v8549_v9 }
 0x4d6   : > { %4006 = vmatprep.subr.bf16.mxu1 %v8554_v10  ;;  %v10474_v10 = vld [vmem:[%s10436_s30 + $0x18] sm:$0xff] }
 0x4d8   : > { %3978 = vmatmul.mubr.bf16.gmra.mrb[8].mxu1 %v10286_v2  ;;  %v8558_v2 = vld [vmem:[#allocation8 + $0x2c8] ss:$16 sps:$4 sm:$0xff]  }
 0x4d9   : > { %4007 = vmatpush1.bf16.msra.mxu1 %v8552_v52  ;;  %3987 = vmatprep.mubr.bf16.mxu1 %v10289_v46  ;;  %v10446_v46 = vld [vmem:[%s10443_s16] sm:$0xff]  ;;  %v8567_v52 = vld [vmem:[#allocation8 + $0x328] ss:$16 sps:$4 sm:$0xff]  }
 0x4da   : > { %4008 = vmatprep.subr.bf16.mxu1 %v8557_v49  ;;  %v4186_v30 = vmul.f32 %v10446_v46, %v10357_v28  ;;  %v10467_v28 = vld [vmem:[%s10443_s16 + $0x10] sm:$0xff] }
 0x4dd   : > { %4009 = vmatpush1.bf16.msra.mxu1 %v8555_v19 }
 0x4de   : > { %4010 = vmatprep.subr.bf16.mxu1 %v8560_v6 }
 0x4e0   : > { %3988 = vmatmul.mubr.bf16.gmra.mrb[12].mxu1 %v10294_v44 }
 0x4e1   : > { %4011 = vmatpush1.bf16.msra.mxu1 %v8558_v2  ;;  %4030 = vmatprep.mubr.bf16.mxu1 %v10297_v56 }
 0x4e2   : > { %4012 = vmatprep.subr.bf16.mxu1 %v8563_v1 }
 0x4e5   : > { %4013 = vmatpush1.bf16.msra.mxu1 %v8561_v48  ;;  %v8575_v48 = vld [vmem:[#allocation8 + $0x36c] ss:$16 sps:$4 sm:$0xff]  }
 0x4e6   : > { %4014 = vmatprep.subr.bf16.mxu1 %v8566_v40  ;;  %v10490_v40 = vld [vmem:[%s10443_s16 + $0x28] sm:$0xff] }
 0x4e9   : > { %4015 = vmatpush1.bf16.msra.mxu1 %v8564_v11 }
 0x4ea   : > { %4016 = vmatprep.subr.bf16.mxu1 %v8569_v62 }
 0x4ed   : > { %4017 = vmatpush1.bf16.msra.mxu1 %v8567_v52 }
 0x50a   : > { %v4154_v35 = vpop.permute.xlu1 %4153 }
 0x50c   : > { %v4122_v60 = vpop.permute.xlu0 %4121 }
 0x50d   : > { %v4178_v36 = vsel %vm4177_vm1, %v4122_v60, %v4154_v35  ;;  %v8572_v35 = vld [vmem:[#allocation8 + $0x34c] ss:$16 sps:$4 sm:$0xff]   ;;  %v4188_v60 = vmul.f32 %v10467_v28, %v10377_v63 }
 0x50e   : > { %v4194_v33 = vmul.f32 %v4178_v36, %v10439_v12  ;;  %v4156_v53 = vpop.permute.xlu1 %4155  ;;  %v4189_v36 = vmul.f32 %v10470_v54, %v10382_v45  ;;  %4018 = vmatprep.subr.bf16.mxu1 %v8572_v35 }
 0x510   : > { %v4124_v34 = vpop.permute.xlu0 %4123  ;;  %v4202_v44 = vadd.f32 %v4194_v33, %v4186_v30  ;;  %v8570_v33 = vld [vmem:[#allocation8 + $0x348] ss:$16 sps:$4 sm:$0xff]   ;;  %v10484_v30 = vld [vmem:[%s10436_s30 + $0x20] sm:$0xff] }
 0x511   : > { %v4179_v61 = vsel %vm4177_vm1, %v4124_v34, %v4156_v53  ;;  %4019 = vmatpush1.bf16.msra.mxu1 %v8570_v33  ;;  %v10510_v33 = vld [vmem:[%s10443_s16 + $0x38] sm:$0xff] }
 0x512   : > { %v4195_v25 = vmul.f32 %v4179_v61, %v10452_v57  ;;  %4020 = vmatprep.subr.bf16.mxu1 %v8575_v48 }
 0x514   : > { %v4203_v3 = vadd.f32 %v4195_v25, %v4187_v50  ;;  %v4126_v13 = vpop.permute.xlu0 %4125  ;;  %v10487_v50 = vld [vmem:[%s10443_s16 + $0x20] sm:$0xff] }
 0x515   : > { %v4190_v62 = vmul.f32 %v10487_v50, %v10391_v16 }
 0x516   : > { %v4128_v4 = vpop.permute.xlu1 %4127  ;;  %v4210_v56 = vpack.c.bf16 %v4203_v3, %v4202_v44  ;;  %v10494_v44 = vld [vmem:[%s10436_s30 + $0x28] sm:$0xff] }
 0x517   : > { %v8573_v3 = vld [vmem:[#allocation8 + $0x368] ss:$16 sps:$4 sm:$0xff]  }
 0x518   : > { %7777 = vmatprep.mubr.bf16.mxu0 %v4210_v56  ;;  %v4158_v55 = vpop.permute.xlu0 %4157  ;;  %4021 = vmatpush1.bf16.msra.mxu1 %v8573_v3  ;;  %v4193_v3 = vmul.f32 %v10510_v33, %v10414_v41  ;;  %v4098_v41 = vld [vmem:[#allocation3 + $0x10] sm:$0xff] }
 0x519   : > { %v4180_v9 = vsel %vm4177_vm1, %v4126_v13, %v4158_v55  ;;  %v4191_v55 = vmul.f32 %v10490_v40, %v10397_v47 }
 0x51a   : > { %v4196_v49 = vmul.f32 %v4180_v9, %v10464_v59  ;;  %v4160_v19 = vpop.permute.xlu1 %4159 }
 0x51b   : > { %v4181_v6 = vsel %vm4177_vm1, %v4128_v4, %v4160_v19  ;;  %v8578_v4 = vld [vmem:[#allocation8 + $0x38c] ss:$16 sps:$4 sm:$0xff]  }
 0x51c   : > { %v4197_v2 = vmul.f32 %v4181_v6, %v10474_v10  ;;  %v4162_v1 = vpop.permute.xlu0 %4161  ;;  %v4204_v53 = vadd.f32 %v4196_v49, %v4188_v60  ;;  %v8576_v49 = vld [vmem:[#allocation8 + $0x388] ss:$16 sps:$4 sm:$0xff]   ;;  %4022 = vmatprep.subr.bf16.mxu1 %v8578_v4  ;;  %v8581_v60 = vld [vmem:[#allocation8 + $0x3ac] ss:$16 sps:$4 sm:$0xff]  }
 0x51d   : > { %4023 = vmatpush1.bf16.msra.mxu1 %v8576_v49 }
 0x51e   : > { %v4205_v34 = vadd.f32 %v4197_v2, %v4189_v36  ;;  %v4164_v61 = vpop.permute.xlu1 %4163  ;;  %v10504_v36 = vld [vmem:[%s10436_s30 + $0x30] sm:$0xff]  ;;  %4024 = vmatprep.subr.bf16.mxu1 %v8581_v60  ;;  %v4103_v60 = vld [vmem:[#allocation3 + $0x60] sm:$0xff] }
 0x51f   : > { %v10507_v2 = vld [vmem:[%s10443_s16 + $0x30] sm:$0xff] }
 0x520   : > { %v4211_v25 = vpack.c.bf16 %v4205_v34, %v4204_v53  ;;  %v4130_v63 = vpop.permute.xlu0 %4129  ;;  %v10514_v53 = vld [vmem:[%s10436_s30 + $0x38] sm:$0xff] }
 0x521   : > { %v4182_v45 = vsel %vm4177_vm1, %v4130_v63, %v4162_v1  ;;  %v8579_v34 = vld [vmem:[#allocation8 + $0x3a8] ss:$16 sps:$4 sm:$0xff]  }
 0x522   : > { %v4198_v13 = vmul.f32 %v4182_v45, %v10484_v30  ;;  %7778 = vmatmul.mubr.bf16.vlgmr.msra.gmra.mrb[16].mxu0 %v4211_v25  ;;  %v4132_v11 = vpop.permute.xlu1 %4131  ;;  %v8584_v25 = vld [vmem:[#allocation8 + $0x3cc] ss:$16 sps:$4 sm:$0xff]   ;;  %v4192_v45 = vmul.f32 %v10507_v2, %v10408_v29  ;;  %4025 = vmatpush1.bf16.msra.mxu1 %v8579_v34  ;;  %v4097_v29 = vld [vmem:[#allocation3] sm:$0xff]  ;;  %v4431_v34 = vsub.f32 0.0, %v10386_v51 }
 0x523   : > { %v4183_v56 = vsel %vm4177_vm1, %v4132_v11, %v4164_v61  ;;  %v8582_v11 = vld [vmem:[#allocation8 + $0x3c8] ss:$16 sps:$4 sm:$0xff]   ;;  %4026 = vmatprep.subr.bf16.mxu1 %v8584_v25  ;;  %7833 = vmatprep.subr.bf16.mxu0 %v4097_v29  ;;  %v4435_v25 = vsub.f32 0.0, %v10418_v32 }
 0x524   : > { %v4199_v9 = vmul.f32 %v4183_v56, %v10494_v44  ;;  %v4134_v52 = vpop.permute.xlu0 %4133  ;;  %v4206_v19 = vadd.f32 %v4198_v13, %v4190_v62  ;;  %v8587_v62 = vld [vmem:[#allocation8 + $0x3ec] ss:$16 sps:$4 sm:$0xff]   ;;  %7834 = vmatpush3.bf16.msra.mxu0 %v4097_v29 }
 0x525   : > { %7835 = vmatprep.subr.bf16.mxu0 %v4098_v41 }
 0x526   : > { %v4207_v35 = vadd.f32 %v4199_v9, %v4191_v55  ;;  %v4136_v6 = vpop.permute.xlu1 %4135  ;;  %4027 = vmatpush1.bf16.msra.mxu1 %v8582_v11  ;;  %v8585_v9 = vld [vmem:[#allocation8 + $0x3e8] ss:$16 sps:$4 sm:$0xff]  }
 0x527   : > { %4028 = vmatprep.subr.bf16.mxu1 %v8587_v62 }
 0x528   : > { %v4166_v1 = vpop.permute.xlu0 %4165  ;;  %v4212_v16 = vpack.c.bf16 %v4207_v35, %v4206_v19  ;;  %7836 = vmatpush3.bf16.msra.mxu0 %v4098_v41  ;;  %v4101_v35 = vld [vmem:[#allocation3 + $0x40] sm:$0xff] }
 0x529   : > { %v4184_v47 = vsel %vm4177_vm1, %v4134_v52, %v4166_v1  ;;  %v4429_v1 = vsub.f32 0.0, %v10369_v58 }
 0x52a   : > { %v4200_v61 = vmul.f32 %v4184_v47, %v10504_v36  ;;  %7781 = vmatprep.mubr.bf16.mxu0 %v4212_v16  ;;  %v4168_v48 = vpop.permute.xlu1 %4167  ;;  %4029 = vmatpush1.bf16.msra.mxu1 %v8585_v9  ;;  %v4104_v47 = vld [vmem:[#allocation3 + $0x70] sm:$0xff] }
 0x52b   : > { %v4185_v63 = vsel %vm4177_vm1, %v4136_v6, %v4168_v48  ;;  %7785 = vmatprep.subr.bf16.mxu1 %v4097_v29  ;;  %v4102_v6 = vld [vmem:[#allocation3 + $0x50] sm:$0xff]  ;;  %v4430_v48 = vsub.f32 0.0, %v10380_v5 }
 0x52c   : > { %v4201_v13 = vmul.f32 %v4185_v63, %v10514_v53  ;;  %v4208_v4 = vadd.f32 %v4200_v61, %v4192_v45  ;;  %v4433_v61 = vsub.f32 0.0, %v10401_v31  ;;  %v4432_v63 = vsub.f32 0.0, %v10395_v23 }
 0x52d   : > { %4031 = vmatmul.mubr.bf16.vlgmr.msra.gmra.mrb[0].mxu1 %v10302_v37  ;;  %v4099_v37 = vld [vmem:[#allocation3 + $0x20] sm:$0xff] }
 0x52e   : > { %v4209_v56 = vadd.f32 %v4201_v13, %v4193_v3  ;;  %4040 = vmatprep.mubr.bf16.mxu1 %v10305_v39  ;;  %7786 = vmatpush3.bf16.msra.mxu1 %v4097_v29  ;;  %v4434_v3 = vsub.f32 0.0, %v10412_v22 }
 0x52f   : > { %7787 = vmatprep.subr.bf16.mxu1 %v4098_v41  ;;  %7837 = vmatprep.subr.bf16.mxu0 %v4099_v37 }
 0x530   : > { %v4213_v55 = vpack.c.bf16 %v4209_v56, %v4208_v4  ;;  %7838 = vmatpush3.bf16.msra.mxu0 %v4099_v37 }
 0x532   : > { %7782 = vmatmul.mubr.bf16.gmra.mrb[20].mxu0 %v4213_v55  ;;  %7788 = vmatpush3.bf16.msra.mxu1 %v4098_v41 }
 0x533   : > { %7789 = vmatprep.subr.bf16.mxu1 %v4099_v37 }
 0x535   : > { %4041 = vmatmul.mubr.bf16.gmra.mrb[4].mxu1 %v10310_v0 }
 0x536   : > { %4050 = vmatprep.mubr.bf16.mxu1 %v10313_v24  ;;  %7790 = vmatpush3.bf16.msra.mxu1 %v4099_v37 }
 0x53d   : > { %4051 = vmatmul.mubr.bf16.gmra.mrb[8].mxu1 %v10318_v43 }
 0x53e   : > { %4060 = vmatprep.mubr.bf16.mxu1 %v10321_v14 }
 0x545   : > { %4061 = vmatmul.mubr.bf16.gmra.mrb[12].mxu1 %v10326_v7  ;;  %v4100_v7 = vld [vmem:[#allocation3 + $0x30] sm:$0xff] }
 0x546   : > { %7791 = vmatprep.subr.bf16.mxu1 %v4100_v7  ;;  %7839 = vmatprep.subr.bf16.mxu0 %v4100_v7 }
 0x547   : > { %7792 = vmatpush3.bf16.msra.mxu1 %v4100_v7  ;;  %7840 = vmatpush3.bf16.msra.mxu0 %v4100_v7 }
 0x548   : > { %7793 = vmatprep.subr.bf16.mxu1 %v4101_v35  ;;  %7841 = vmatprep.subr.bf16.mxu0 %v4101_v35 }
 0x54b   : > { %7794 = vmatpush3.bf16.msra.mxu1 %v4101_v35  ;;  %7842 = vmatpush3.bf16.msra.mxu0 %v4101_v35 }
 0x54c   : > { %7795 = vmatprep.subr.bf16.mxu1 %v4102_v6  ;;  %7843 = vmatprep.subr.bf16.mxu0 %v4102_v6 }
 0x54f   : > { %7796 = vmatpush3.bf16.msra.mxu1 %v4102_v6  ;;  %7844 = vmatpush3.bf16.msra.mxu0 %v4102_v6 }
 0x550   : > { %7797 = vmatprep.subr.bf16.mxu1 %v4103_v60  ;;  %7845 = vmatprep.subr.bf16.mxu0 %v4103_v60 }
 0x553   : > { %7798 = vmatpush3.bf16.msra.mxu1 %v4103_v60  ;;  %7846 = vmatpush3.bf16.msra.mxu0 %v4103_v60 }
 0x554   : > { %7799 = vmatprep.subr.bf16.mxu1 %v4104_v47  ;;  %7847 = vmatprep.subr.bf16.mxu0 %v4104_v47 }
 0x557   : > { %7800 = vmatpush3.bf16.msra.mxu1 %v4104_v47  ;;  %7848 = vmatpush3.bf16.msra.mxu0 %v4104_v47  ;;  %v4445_v47 = vpop.permute.xlu1 %4444 }
 0x558   : > { %7809 = vmatprep.subr.bf16.mxu1 %v10329_v20 }
 0x5f5   : > { %v10530_v39 = vpop.f32.mrb[16].mxu0 }
 0x5f6   : > { %4283 = vmax.xlane.f32.xlu0 %v10530_v39  ;;  %v10533_v0 = vpop.f32.mrb[17].mxu0 }
 0x5f7   : > { %v10535_v24 = vpop.f32.mrb[18].mxu0 }
 0x5f8   : > { %v10537_v43 = vpop.f32.mrb[19].mxu0 }
 0x5f9   : > { %4281 = vmax.xlane.f32.xlu1 %v10537_v43 }
 0x5fa   : > { %4279 = vmax.xlane.f32.xlu0 %v10533_v0 }
 0x5fe   : > { %4285 = vmax.xlane.f32.xlu0 %v10535_v24 }
 0x600   : > { %v10553_v16 = vpop.f32.mrb[0].mxu1 }
 0x601   : > { %v4766_v45 = vsub.f32 0.0, %v10553_v16  ;;  %v10589_v13 = vpop.f32.mrb[1].mxu1 }
 0x602   : > { %v10591_v11 = vpop.f32.mrb[2].mxu1 }
 0x603   : > { %v10593_v4 = vpop.f32.mrb[3].mxu1 }
 0x604   : > { %11350 = vst [vmem:[#allocation38_spill] sm:$0xff] %v10593_v4 }
 0x605   : > { %v10542_v14 = vpop.f32.mrb[20].mxu0 }
 0x606   : > { %v10544_v52 = vpop.f32.mrb[21].mxu0 }
 0x607   : > { %v10546_v49 = vpop.f32.mrb[22].mxu0 }
 0x608   : > { %v10548_v19 = vpop.f32.mrb[23].mxu0  ;;  %v10595_v56 = vpop.f32.mrb[4].mxu1 }
 0x609   : > { %v10597_v62 = vpop.f32.mrb[5].mxu1 }
 0x60a   : > { %4478 = vrot.lane.b32.xlu1 %v10369_v58, %s9269_s18  ;;  %11351 = vst [vmem:[#allocation39_spill] sm:$0xff] %v10597_v62  ;;  %v10599_v55 = vpop.f32.mrb[6].mxu1 }
 0x60b   : > { %v10601_v9 = vpop.f32.mrb[7].mxu1 }
 0x60c   : > { %11352 = vst [vmem:[#allocation40_spill] sm:$0xff] %v10601_v9 }
 0x610   : > { %v10603_v29 = vpop.f32.mrb[8].mxu1 }
 0x611   : > { %v10605_v41 = vpop.f32.mrb[9].mxu1 }
 0x612   : > { %11353 = vst [vmem:[#allocation41_spill] sm:$0xff] %v10605_v41  ;;  %v10607_v37 = vpop.f32.mrb[10].mxu1 }
 0x613   : > { %v10609_v7 = vpop.f32.mrb[11].mxu1 }
 0x614   : > { %4446 = vrot.lane.b32.xlu0 %v4429_v1, %s9269_s18  ;;  %11354 = vst [vmem:[#allocation42_spill] sm:$0xff] %v10609_v7 }
 0x618   : > { %v10611_v35 = vpop.f32.mrb[12].mxu1 }
 0x619   : > { %11355 = vst [vmem:[#allocation43_spill] sm:$0xff] %v10611_v35  ;;  %v10613_v6 = vpop.f32.mrb[13].mxu1 }
 0x61a   : > { %11356 = vst [vmem:[#allocation44_spill] sm:$0xff] %v10613_v6  ;;  %v10615_v60 = vpop.f32.mrb[14].mxu1 }
 0x61b   : > { %v10617_v1 = vpop.f32.mrb[15].mxu1 }
 0x61c   : > { %11357 = vst [vmem:[#allocation45_spill] sm:$0xff] %v10617_v1 }
 0x62e   : > { %4291 = vmax.xlane.f32.xlu1 %v10542_v14 }
 0x632   : > { %4287 = vmax.xlane.f32.xlu1 %v10544_v52 }
 0x633   : > { %4293 = vmax.xlane.f32.xlu0 %v10546_v49 }
 0x637   : > { %4289 = vmax.xlane.f32.xlu0 %v10548_v19 }
 0x643   : > { %4450 = vrot.lane.b32.xlu1 %v4431_v34, %s9269_s18  ;;  %v4477_v34 = vpop.permute.xlu1 %4476 }
 0x644   : > { %v4500_v9 = vsel %vm4177_vm1, %v4445_v47, %v4477_v34 }
 0x645   : > { %v4516_v35 = vmul.f32 %v4500_v9, %v10439_v12 }
 0x647   : > { %4482 = vrot.lane.b32.xlu1 %v10386_v51, %s9269_s18 }
 0x64b   : > { %4454 = vrot.lane.b32.xlu1 %v4433_v61, %s9269_s18 }
 0x64d   : > { %4448 = vrot.lane.b32.xlu0 %v4430_v48, %s9269_s18 }
 0x64f   : > { %4486 = vrot.lane.b32.xlu1 %v10401_v31, %s9269_s18 }
 0x651   : > { %4480 = vrot.lane.b32.xlu0 %v10380_v5, %s9269_s18 }
 0x653   : > { %4458 = vrot.lane.b32.xlu1 %v4435_v25, %s9269_s18 }
 0x655   : > { %4452 = vrot.lane.b32.xlu0 %v4432_v63, %s9269_s18 }
 0x657   : > { %4490 = vrot.lane.b32.xlu1 %v10418_v32, %s9269_s18 }
 0x659   : > { %4484 = vrot.lane.b32.xlu0 %v10395_v23, %s9269_s18 }
 0x65b   : > { %4782 = vrot.lane.b32.xlu1 %v4766_v45, %s9269_s18 }
 0x65d   : > { %4456 = vrot.lane.b32.xlu0 %v4434_v3, %s9269_s18 }
 0x65f   : > { %4814 = vrot.lane.b32.xlu1 %v10553_v16, %s9269_s18 }
 0x661   : > { %4488 = vrot.lane.b32.xlu0 %v10412_v22, %s9269_s18 }
 0x683   : > { %v4284_v61 = vpop.xlane.xlu0 %4283 }
 0x684   : > { %v4297_v25 = vsub.f32 %v10530_v39, %v4284_v61 }
 0x686   : > { %v4282_v48 = vpop.xlane.xlu1 %4281  ;;  %v4307_v7 = vmul.f32 1.442695, %v4297_v25 }
 0x687   : > { %v4296_v63 = vsub.f32 %v10537_v43, %v4282_v48  ;;  %v4280_v45 = vpop.xlane.xlu0 %4279 }
 0x688   : > { %v4295_v3 = vsub.f32 %v10533_v0, %v4280_v45  ;;  %v4508_v0 = vmul.f32 %v10446_v46, %v10361_v17 }
 0x689   : > { %v4305_v41 = vmul.f32 1.442695, %v4296_v63 }
 0x68a   : > { %v4303_v62 = vmul.f32 1.442695, %v4295_v3  ;;  %v4479_v39 = vpop.permute.xlu1 %4478 }
 0x68b   : > { %8780 = vpow2.f32 %v4305_v41  ;;  %v4286_v6 = vpop.xlane.xlu0 %4285  ;;  %v4509_v41 = vmul.f32 %v10449_v42, %v10369_v58 }
 0x68c   : > { %8782 = vpow2.f32 %v4303_v62  ;;  %v4298_v1 = vsub.f32 %v10535_v24, %v4286_v6  ;;  %v10631_v62 = vadd.f32 %v4516_v35, %v4508_v0 }
 0x68d   : > { %8784 = vpow2.f32 %v4307_v7 }
 0x68e   : > { %v4309_v4 = vmul.f32 1.442695, %v4298_v1 }
 0x68f   : > { %v4447_v61 = vpop.permute.xlu0 %4446 }
 0x690   : > { %8786 = vpow2.f32 %v4309_v4  ;;  %v4501_v43 = vsel %vm4177_vm1, %v4447_v61, %v4479_v39 }
 0x691   : > { %v4517_v47 = vmul.f32 %v4501_v43, %v10452_v57 }
 0x693   : > { %v10633_v24 = vadd.f32 %v4517_v47, %v4509_v41  ;;  %v4511_v41 = vmul.f32 %v10470_v54, %v10386_v51 }
 0x695   : > { %v10635_v6 = vpop.eup %8780  ;;  %v4532_v9 = vpack.c.bf16 %v10633_v24, %v10631_v62  ;;  %v4846_v62 = vmul.f32 %v10446_v46, %v10553_v16 }
 0x696   : > { %v10639_v4 = vpop.eup %8782 }
 0x697   : > { %v4335_v7 = vpack.c.bf16 %v10635_v6, %v10639_v4  ;;  %v10643_v17 = vpop.eup %8784 }
 0x699   : > { %7801 = vmatprep.mubr.bf16.mxu1 %v4335_v7 }
 0x69a   : > { %v10645_v58 = vpop.eup %8786 }
 0x69b   : > { %v4336_v35 = vpack.c.bf16 %v10645_v58, %v10643_v17 }
 0x69d   : > { %7802 = vmatmul.mubr.bf16.vlgmr.msra.gmra.mrb[16].mxu1 %v4336_v35 }
 0x69e   : > { %7810 = vmatpush3.bf16.xpose.msra.mxu1 %v10329_v20 }
 0x69f   : > { %7811 = vmatprep.subr.bf16.mxu1 %v10331_v21 }
 0x6a6   : > { %7812 = vmatpush3.bf16.xpose.msra.mxu1 %v10331_v21 }
 0x6a7   : > { %7813 = vmatprep.subr.bf16.mxu1 %v10336_v8 }
 0x6ae   : > { %7814 = vmatpush3.bf16.xpose.msra.mxu1 %v10336_v8 }
 0x6af   : > { %7815 = vmatprep.subr.bf16.mxu1 %v10340_v18 }
 0x6b6   : > { %7816 = vmatpush3.bf16.xpose.msra.mxu1 %v10340_v18 }
 0x6b7   : > { %7817 = vmatprep.subr.bf16.mxu1 %v10344_v38 }
 0x6bb   : > { %v4292_v1 = vpop.xlane.xlu1 %4291 }
 0x6bc   : > { %v4301_v25 = vsub.f32 %v10542_v14, %v4292_v1 }
 0x6be   : > { %7818 = vmatpush3.bf16.xpose.msra.mxu1 %v10344_v38  ;;  %v4315_v39 = vmul.f32 1.442695, %v4301_v25 }
 0x6bf   : > { %v4288_v34 = vpop.xlane.xlu1 %4287  ;;  %7819 = vmatprep.subr.bf16.mxu1 %v10348_v26 }
 0x6c0   : > { %v4299_v20 = vsub.f32 %v10544_v52, %v4288_v34  ;;  %v4294_v48 = vpop.xlane.xlu0 %4293 }
 0x6c1   : > { %v4302_v21 = vsub.f32 %v10546_v49, %v4294_v48 }
 0x6c2   : > { %v4311_v8 = vmul.f32 1.442695, %v4299_v20 }
 0x6c3   : > { %v4451_v63 = vpop.permute.xlu1 %4450  ;;  %v4317_v45 = vmul.f32 1.442695, %v4302_v21 }
 0x6c4   : > { %v4290_v3 = vpop.xlane.xlu0 %4289  ;;  %8788 = vpow2.f32 %v4311_v8 }
 0x6c5   : > { %v4300_v18 = vsub.f32 %v10548_v19, %v4290_v3  ;;  %8790 = vpow2.f32 %v4317_v45 }
 0x6c6   : > { %7820 = vmatpush3.bf16.xpose.msra.mxu1 %v10348_v26  ;;  %v4510_v26 = vmul.f32 %v10467_v28, %v10380_v5 }
 0x6c7   : > { %v4313_v38 = vmul.f32 1.442695, %v4300_v18  ;;  %v4483_v61 = vpop.permute.xlu1 %4482  ;;  %7821 = vmatprep.subr.bf16.mxu1 %v10353_v27 }
 0x6c8   : > { %v4449_v52 = vpop.permute.xlu0 %4448  ;;  %v4503_v49 = vsel %vm4177_vm1, %v4451_v63, %v4483_v61 }
 0x6c9   : > { %8792 = vpow2.f32 %v4313_v38  ;;  %v4519_v43 = vmul.f32 %v4503_v49, %v10474_v10  ;;  %v4513_v38 = vmul.f32 %v10490_v40, %v10401_v31 }
 0x6ca   : > { %8794 = vpow2.f32 %v4315_v39  ;;  %v4512_v39 = vmul.f32 %v10487_v50, %v10395_v23 }
 0x6cb   : > { %v4455_v14 = vpop.permute.xlu1 %4454  ;;  %v4527_v35 = vadd.f32 %v4519_v43, %v4511_v41 }
 0x6cc   : > { %v4481_v0 = vpop.permute.xlu0 %4480 }
 0x6cd   : > { %v4502_v19 = vsel %vm4177_vm1, %v4449_v52, %v4481_v0 }
 0x6ce   : > { %v4518_v47 = vmul.f32 %v4502_v19, %v10464_v59  ;;  %7822 = vmatpush3.bf16.xpose.msra.mxu1 %v10353_v27  ;;  %v10675_v20 = vpop.eup %8788 }
 0x6cf   : > { %v4487_v7 = vpop.permute.xlu1 %4486  ;;  %7823 = vmatprep.subr.bf16.mxu1 %v10366_v15  ;;  %v10678_v21 = vpop.eup %8790 }
 0x6d0   : > { %v4526_v1 = vadd.f32 %v4518_v47, %v4510_v26  ;;  %v4453_v34 = vpop.permute.xlu0 %4452  ;;  %v4505_v48 = vsel %vm4177_vm1, %v4455_v14, %v4487_v7  ;;  %v4515_v47 = vmul.f32 %v10510_v33, %v10418_v32 }
 0x6d1   : > { %v4521_v27 = vmul.f32 %v4505_v48, %v10494_v44 }
 0x6d2   : > { %v4533_v5 = vpack.c.bf16 %v4527_v35, %v4526_v1 }
 0x6d3   : > { %v10680_v25 = vpop.eup %8792  ;;  %v4459_v51 = vpop.permute.xlu1 %4458  ;;  %v4529_v49 = vadd.f32 %v4521_v27, %v4513_v38 }
 0x6d4   : > { %v10682_v8 = vpop.eup %8794  ;;  %v4485_v63 = vpop.permute.xlu0 %4484  ;;  %v4337_v45 = vpack.c.bf16 %v10680_v25, %v10675_v20 }
 0x6d5   : > { %v4504_v3 = vsel %vm4177_vm1, %v4453_v34, %v4485_v63  ;;  %v4338_v18 = vpack.c.bf16 %v10678_v21, %v10682_v8 }
 0x6d6   : > { %v4520_v61 = vmul.f32 %v4504_v3, %v10484_v30  ;;  %7805 = vmatprep.mubr.bf16.mxu1 %v4337_v45  ;;  %7824 = vmatpush3.bf16.xpose.msra.mxu1 %v10366_v15  ;;  %v4514_v15 = vmul.f32 %v10507_v2, %v10412_v22 }
 0x6d7   : > { %v4491_v52 = vpop.permute.xlu1 %4490  ;;  %7806 = vmatmul.mubr.bf16.gmra.mrb[20].mxu1 %v4338_v18 }
 0x6d8   : > { %v4528_v14 = vadd.f32 %v4520_v61, %v4512_v39  ;;  %7825 = vmatprep.mubr.bf16.mxu1 %v4532_v9  ;;  %v4457_v43 = vpop.permute.xlu0 %4456  ;;  %v4507_v0 = vsel %vm4177_vm1, %v4459_v51, %v4491_v52 }
 0x6d9   : > { %v4523_v31 = vmul.f32 %v4507_v0, %v10514_v53  ;;  %v10741_v0 = vld [vmem:[#allocation2 + $0x8] sm:$0xff] }
 0x6da   : > { %v4534_v23 = vpack.c.bf16 %v4529_v49, %v4528_v14  ;;  %7857 = vmatprep.subr.bf16.mxu0 %v10741_v0 }
 0x6db   : > { %v4783_v19 = vpop.permute.xlu1 %4782  ;;  %v4531_v9 = vadd.f32 %v4523_v31, %v4515_v47  ;;  %v4768_v31 = vsub.f32 0.0, %v10595_v56  ;;  %v11362_v47 = vld [vmem:[#allocation43_spill] sm:$0xff] }
 0x6dc   : > { %v4489_v26 = vpop.permute.xlu0 %4488 }
 0x6dd   : > { %v4506_v41 = vsel %vm4177_vm1, %v4457_v43, %v4489_v26  ;;  %v4767_v43 = vsub.f32 0.0, %v10591_v11  ;;  %v4773_v26 = vsub.f32 0.0, %v10615_v60 }
 0x6de   : > { %v4522_v7 = vmul.f32 %v4506_v41, %v10504_v36  ;;  %v4770_v41 = vsub.f32 0.0, %v10603_v29 }
 0x6df   : > { %7826 = vmatmul.mubr.bf16.vlgmr.msra.gmra.mrb[24].mxu1 %v4533_v5  ;;  %v4815_v24 = vpop.permute.xlu1 %4814 }
 0x6e0   : > { %v4530_v35 = vadd.f32 %v4522_v7, %v4514_v15  ;;  %7829 = vmatprep.mubr.bf16.mxu1 %v4534_v23  ;;  %v4838_v1 = vsel %vm4177_vm1, %v4783_v19, %v4815_v24  ;;  %v4769_v23 = vsub.f32 0.0, %v10599_v55  ;;  %v4771_v19 = vsub.f32 0.0, %v10607_v37 }
 0x6e1   : > { %v4854_v34 = vmul.f32 %v4838_v1, %v10439_v12  ;;  %v5088_v15 = vsub.f32 0.0, %v10589_v13  ;;  %v4772_v7 = vsub.f32 0.0, %v11362_v47 }
 0x6e2   : > { %v4535_v48 = vpack.c.bf16 %v4531_v9, %v4530_v35 }
 0x6e3   : > { %v10711_v51 = vadd.f32 %v4854_v34, %v4846_v62 }
 0x6e7   : > { %7830 = vmatmul.mubr.bf16.gmra.mrb[28].mxu1 %v4535_v48 }
 0x770   : > { %v10713_v22 = vpop.f32.mrb[16].mxu1 }
 0x771   : > { %v10715_v32 = vpop.f32.mrb[17].mxu1 }
 0x772   : > { %v10717_v27 = vpop.f32.mrb[18].mxu1 }
 0x773   : > { %v10719_v16 = vpop.f32.mrb[19].mxu1 }
 0x7aa   : > { %v10721_v5 = vpop.f32.mrb[20].mxu1 }
 0x7ab   : > { %11358 = vst [vmem:[#allocation46_spill] sm:$0xff] %v10721_v5  ;;  %v10723_v63 = vpop.f32.mrb[21].mxu1 }
 0x7ac   : > { %11359 = vst [vmem:[#allocation47_spill] sm:$0xff] %v10723_v63  ;;  %v10725_v45 = vpop.f32.mrb[22].mxu1 }
 0x7ad   : > { %11360 = vst [vmem:[#allocation48_spill] sm:$0xff] %v10725_v45  ;;  %v10727_v3 = vpop.f32.mrb[23].mxu1 }
 0x7ae   : > { %11361 = vst [vmem:[#allocation49_spill] sm:$0xff] %v10727_v3 }
 0x7b2   : > { %v7827_v12 = vpop.f32.mrb[24].mxu1 }
 0x7b3   : > { %4605 = vmax.xlane.f32.xlu0 %v7827_v12  ;;  %v4570_v18 = vpop.f32.mrb[25].mxu1 }
 0x7b4   : > { %v7828_v39 = vpop.f32.mrb[26].mxu1 }
 0x7b5   : > { %v4573_v38 = vpop.f32.mrb[27].mxu1 }
 0x7b6   : > { %4603 = vmax.xlane.f32.xlu1 %v4573_v38 }
 0x7b7   : > { %4601 = vmax.xlane.f32.xlu0 %v4570_v18 }
 0x7ba   : > { %v10729_v61 = vpop.f32.mrb[28].mxu1 }
 0x7bb   : > { %4607 = vmax.xlane.f32.xlu0 %v7828_v39  ;;  %v10731_v52 = vpop.f32.mrb[29].mxu1 }
 0x7bc   : > { %v10733_v49 = vpop.f32.mrb[30].mxu1 }
 0x7bd   : > { %v10735_v14 = vpop.f32.mrb[31].mxu1 }
 0x7c7   : > { %4816 = vrot.lane.b32.xlu1 %v10591_v11, %s9269_s18 }
 0x7d1   : > { %4784 = vrot.lane.b32.xlu0 %v4767_v43, %s9269_s18 }
 0x7eb   : > { %4613 = vmax.xlane.f32.xlu1 %v10729_v61 }
 0x7ef   : > { %4609 = vmax.xlane.f32.xlu1 %v10731_v52 }
 0x7f0   : > { %4615 = vmax.xlane.f32.xlu0 %v10733_v49 }
 0x7f4   : > { %4611 = vmax.xlane.f32.xlu0 %v10735_v14 }
 0x800   : > { %4788 = vrot.lane.b32.xlu1 %v4769_v23, %s9269_s18 }
 0x804   : > { %4820 = vrot.lane.b32.xlu1 %v10599_v55, %s9269_s18 }
 0x808   : > { %4792 = vrot.lane.b32.xlu1 %v4771_v19, %s9269_s18 }
 0x80a   : > { %4786 = vrot.lane.b32.xlu0 %v4768_v31, %s9269_s18 }
 0x80c   : > { %4824 = vrot.lane.b32.xlu1 %v10607_v37, %s9269_s18 }
 0x80e   : > { %4818 = vrot.lane.b32.xlu0 %v10595_v56, %s9269_s18 }
 0x810   : > { %4796 = vrot.lane.b32.xlu1 %v4773_v26, %s9269_s18 }
 0x812   : > { %4790 = vrot.lane.b32.xlu0 %v4770_v41, %s9269_s18 }
 0x814   : > { %4828 = vrot.lane.b32.xlu1 %v10615_v60, %s9269_s18 }
 0x816   : > { %4822 = vrot.lane.b32.xlu0 %v10603_v29, %s9269_s18 }
 0x818   : > { %5104 = vrot.lane.b32.xlu1 %v5088_v15, %s9269_s18 }
 0x81a   : > { %4794 = vrot.lane.b32.xlu0 %v4772_v7, %s9269_s18 }
 0x81c   : > { %5136 = vrot.lane.b32.xlu1 %v10589_v13, %s9269_s18 }
 0x81e   : > { %4826 = vrot.lane.b32.xlu0 %v11362_v47, %s9269_s18 }
 0x840   : > { %v4606_v62 = vpop.xlane.xlu0 %4605 }
 0x841   : > { %v4619_v9 = vsub.f32 %v7827_v12, %v4606_v62  ;;  %v4847_v12 = vmul.f32 %v10449_v42, %v10591_v11  ;;  %v10800_v11 = vld [vmem:[#allocation2 + $0x28] sm:$0xff] }
 0x843   : > { %v4604_v24 = vpop.xlane.xlu1 %4603  ;;  %v4629_v23 = vmul.f32 1.442695, %v4619_v9 }
 0x844   : > { %v4618_v35 = vsub.f32 %v4573_v38, %v4604_v24  ;;  %v4602_v1 = vpop.xlane.xlu0 %4601 }
 0x845   : > { %v4617_v34 = vsub.f32 %v4570_v18, %v4602_v1 }
 0x846   : > { %v4627_v48 = vmul.f32 1.442695, %v4618_v35 }
 0x847   : > { %v4625_v43 = vmul.f32 1.442695, %v4617_v34  ;;  %v4817_v41 = vpop.permute.xlu1 %4816  ;;  %v10804_v34 = vld [vmem:[#allocation2 + $0x38] sm:$0xff] }
 0x848   : > { %8796 = vpow2.f32 %v4627_v48  ;;  %v4608_v19 = vpop.xlane.xlu0 %4607  ;;  %v10808_v48 = vld [vmem:[#allocation2 + $0x48] sm:$0xff] }
 0x849   : > { %8798 = vpow2.f32 %v4625_v43  ;;  %v4620_v31 = vsub.f32 %v7828_v39, %v4608_v19 }
 0x84a   : > { %8800 = vpow2.f32 %v4629_v23  ;;  %v10812_v23 = vld [vmem:[#allocation2 + $0x58] sm:$0xff] }
 0x84b   : > { %v4631_v26 = vmul.f32 1.442695, %v4620_v31 }
 0x84c   : > { %v4785_v15 = vpop.permute.xlu0 %4784 }
 0x84d   : > { %8802 = vpow2.f32 %v4631_v26  ;;  %v4839_v7 = vsel %vm4177_vm1, %v4785_v15, %v4817_v41 }
 0x84e   : > { %v4855_v38 = vmul.f32 %v4839_v7, %v10452_v57  ;;  %v10796_v57 = vld [vmem:[#allocation2 + $0x18] sm:$0xff] }
 0x850   : > { %v10780_v18 = vadd.f32 %v4855_v38, %v4847_v12 }
 0x852   : > { %v10782_v62 = vpop.eup %8796 }
 0x853   : > { %v10786_v39 = vpop.eup %8798 }
 0x854   : > { %v4657_v9 = vpack.c.bf16 %v10782_v62, %v10786_v39  ;;  %v10790_v35 = vpop.eup %8800 }
 0x856   : > { %7849 = vmatprep.mubr.bf16.mxu0 %v4657_v9 }
 0x857   : > { %v10792_v1 = vpop.eup %8802 }
 0x858   : > { %v4658_v42 = vpack.c.bf16 %v10792_v1, %v10790_v35 }
 0x85a   : > { %7850 = vmatmul.mubr.bf16.vlgmr.msra.gmra.mrb[24].mxu0 %v4658_v42  ;;  %v10819_v42 = vld [vmem:[#allocation2 + $0x68] sm:$0xff] }
 0x85b   : > { %7858 = vmatpush3.bf16.xpose.msra.mxu0 %v10741_v0 }
 0x85c   : > { %7859 = vmatprep.subr.bf16.mxu0 %v10796_v57 }
 0x863   : > { %7860 = vmatpush3.bf16.xpose.msra.mxu0 %v10796_v57 }
 0x864   : > { %7861 = vmatprep.subr.bf16.mxu0 %v10800_v11 }
 0x86b   : > { %7862 = vmatpush3.bf16.xpose.msra.mxu0 %v10800_v11 }
 0x86c   : > { %7863 = vmatprep.subr.bf16.mxu0 %v10804_v34 }
 0x873   : > { %7864 = vmatpush3.bf16.xpose.msra.mxu0 %v10804_v34 }
 0x874   : > { %7865 = vmatprep.subr.bf16.mxu0 %v10808_v48 }
 0x878   : > { %v4614_v43 = vpop.xlane.xlu1 %4613 }
 0x879   : > { %v4623_v15 = vsub.f32 %v10729_v61, %v4614_v43 }
 0x87b   : > { %7866 = vmatpush3.bf16.xpose.msra.mxu0 %v10808_v48  ;;  %v4637_v45 = vmul.f32 1.442695, %v4623_v15 }
 0x87c   : > { %v4610_v19 = vpop.xlane.xlu1 %4609  ;;  %7867 = vmatprep.subr.bf16.mxu0 %v10812_v23 }
 0x87d   : > { %v4621_v31 = vsub.f32 %v10731_v52, %v4610_v19  ;;  %v4616_v26 = vpop.xlane.xlu0 %4615 }
 0x87e   : > { %v4624_v41 = vsub.f32 %v10733_v49, %v4616_v26  ;;  %v4849_v26 = vmul.f32 %v10470_v54, %v10599_v55 }
 0x87f   : > { %v4633_v7 = vmul.f32 1.442695, %v4621_v31  ;;  %v10826_v31 = vld [vmem:[#allocation2 + $0x78] sm:$0xff] }
 0x880   : > { %v4789_v12 = vpop.permute.xlu1 %4788  ;;  %v4639_v38 = vmul.f32 1.442695, %v4624_v41 }
 0x881   : > { %v4612_v9 = vpop.xlane.xlu0 %4611  ;;  %8804 = vpow2.f32 %v4633_v7 }
 0x882   : > { %v4622_v24 = vsub.f32 %v10735_v14, %v4612_v9  ;;  %8806 = vpow2.f32 %v4639_v38 }
 0x883   : > { %7868 = vmatpush3.bf16.xpose.msra.mxu0 %v10812_v23 }
 0x884   : > { %v4635_v5 = vmul.f32 1.442695, %v4622_v24  ;;  %v4821_v3 = vpop.permute.xlu1 %4820  ;;  %7869 = vmatprep.subr.bf16.mxu0 %v10819_v42  ;;  %v4848_v24 = vmul.f32 %v10467_v28, %v10595_v56 }
 0x885   : > { %v4787_v52 = vpop.permute.xlu0 %4786  ;;  %v4841_v61 = vsel %vm4177_vm1, %v4789_v12, %v4821_v3 }
 0x886   : > { %8808 = vpow2.f32 %v4635_v5  ;;  %v4857_v43 = vmul.f32 %v4841_v61, %v10474_v10 }
 0x887   : > { %8810 = vpow2.f32 %v4637_v45 }
 0x888   : > { %v4793_v49 = vpop.permute.xlu1 %4792  ;;  %v4865_v45 = vadd.f32 %v4857_v43, %v4849_v26  ;;  %v4851_v43 = vmul.f32 %v10490_v40, %v10607_v37  ;;  %v11363_v26 = vpack.c.bf16 %v10780_v18, %v10711_v51 }
 0x889   : > { %v4819_v19 = vpop.permute.xlu0 %4818 }
 0x88a   : > { %v4840_v14 = vsel %vm4177_vm1, %v4787_v52, %v4819_v19 }
 0x88b   : > { %v4856_v41 = vmul.f32 %v4840_v14, %v10464_v59  ;;  %7870 = vmatpush3.bf16.xpose.msra.mxu0 %v10819_v42  ;;  %v10836_v15 = vpop.eup %8804 }
 0x88c   : > { %v4825_v5 = vpop.permute.xlu1 %4824  ;;  %7871 = vmatprep.subr.bf16.mxu0 %v10826_v31  ;;  %v10839_v12 = vpop.eup %8806 }
 0x88d   : > { %v4864_v10 = vadd.f32 %v4856_v41, %v4848_v24  ;;  %v4791_v3 = vpop.permute.xlu0 %4790  ;;  %v4843_v7 = vsel %vm4177_vm1, %v4793_v49, %v4825_v5  ;;  %v4850_v49 = vmul.f32 %v10487_v50, %v10603_v29 }
 0x88e   : > { %v4859_v59 = vmul.f32 %v4843_v7, %v10494_v44 }
 0x88f   : > { %v4871_v28 = vpack.c.bf16 %v4865_v45, %v4864_v10  ;;  %v4852_v45 = vmul.f32 %v10507_v2, %v11362_v47  ;;  %v4853_v10 = vmul.f32 %v10510_v33, %v10615_v60  ;;  %v4758_v47 = vld [vmem:[#allocation3 + $0x8] sm:$0xff] }
 0x890   : > { %v10841_v56 = vpop.eup %8808  ;;  %v4797_v54 = vpop.permute.xlu1 %4796  ;;  %v4867_v14 = vadd.f32 %v4859_v59, %v4851_v43  ;;  %v8908_v59 = vld [vmem:[%s10436_s30] sm:$0xff]  ;;  %7881 = vmatprep.subr.bf16.mxu1 %v4758_v47 }
 0x891   : > { %v10843_v55 = vpop.eup %8810  ;;  %v4823_v38 = vpop.permute.xlu0 %4822  ;;  %v4659_v9 = vpack.c.bf16 %v10841_v56, %v10836_v15  ;;  %7882 = vmatpush3.bf16.msra.mxu1 %v4758_v47 }
 0x892   : > { %v4842_v52 = vsel %vm4177_vm1, %v4791_v3, %v4823_v38  ;;  %v4660_v61 = vpack.c.bf16 %v10839_v12, %v10843_v55 }
 0x893   : > { %v4858_v19 = vmul.f32 %v4842_v52, %v10484_v30  ;;  %7853 = vmatprep.mubr.bf16.mxu0 %v4659_v9  ;;  %7872 = vmatpush3.bf16.xpose.msra.mxu0 %v10826_v31 }
 0x894   : > { %v4829_v44 = vpop.permute.xlu1 %4828  ;;  %7854 = vmatmul.mubr.bf16.gmra.mrb[28].mxu0 %v4660_v61  ;;  %7929 = vmatprep.subr.bf16.mxu0 %v4758_v47 }
 0x895   : > { %v4866_v24 = vadd.f32 %v4858_v19, %v4850_v49  ;;  %7873 = vmatprep.mubr.bf16.mxu0 %v11363_v26  ;;  %v4795_v41 = vpop.permute.xlu0 %4794  ;;  %v4845_v5 = vsel %vm4177_vm1, %v4797_v54, %v4829_v44 }
 0x896   : > { %v4861_v40 = vmul.f32 %v4845_v5, %v10514_v53  ;;  %v5168_v53 = vmul.f32 %v10446_v46, %v10589_v13  ;;  %v4760_v46 = vld [vmem:[#allocation3 + $0x28] sm:$0xff] }
 0x897   : > { %v4872_v50 = vpack.c.bf16 %v4867_v14, %v4866_v24 }
 0x898   : > { %v5105_v29 = vpop.permute.xlu1 %5104  ;;  %v4869_v3 = vadd.f32 %v4861_v40, %v4853_v10  ;;  %v4762_v40 = vld [vmem:[#allocation3 + $0x48] sm:$0xff] }
 0x899   : > { %v4827_v30 = vpop.permute.xlu0 %4826 }
 0x89a   : > { %v4844_v37 = vsel %vm4177_vm1, %v4795_v41, %v4827_v30  ;;  %v11366_v30 = vld [vmem:[#allocation38_spill] sm:$0xff] }
 0x89b   : > { %v4860_v51 = vmul.f32 %v4844_v37, %v10504_v36  ;;  %v4763_v37 = vld [vmem:[#allocation3 + $0x58] sm:$0xff]  ;;  %v5089_v10 = vsub.f32 0.0, %v11366_v30 }
 0x89c   : > { %v5137_v18 = vpop.permute.xlu1 %5136  ;;  %7874 = vmatmul.mubr.bf16.vlgmr.msra.gmra.mrb[32].mxu0 %v4871_v28  ;;  %v4759_v28 = vld [vmem:[#allocation3 + $0x18] sm:$0xff] }
 0x89d   : > { %v4868_v7 = vadd.f32 %v4860_v51, %v4852_v45  ;;  %v5160_v54 = vsel %vm4177_vm1, %v5105_v29, %v5137_v18  ;;  %7877 = vmatprep.mubr.bf16.mxu0 %v4872_v50  ;;  %7930 = vmatpush3.bf16.msra.mxu0 %v4758_v47  ;;  %v4761_v29 = vld [vmem:[#allocation3 + $0x38] sm:$0xff]  ;;  %v4764_v45 = vld [vmem:[#allocation3 + $0x68] sm:$0xff]  ;;  %v11367_v18 = vld [vmem:[#allocation40_spill] sm:$0xff] }
 0x89e   : > { %v5176_v38 = vmul.f32 %v8908_v59, %v5160_v54  ;;  %7883 = vmatprep.subr.bf16.mxu1 %v4759_v28  ;;  %7931 = vmatprep.subr.bf16.mxu0 %v4759_v28  ;;  %v4765_v51 = vld [vmem:[#allocation3 + $0x78] sm:$0xff] }
 0x89f   : > { %v4873_v9 = vpack.c.bf16 %v4869_v3, %v4868_v7  ;;  %7884 = vmatpush3.bf16.msra.mxu1 %v4759_v28  ;;  %v5091_v3 = vsub.f32 0.0, %v11367_v18  ;;  %v11368_v7 = vld [vmem:[#allocation42_spill] sm:$0xff]  ;;  %v11371_v47 = vld [vmem:[#allocation41_spill] sm:$0xff] }
 0x8a0   : > { %v10872_v52 = vadd.f32 %v5176_v38, %v5168_v53  ;;  %7885 = vmatprep.subr.bf16.mxu1 %v4760_v46  ;;  %v5093_v54 = vsub.f32 0.0, %v11368_v7  ;;  %v11369_v53 = vld [vmem:[#allocation39_spill] sm:$0xff]  ;;  %v11370_v38 = vld [vmem:[#allocation45_spill] sm:$0xff] }
 0x8a1   : > { %7932 = vmatpush3.bf16.msra.mxu0 %v4759_v28  ;;  %v5090_v59 = vsub.f32 0.0, %v11369_v53  ;;  %v5092_v28 = vsub.f32 0.0, %v11371_v47 }
 0x8a2   : > { %7933 = vmatprep.subr.bf16.mxu0 %v4760_v46 }
 0x8a3   : > { %7886 = vmatpush3.bf16.msra.mxu1 %v4760_v46 }
 0x8a4   : > { %7878 = vmatmul.mubr.bf16.gmra.mrb[36].mxu0 %v4873_v9  ;;  %7887 = vmatprep.subr.bf16.mxu1 %v4761_v29  ;;  %v5095_v9 = vsub.f32 0.0, %v11370_v38 }
 0x8a5   : > { %7934 = vmatpush3.bf16.msra.mxu0 %v4760_v46  ;;  %v11372_v46 = vld [vmem:[#allocation44_spill] sm:$0xff] }
 0x8a6   : > { %7935 = vmatprep.subr.bf16.mxu0 %v4761_v29 }
 0x8a7   : > { %7888 = vmatpush3.bf16.msra.mxu1 %v4761_v29 }
 0x8a8   : > { %7889 = vmatprep.subr.bf16.mxu1 %v4762_v40 }
 0x8a9   : > { %7936 = vmatpush3.bf16.msra.mxu0 %v4761_v29  ;;  %v5094_v29 = vsub.f32 0.0, %v11372_v46 }
 0x8aa   : > { %7937 = vmatprep.subr.bf16.mxu0 %v4762_v40 }
 0x8ab   : > { %7890 = vmatpush3.bf16.msra.mxu1 %v4762_v40 }
 0x8ac   : > { %7891 = vmatprep.subr.bf16.mxu1 %v4763_v37 }
 0x8ad   : > { %7938 = vmatpush3.bf16.msra.mxu0 %v4762_v40 }
 0x8ae   : > { %7939 = vmatprep.subr.bf16.mxu0 %v4763_v37 }
 0x8af   : > { %7892 = vmatpush3.bf16.msra.mxu1 %v4763_v37 }
 0x8b0   : > { %7893 = vmatprep.subr.bf16.mxu1 %v4764_v45 }
 0x8b1   : > { %7940 = vmatpush3.bf16.msra.mxu0 %v4763_v37 }
 0x8b2   : > { %7941 = vmatprep.subr.bf16.mxu0 %v4764_v45 }
 0x8b3   : > { %7894 = vmatpush3.bf16.msra.mxu1 %v4764_v45 }
 0x8b4   : > { %7895 = vmatprep.subr.bf16.mxu1 %v4765_v51 }
 0x8b5   : > { %7942 = vmatpush3.bf16.msra.mxu0 %v4764_v45 }
 0x8b6   : > { %7943 = vmatprep.subr.bf16.mxu0 %v4765_v51 }
 0x8b7   : > { %7896 = vmatpush3.bf16.msra.mxu1 %v4765_v51 }
 0x8b8   : > { %7905 = vmatprep.subr.bf16.mxu1 %v10741_v0 }
 0x8b9   : > { %7944 = vmatpush3.bf16.msra.mxu0 %v4765_v51 }
 0x92d   : > { %v10874_v2 = vpop.f32.mrb[24].mxu0 }
 0x92e   : > { %v10876_v33 = vpop.f32.mrb[25].mxu0 }
 0x92f   : > { %v10878_v36 = vpop.f32.mrb[26].mxu0 }
 0x930   : > { %v10880_v60 = vpop.f32.mrb[27].mxu0 }
 0x967   : > { %v10882_v13 = vpop.f32.mrb[28].mxu0 }
 0x968   : > { %11364 = vst [vmem:[#allocation43_spill] sm:$0xff] %v10882_v13  ;;  %v10884_v61 = vpop.f32.mrb[29].mxu0 }
 0x969   : > { %v10886_v49 = vpop.f32.mrb[30].mxu0 }
 0x96a   : > { %11365 = vst [vmem:[#allocation50_spill] sm:$0xff] %v10886_v49  ;;  %v10888_v43 = vpop.f32.mrb[31].mxu0 }
 0x96f   : > { %v10890_v19 = vpop.f32.mrb[32].mxu0 }
 0x970   : > { %4943 = vmax.xlane.f32.xlu0 %v10890_v19  ;;  %v10893_v44 = vpop.f32.mrb[33].mxu0 }
 0x971   : > { %v10895_v14 = vpop.f32.mrb[34].mxu0 }
 0x972   : > { %v10897_v24 = vpop.f32.mrb[35].mxu0 }
 0x973   : > { %4941 = vmax.xlane.f32.xlu1 %v10897_v24 }
 0x974   : > { %4939 = vmax.xlane.f32.xlu0 %v10893_v44 }
 0x977   : > { %v10901_v26 = vpop.f32.mrb[36].mxu0 }
 0x978   : > { %4945 = vmax.xlane.f32.xlu0 %v10895_v14  ;;  %v10904_v41 = vpop.f32.mrb[37].mxu0 }
 0x979   : > { %v10906_v5 = vpop.f32.mrb[38].mxu0 }
 0x97a   : > { %v10908_v50 = vpop.f32.mrb[39].mxu0 }
 0x984   : > { %5138 = vrot.lane.b32.xlu1 %v11366_v30, %s9269_s18 }
 0x98e   : > { %5106 = vrot.lane.b32.xlu0 %v5089_v10, %s9269_s18 }
 0x9a8   : > { %4951 = vmax.xlane.f32.xlu1 %v10901_v26 }
 0x9ac   : > { %4947 = vmax.xlane.f32.xlu1 %v10904_v41 }
 0x9ad   : > { %4953 = vmax.xlane.f32.xlu0 %v10906_v5 }
 0x9b1   : > { %4949 = vmax.xlane.f32.xlu0 %v10908_v50 }
 0x9bd   : > { %5110 = vrot.lane.b32.xlu1 %v5091_v3, %s9269_s18 }
 0x9c1   : > { %5142 = vrot.lane.b32.xlu1 %v11367_v18, %s9269_s18 }
 0x9c5   : > { %5114 = vrot.lane.b32.xlu1 %v5093_v54, %s9269_s18 }
 0x9c7   : > { %5108 = vrot.lane.b32.xlu0 %v5090_v59, %s9269_s18 }
 0x9c9   : > { %5146 = vrot.lane.b32.xlu1 %v11368_v7, %s9269_s18 }
 0x9cb   : > { %5140 = vrot.lane.b32.xlu0 %v11369_v53, %s9269_s18 }
 0x9cd   : > { %5118 = vrot.lane.b32.xlu1 %v5095_v9, %s9269_s18 }
 0x9cf   : > { %5112 = vrot.lane.b32.xlu0 %v5092_v28, %s9269_s18 }
 0x9d1   : > { %5150 = vrot.lane.b32.xlu1 %v11370_v38, %s9269_s18 }
 0x9d3   : > { %5144 = vrot.lane.b32.xlu0 %v11371_v47, %s9269_s18 }
 0x9d7   : > { %5116 = vrot.lane.b32.xlu0 %v5094_v29, %s9269_s18 }
 0x9db   : > { %5148 = vrot.lane.b32.xlu0 %v11372_v46, %s9269_s18  ;;  %s11181_s18 = scalar_lea.hbm %s11381_s2, %s7147_s13 }
 0x9fd   : > { %v4944_v40 = vpop.xlane.xlu0 %4943 }
 0x9fe   : > { %v4957_v45 = vsub.f32 %v10890_v19, %v4944_v40 }
 0xa00   : > { %v4942_v37 = vpop.xlane.xlu1 %4941  ;;  %v4967_v9 = vmul.f32 1.442695, %v4957_v45 }
 0xa01   : > { %v4956_v10 = vsub.f32 %v10897_v24, %v4942_v37  ;;  %v4940_v51 = vpop.xlane.xlu0 %4939  ;;  %v8909_v24 = vld [vmem:[%s10443_s16 + $0x8] sm:$0xff] }
 0xa02   : > { %v4955_v3 = vsub.f32 %v10893_v44, %v4940_v51  ;;  %v5169_v40 = vmul.f32 %v8909_v24, %v11366_v30  ;;  %v8910_v44 = vld [vmem:[%s10436_s30 + $0x8] sm:$0xff] }
 0xa03   : > { %v4965_v54 = vmul.f32 1.442695, %v4956_v10 }
 0xa04   : > { %v4963_v59 = vmul.f32 1.442695, %v4955_v3  ;;  %v5139_v13 = vpop.permute.xlu1 %5138 }
 0xa05   : > { %8812 = vpow2.f32 %v4965_v54  ;;  %v4946_v28 = vpop.xlane.xlu0 %4945 }
 0xa06   : > { %8814 = vpow2.f32 %v4963_v59  ;;  %v4958_v29 = vsub.f32 %v10895_v14, %v4946_v28 }
 0xa07   : > { %8816 = vpow2.f32 %v4967_v9 }
 0xa08   : > { %v4969_v49 = vmul.f32 1.442695, %v4958_v29 }
 0xa09   : > { %v5107_v63 = vpop.permute.xlu0 %5106 }
 0xa0a   : > { %8818 = vpow2.f32 %v4969_v49  ;;  %v5161_v19 = vsel %vm4177_vm1, %v5107_v63, %v5139_v13 }
 0xa0b   : > { %v5177_v37 = vmul.f32 %v8910_v44, %v5161_v19  ;;  %v8911_v44 = vld [vmem:[%s10436_s30 + $0x18] sm:$0xff] }
 0xa0d   : > { %v10951_v10 = vadd.f32 %v5177_v37, %v5169_v40 }
 0xa0f   : > { %v10953_v45 = vpop.eup %8812  ;;  %v5192_v51 = vpack.c.bf16 %v10951_v10, %v10872_v52 }
 0xa10   : > { %v10957_v14 = vpop.eup %8814 }
 0xa11   : > { %v4995_v3 = vpack.c.bf16 %v10953_v45, %v10957_v14  ;;  %v10961_v49 = vpop.eup %8816 }
 0xa13   : > { %7897 = vmatprep.mubr.bf16.mxu1 %v4995_v3 }
 0xa14   : > { %v10963_v63 = vpop.eup %8818 }
 0xa15   : > { %v4996_v13 = vpack.c.bf16 %v10963_v63, %v10961_v49 }
 0xa17   : > { %7898 = vmatmul.mubr.bf16.vlgmr.msra.gmra.mrb[32].mxu1 %v4996_v13 }
 0xa18   : > { %7906 = vmatpush3.bf16.xpose.msra.mxu1 %v10741_v0 }
 0xa19   : > { %7907 = vmatprep.subr.bf16.mxu1 %v10796_v57 }
 0xa20   : > { %7908 = vmatpush3.bf16.xpose.msra.mxu1 %v10796_v57 }
 0xa21   : > { %7909 = vmatprep.subr.bf16.mxu1 %v10800_v11 }
 0xa28   : > { %7910 = vmatpush3.bf16.xpose.msra.mxu1 %v10800_v11 }
 0xa29   : > { %7911 = vmatprep.subr.bf16.mxu1 %v10804_v34 }
 0xa30   : > { %7912 = vmatpush3.bf16.xpose.msra.mxu1 %v10804_v34 }
 0xa31   : > { %7913 = vmatprep.subr.bf16.mxu1 %v10808_v48 }
 0xa35   : > { %v4952_v30 = vpop.xlane.xlu1 %4951 }
 0xa36   : > { %v4961_v9 = vsub.f32 %v10901_v26, %v4952_v30  ;;  %v8913_v30 = vld [vmem:[%s10443_s16 + $0x18] sm:$0xff] }
 0xa38   : > { %7914 = vmatpush3.bf16.xpose.msra.mxu1 %v10808_v48  ;;  %v4975_v24 = vmul.f32 1.442695, %v4961_v9 }
 0xa39   : > { %v4948_v54 = vpop.xlane.xlu1 %4947  ;;  %7915 = vmatprep.subr.bf16.mxu1 %v10812_v23 }
 0xa3a   : > { %v4959_v0 = vsub.f32 %v10904_v41, %v4948_v54  ;;  %v4954_v59 = vpop.xlane.xlu0 %4953  ;;  %v5171_v54 = vmul.f32 %v8913_v30, %v11367_v18 }
 0xa3b   : > { %v4962_v57 = vsub.f32 %v10906_v5, %v4954_v59 }
 0xa3c   : > { %v4971_v11 = vmul.f32 1.442695, %v4959_v0  ;;  %v8914_v0 = vld [vmem:[%s10436_s30 + $0x10] sm:$0xff] }
 0xa3d   : > { %v5111_v28 = vpop.permute.xlu1 %5110  ;;  %v4977_v29 = vmul.f32 1.442695, %v4962_v57 }
 0xa3e   : > { %v4950_v34 = vpop.xlane.xlu0 %4949  ;;  %8820 = vpow2.f32 %v4971_v11 }
 0xa3f   : > { %v4960_v19 = vsub.f32 %v10908_v50, %v4950_v34  ;;  %8822 = vpow2.f32 %v4977_v29 }
 0xa40   : > { %7916 = vmatpush3.bf16.xpose.msra.mxu1 %v10812_v23  ;;  %v8912_v23 = vld [vmem:[%s10443_s16 + $0x10] sm:$0xff] }
 0xa41   : > { %v4973_v48 = vmul.f32 1.442695, %v4960_v19  ;;  %v5143_v41 = vpop.permute.xlu1 %5142  ;;  %7917 = vmatprep.subr.bf16.mxu1 %v10819_v42  ;;  %v5170_v13 = vmul.f32 %v8912_v23, %v11369_v53 }
 0xa42   : > { %v5109_v26 = vpop.permute.xlu0 %5108  ;;  %v5163_v5 = vsel %vm4177_vm1, %v5111_v28, %v5143_v41 }
 0xa43   : > { %8824 = vpow2.f32 %v4973_v48  ;;  %v5179_v50 = vmul.f32 %v8911_v44, %v5163_v5  ;;  %v8915_v48 = vld [vmem:[%s10436_s30 + $0x28] sm:$0xff] }
 0xa44   : > { %8826 = vpow2.f32 %v4975_v24 }
 0xa45   : > { %v5115_v40 = vpop.permute.xlu1 %5114  ;;  %v5187_v9 = vadd.f32 %v5179_v50, %v5171_v54  ;;  %v8916_v50 = vld [vmem:[%s10443_s16 + $0x20] sm:$0xff] }
 0xa46   : > { %v5141_v37 = vpop.permute.xlu0 %5140 }
 0xa47   : > { %v5162_v3 = vsel %vm4177_vm1, %v5109_v26, %v5141_v37  ;;  %v5172_v37 = vmul.f32 %v8916_v50, %v11371_v47  ;;  %v8593_v50 = vld [vmem:[#allocation13 + $0x2c] ss:$16 sps:$4 sm:$0xff]  }
 0xa48   : > { %v5178_v59 = vmul.f32 %v8914_v0, %v5162_v3  ;;  %7918 = vmatpush3.bf16.xpose.msra.mxu1 %v10819_v42  ;;  %v10993_v29 = vpop.eup %8820  ;;  %v8917_v3 = vld [vmem:[%s10443_s16 + $0x28] sm:$0xff] }
 0xa49   : > { %v5147_v57 = vpop.permute.xlu1 %5146  ;;  %7919 = vmatprep.subr.bf16.mxu1 %v10826_v31  ;;  %v10996_v34 = vpop.eup %8822  ;;  %v5173_v23 = vmul.f32 %v8917_v3, %v11368_v7  ;;  %v8596_v3 = vld [vmem:[#allocation13 + $0x4c] ss:$16 sps:$4 sm:$0xff]  }
 0xa4a   : > { %v5186_v11 = vadd.f32 %v5178_v59, %v5170_v13  ;;  %v5113_v28 = vpop.permute.xlu0 %5112  ;;  %v5165_v53 = vsel %vm4177_vm1, %v5115_v40, %v5147_v57  ;;  %v8918_v13 = vld [vmem:[%s10436_s30 + $0x20] sm:$0xff] }
 0xa4b   : > { %v5181_v41 = vmul.f32 %v8915_v48, %v5165_v53  ;;  %v8920_v48 = vld [vmem:[%s10443_s16 + $0x30] sm:$0xff] }
 0xa4c   : > { %v5193_v18 = vpack.c.bf16 %v5187_v9, %v5186_v11  ;;  %v8919_v9 = vld [vmem:[%s10436_s30 + $0x38] sm:$0xff] }
 0xa4d   : > { %v10998_v19 = vpop.eup %8824  ;;  %v5119_v24 = vpop.permute.xlu1 %5118  ;;  %v5189_v0 = vadd.f32 %v5181_v41, %v5173_v23  ;;  %v8597_v23 = vld [vmem:[#allocation13 + $0x68] ss:$16 sps:$4 sm:$0xff]  }
 0xa4e   : > { %v11000_v42 = vpop.eup %8826  ;;  %v5145_v26 = vpop.permute.xlu0 %5144  ;;  %v4997_v5 = vpack.c.bf16 %v10998_v19, %v10993_v29 }
 0xa4f   : > { %v5164_v44 = vsel %vm4177_vm1, %v5113_v28, %v5145_v26  ;;  %v4998_v40 = vpack.c.bf16 %v10996_v34, %v11000_v42  ;;  %v8921_v26 = vld [vmem:[%s10443_s16 + $0x38] sm:$0xff]  ;;  %s9121_s16 = scalar_lea.vmem %s11183_s8, 4096 }
 0xa50   : > { %v5180_v30 = vmul.f32 %v8918_v13, %v5164_v44  ;;  %7901 = vmatprep.mubr.bf16.mxu1 %v4997_v5  ;;  %7920 = vmatpush3.bf16.xpose.msra.mxu1 %v10826_v31  ;;  %v5174_v31 = vmul.f32 %v8920_v48, %v11372_v46  ;;  %v5175_v41 = vmul.f32 %v8921_v26, %v11370_v38  ;;  %v8922_v5 = vld [vmem:[%s10436_s30 + $0x30] sm:$0xff]  ;;  %v8594_v46 = vld [vmem:[#allocation13 + $0x48] ss:$16 sps:$4 sm:$0xff]   ;;  %v8599_v38 = vld [vmem:[#allocation13 + $0x6c] ss:$16 sps:$4 sm:$0xff]   ;;  %s11193_s30 = scalar_lea.sflag [#allocation7], %s395_s23  ;;  %p9122_p1 = scmp.ne.s32.totalorder %s11183_s8, %s9121_s16 }
 0xa51   : > { %v5151_v54 = vpop.permute.xlu1 %5150  ;;  %7902 = vmatmul.mubr.bf16.gmra.mrb[36].mxu1 %v4998_v40  ;;  %v8590_v40 = vld [vmem:[#allocation13 + $0xc] ss:$16 sps:$4 sm:$0xff]   ;;  %p9129_p2 = scmp.lt.s32.totalorder %s9127_s17, %s9121_s16 }
 0xa52   : > { %v5188_v59 = vadd.f32 %v5180_v30, %v5172_v37  ;;  %7921 = vmatprep.mubr.bf16.mxu1 %v5192_v51  ;;  %v5117_v47 = vpop.permute.xlu0 %5116  ;;  %v5167_v57 = vsel %vm4177_vm1, %v5119_v24, %v5151_v54  ;;  %v8588_v24 = vld [vmem:[#allocation13 + $0x8] ss:$16 sps:$4 sm:$0xff]   ;;  %6340 = vmatprep.subr.bf16.mxu1 %v8590_v40  ;;  %v8602_v13 = vld [vmem:[#allocation13 + $0x8c] ss:$16 sps:$4 sm:$0xff]   ;;  %p9123_p12 = pnand %p9122_p1, %p11382_p6 }
 0xa53   : > { %v5183_v11 = vmul.f32 %v8919_v9, %v5167_v57  ;;  %v8591_v37 = vld [vmem:[#allocation13 + $0x28] ss:$16 sps:$4 sm:$0xff]   ;;  %p9130_p7 = por %p9129_p2, %p9128_p5 }
 0xa54   : > { %v5194_v7 = vpack.c.bf16 %v5189_v0, %v5188_v59  ;;  %v8600_v59 = vld [vmem:[#allocation13 + $0x88] ss:$16 sps:$4 sm:$0xff]   ;;  %p9124_p3 = pneg %p9123_p12 }
 0xa55   : > { %v5191_v52 = vadd.f32 %v5183_v11, %v5175_v41  ;;  %v8603_v57 = vld [vmem:[#allocation13 + $0xa8] ss:$16 sps:$4 sm:$0xff]  }
 0xa56   : > { %v5149_v28 = vpop.permute.xlu0 %5148  ;;  %v8606_v9 = vld [vmem:[#allocation13 + $0xc8] ss:$16 sps:$4 sm:$0xff]   ;;  %p9131_p11 = pnand %p9130_p7, %p9124_p3 }
 0xa57   : > { %v5166_v53 = vsel %vm4177_vm1, %v5117_v47, %v5149_v28  ;;  %v8605_v47 = vld [vmem:[#allocation13 + $0xac] ss:$16 sps:$4 sm:$0xff]   ;;  %v8609_v40 = vld [vmem:[#allocation13 + $0xe8] ss:$16 sps:$4 sm:$0xff]  }
 0xa58   : > { %v5182_v44 = vmul.f32 %v8922_v5, %v5166_v53 }
 0xa59   : > { %7922 = vmatmul.mubr.bf16.vlgmr.msra.gmra.mrb[40].mxu1 %v5193_v18 }
 0xa5a   : > { %v5190_v10 = vadd.f32 %v5182_v44, %v5174_v31  ;;  %7925 = vmatprep.mubr.bf16.mxu1 %v5194_v7  ;;  %6341 = vmatpush1.bf16.msra.mxu1 %v8588_v24  ;;  %v8608_v7 = vld [vmem:[#allocation13 + $0xcc] ss:$16 sps:$4 sm:$0xff]  }
 0xa5b   : > { %6342 = vmatprep.subr.bf16.mxu1 %v8593_v50  ;;  %v8611_v24 = vld [vmem:[#allocation13 + $0xec] ss:$16 sps:$4 sm:$0xff]  }
 0xa5c   : > { %v5195_v51 = vpack.c.bf16 %v5191_v52, %v5190_v10  ;;  %v8614_v50 = vld [vmem:[#allocation13 + $0x10c] ss:$16 sps:$4 sm:$0xff]  }
 0xa5e   : > { %6343 = vmatpush1.bf16.msra.mxu1 %v8591_v37  ;;  %v8612_v37 = vld [vmem:[#allocation13 + $0x108] ss:$16 sps:$4 sm:$0xff]  }
 0xa5f   : > { %6344 = vmatprep.subr.bf16.mxu1 %v8596_v3  ;;  %v8617_v3 = vld [vmem:[#allocation13 + $0x12c] ss:$16 sps:$4 sm:$0xff]  }
 0xa61   : > { %7926 = vmatmul.mubr.bf16.gmra.mrb[44].mxu1 %v5195_v51 }
 0xa62   : > { %6345 = vmatpush1.bf16.msra.mxu1 %v8594_v46  ;;  %v8615_v46 = vld [vmem:[#allocation13 + $0x128] ss:$16 sps:$4 sm:$0xff]  }
 0xa63   : > { %6346 = vmatprep.subr.bf16.mxu1 %v8599_v38  ;;  %v8618_v38 = vld [vmem:[#allocation13 + $0x148] ss:$16 sps:$4 sm:$0xff]  }
 0xa66   : > { %6347 = vmatpush1.bf16.msra.mxu1 %v8597_v23 }
 0xa67   : > { %6348 = vmatprep.subr.bf16.mxu1 %v8602_v13 }
 0xa6a   : > { %6349 = vmatpush1.bf16.msra.mxu1 %v8600_v59 }
 0xa6b   : > { %6350 = vmatprep.subr.bf16.mxu1 %v8605_v47 }
 0xa6e   : > { %6351 = vmatpush1.bf16.msra.mxu1 %v8603_v57 }
 0xa6f   : > { %6352 = vmatprep.subr.bf16.mxu1 %v8608_v7 }
 0xa72   : > { %6353 = vmatpush1.bf16.msra.mxu1 %v8606_v9 }
 0xa73   : > { %6354 = vmatprep.subr.bf16.mxu1 %v8611_v24 }
 0xa76   : > { %6355 = vmatpush1.bf16.msra.mxu1 %v8609_v40 }
 0xa77   : > { %6356 = vmatprep.subr.bf16.mxu1 %v8614_v50 }
 0xa7a   : > { %6357 = vmatpush1.bf16.msra.mxu1 %v8612_v37 }
 0xa7b   : > { %6358 = vmatprep.subr.bf16.mxu1 %v8617_v3 }
 0xa7e   : > { %6359 = vmatpush1.bf16.msra.mxu1 %v8615_v46 }
 0xaea   : > { %v11025_v18 = vpop.f32.mrb[32].mxu1 }
 0xaeb   : > { %v11027_v30 = vpop.f32.mrb[33].mxu1 }
 0xaec   : > { %v11029_v54 = vpop.f32.mrb[34].mxu1 }
 0xaed   : > { %v11031_v0 = vpop.f32.mrb[35].mxu1 }
 0xb24   : > { %v11033_v11 = vpop.f32.mrb[36].mxu1 }
 0xb25   : > { %v11035_v28 = vpop.f32.mrb[37].mxu1 }
 0xb26   : > { %v11037_v53 = vpop.f32.mrb[38].mxu1 }
 0xb27   : > { %v11039_v48 = vpop.f32.mrb[39].mxu1 }
 0xb2c   : > { %v11041_v31 = vpop.f32.mrb[40].mxu1 }
 0xb2d   : > { %v11043_v26 = vpop.f32.mrb[41].mxu1 }
 0xb2e   : > { %5261 = vmax.xlane.f32.xlu0 %v11043_v26  ;;  %v11046_v41 = vpop.f32.mrb[42].mxu1 }
 0xb2f   : > { %v11048_v5 = vpop.f32.mrb[43].mxu1 }
 0xb30   : > { %5263 = vmax.xlane.f32.xlu1 %v11048_v5 }
 0xb32   : > { %5265 = vmax.xlane.f32.xlu0 %v11041_v31 }
 0xb34   : > { %v11052_v44 = vpop.f32.mrb[44].mxu1 }
 0xb35   : > { %v11054_v52 = vpop.f32.mrb[45].mxu1 }
 0xb36   : > { %5267 = vmax.xlane.f32.xlu0 %v11046_v41  ;;  %5269 = vmax.xlane.f32.xlu1 %v11054_v52  ;;  %v11058_v10 = vpop.f32.mrb[46].mxu1 }
 0xb37   : > { %v11060_v51 = vpop.f32.mrb[47].mxu1 }
 0xb3a   : > { %5273 = vmax.xlane.f32.xlu1 %v11052_v44  ;;  %5271 = vmax.xlane.f32.xlu0 %v11060_v51 }
 0xb3e   : > { %4641 = vadd.xlane.f32.xlu1 %v10786_v39  ;;  %5275 = vmax.xlane.f32.xlu0 %v11058_v10  ;;  %v8620_v39 = vld [vmem:[#allocation13 + $0x14c] ss:$16 sps:$4 sm:$0xff]  }
 0xb3f   : > { %6360 = vmatprep.subr.bf16.mxu1 %v8620_v39 }
 0xb40   : > { %6361 = vmatpush1.bf16.msra.mxu1 %v8618_v38 }
 0xb42   : > { %4319 = vadd.xlane.f32.xlu1 %v10639_v4  ;;  %4643 = vadd.xlane.f32.xlu0 %v10782_v62  ;;  %v8623_v4 = vld [vmem:[#allocation13 + $0x16c] ss:$16 sps:$4 sm:$0xff]   ;;  %v8621_v62 = vld [vmem:[#allocation13 + $0x168] ss:$16 sps:$4 sm:$0xff]  }
 0xb43   : > { %6362 = vmatprep.subr.bf16.mxu1 %v8623_v4 }
 0xb44   : > { %6363 = vmatpush1.bf16.msra.mxu1 %v8621_v62 }
 0xb46   : > { %4645 = vadd.xlane.f32.xlu1 %v10790_v35  ;;  %4321 = vadd.xlane.f32.xlu0 %v10635_v6  ;;  %v8626_v6 = vld [vmem:[#allocation13 + $0x18c] ss:$16 sps:$4 sm:$0xff]   ;;  %v8629_v35 = vld [vmem:[#allocation13 + $0x4] ss:$16 sps:$4 sm:$0xff]  }
 0xb47   : > { %6364 = vmatprep.subr.bf16.mxu1 %v8626_v6  ;;  %6194 = vmatprep.subr.bf16.mxu0 %v8629_v35 }
 0xb4a   : > { %4323 = vadd.xlane.f32.xlu1 %v10643_v17  ;;  %4647 = vadd.xlane.f32.xlu0 %v10792_v1  ;;  %v8624_v17 = vld [vmem:[#allocation13 + $0x188] ss:$16 sps:$4 sm:$0xff]   ;;  %v8632_v1 = vld [vmem:[#allocation13 + $0x1ac] ss:$16 sps:$4 sm:$0xff]  }
 0xb4b   : > { %6365 = vmatpush1.bf16.msra.mxu1 %v8624_v17 }
 0xb4c   : > { %6366 = vmatprep.subr.bf16.mxu1 %v8632_v1 }
 0xb4e   : > { %4649 = vadd.xlane.f32.xlu1 %v10836_v15  ;;  %4325 = vadd.xlane.f32.xlu0 %v10645_v58  ;;  %v8630_v58 = vld [vmem:[#allocation13 + $0x1a8] ss:$16 sps:$4 sm:$0xff]  }
 0xb4f   : > { %6367 = vmatpush1.bf16.msra.mxu1 %v8630_v58  ;;  %v8636_v15 = vld [vmem:[#allocation13 + $0x1c8] ss:$16 sps:$4 sm:$0xff]  }
 0xb52   : > { %4327 = vadd.xlane.f32.xlu1 %v10675_v20  ;;  %4651 = vadd.xlane.f32.xlu0 %v10841_v56  ;;  %v8638_v20 = vld [vmem:[#allocation13 + $0x1cc] ss:$16 sps:$4 sm:$0xff]  }
 0xb53   : > { %6368 = vmatprep.subr.bf16.mxu1 %v8638_v20  ;;  %v8644_v56 = vld [vmem:[#allocation13 + $0x1ec] ss:$16 sps:$4 sm:$0xff]   ;;  %v8627_v20 = vld [vmem:[#allocation13] ss:$16 sps:$4 sm:$0xff]  }
 0xb54   : > { %6369 = vmatpush1.bf16.msra.mxu1 %v8636_v15 }
 0xb55   : > { %6370 = vmatprep.subr.bf16.mxu1 %v8644_v56  ;;  %v8635_v56 = vld [vmem:[#allocation13 + $0x24] ss:$16 sps:$4 sm:$0xff]  }
 0xb56   : > { %4653 = vadd.xlane.f32.xlu1 %v10843_v55  ;;  %4329 = vadd.xlane.f32.xlu0 %v10680_v25  ;;  %v8642_v55 = vld [vmem:[#allocation13 + $0x1e8] ss:$16 sps:$4 sm:$0xff]  }
 0xb58   : > { %6371 = vmatpush1.bf16.msra.mxu1 %v8642_v55 }
 0xb5a   : > { %4331 = vadd.xlane.f32.xlu1 %v10682_v8  ;;  %4655 = vadd.xlane.f32.xlu0 %v10839_v12 }
 0xb5e   : > { %4333 = vadd.xlane.f32.xlu0 %v10678_v21 }
 0xbbb   : > { %v5262_v25 = vpop.xlane.xlu0 %5261 }
 0xbbc   : > { %v5277_v23 = vsub.f32 %v11043_v26, %v5262_v25 }
 0xbbd   : > { %v5264_v13 = vpop.xlane.xlu1 %5263 }
 0xbbe   : > { %v5285_v59 = vmul.f32 1.442695, %v5277_v23  ;;  %v5278_v8 = vsub.f32 %v11048_v5, %v5264_v13  ;;  %v8633_v23 = vld [vmem:[#allocation13 + $0x20] ss:$16 sps:$4 sm:$0xff]  }
 0xbbf   : > { %v5266_v47 = vpop.xlane.xlu0 %5265 }
 0xbc0   : > { %8828 = vpow2.f32 %v5285_v59  ;;  %v5287_v12 = vmul.f32 1.442695, %v5278_v8  ;;  %v5279_v57 = vsub.f32 %v11041_v31, %v5266_v47  ;;  %v8641_v8 = vld [vmem:[#allocation13 + $0x44] ss:$16 sps:$4 sm:$0xff]  }
 0xbc2   : > { %8830 = vpow2.f32 %v5287_v12  ;;  %v5289_v9 = vmul.f32 1.442695, %v5279_v57 }
 0xbc3   : > { %v5270_v7 = vpop.xlane.xlu1 %5269  ;;  %v5268_v21 = vpop.xlane.xlu0 %5267 }
 0xbc4   : > { %v5281_v24 = vsub.f32 %v11054_v52, %v5270_v7  ;;  %v5280_v40 = vsub.f32 %v11046_v41, %v5268_v21  ;;  %8832 = vpow2.f32 %v5289_v9  ;;  %v8639_v21 = vld [vmem:[#allocation13 + $0x40] ss:$16 sps:$4 sm:$0xff]  }
 0xbc6   : > { %v5291_v50 = vmul.f32 1.442695, %v5280_v40  ;;  %v5293_v3 = vmul.f32 1.442695, %v5281_v24  ;;  %v8647_v24 = vld [vmem:[#allocation13 + $0x64] ss:$16 sps:$4 sm:$0xff]  }
 0xbc7   : > { %v5274_v37 = vpop.xlane.xlu1 %5273  ;;  %v5272_v26 = vpop.xlane.xlu0 %5271 }
 0xbc8   : > { %v5283_v5 = vsub.f32 %v11052_v44, %v5274_v37  ;;  %v5282_v46 = vsub.f32 %v11060_v51, %v5272_v26  ;;  %8834 = vpow2.f32 %v5291_v50 }
 0xbc9   : > { %8836 = vpow2.f32 %v5293_v3 }
 0xbca   : > { %v8829_v39 = vpop.eup %8828  ;;  %v5297_v31 = vmul.f32 1.442695, %v5283_v5  ;;  %v5295_v38 = vmul.f32 1.442695, %v5282_v46  ;;  %v8645_v46 = vld [vmem:[#allocation13 + $0x60] ss:$16 sps:$4 sm:$0xff]  }
 0xbcb   : > { %v4642_v4 = vpop.xlane.xlu1 %4641  ;;  %5301 = vadd.xlane.f32.xlu1 %v8829_v39  ;;  %v5276_v62 = vpop.xlane.xlu0 %5275 }
 0xbcc   : > { %v8831_v6 = vpop.eup %8830  ;;  %v5284_v41 = vsub.f32 %v11058_v10, %v5276_v62  ;;  %8838 = vpow2.f32 %v5295_v38  ;;  %v8650_v38 = vld [vmem:[#allocation13 + $0x84] ss:$16 sps:$4 sm:$0xff]  }
 0xbcd   : > { %5303 = vadd.xlane.f32.xlu0 %v8831_v6  ;;  %v5317_v52 = vpack.c.bf16 %v8831_v6, %v8829_v39  ;;  %8840 = vpow2.f32 %v5297_v31  ;;  %v8648_v6 = vld [vmem:[#allocation13 + $0x80] ss:$16 sps:$4 sm:$0xff]  }
 0xbce   : > { %v5299_v17 = vmul.f32 1.442695, %v5284_v41  ;;  %8842 = vrcp.f32 %v4642_v4  ;;  %v8833_v35 = vpop.eup %8832  ;;  %v8653_v41 = vld [vmem:[#allocation13 + $0xa4] ss:$16 sps:$4 sm:$0xff]  }
 0xbcf   : > { %v4320_v44 = vpop.xlane.xlu1 %4319  ;;  %4979 = vadd.xlane.f32.xlu1 %v10957_v14  ;;  %7945 = vmatprep.mubr.bf16.mxu0 %v5317_v52  ;;  %v4644_v51 = vpop.xlane.xlu0 %4643 }
 0xbd0   : > { %8844 = vpow2.f32 %v5299_v17 }
 0xbd1   : > { %4981 = vadd.xlane.f32.xlu0 %v10953_v45  ;;  %8846 = vrcp.f32 %v4644_v51 }
 0xbd2   : > { %v8835_v1 = vpop.eup %8834  ;;  %8848 = vrcp.f32 %v4320_v44 }
 0xbd3   : > { %v4646_v58 = vpop.xlane.xlu1 %4645  ;;  %5305 = vadd.xlane.f32.xlu1 %v8833_v35  ;;  %v4322_v10 = vpop.xlane.xlu0 %4321  ;;  %v5318_v15 = vpack.c.bf16 %v8835_v1, %v8833_v35  ;;  %v8651_v35 = vld [vmem:[#allocation13 + $0xa0] ss:$16 sps:$4 sm:$0xff]  }
 0xbd4   : > { %8850 = vrcp.f32 %v4322_v10  ;;  %v8837_v55 = vpop.eup %8836 }
 0xbd5   : > { %5307 = vadd.xlane.f32.xlu0 %v8835_v1  ;;  %7946 = vmatmul.mubr.bf16.vlgmr.msra.gmra.mrb[40].mxu0 %v5318_v15  ;;  %8852 = vrcp.f32 %v4646_v58  ;;  %v8656_v1 = vld [vmem:[#allocation13 + $0xc4] ss:$16 sps:$4 sm:$0xff]   ;;  %v8654_v15 = vld [vmem:[#allocation13 + $0xc0] ss:$16 sps:$4 sm:$0xff]  }
 0xbd6   : > { %v8839_v14 = vpop.eup %8838  ;;  %6195 = vmatpush1.bf16.msra.mxu0 %v8627_v20 }
 0xbd7   : > { %v4324_v25 = vpop.xlane.xlu1 %4323  ;;  %4983 = vadd.xlane.f32.xlu1 %v10961_v49  ;;  %v4648_v45 = vpop.xlane.xlu0 %4647  ;;  %6196 = vmatprep.subr.bf16.mxu0 %v8635_v56  ;;  %v5319_v59 = vpack.c.bf16 %v8839_v14, %v8837_v55  ;;  %v8659_v56 = vld [vmem:[#allocation13 + $0xe4] ss:$16 sps:$4 sm:$0xff]  }
 0xbd8   : > { %v8841_v13 = vpop.eup %8840  ;;  %8854 = vrcp.f32 %v4648_v45  ;;  %v11373_v45 = vld [vmem:[#allocation47_spill] sm:$0xff] }
 0xbd9   : > { %v8843_v47 = vpop.eup %8842  ;;  %4985 = vadd.xlane.f32.xlu0 %v10963_v63  ;;  %7949 = vmatprep.mubr.bf16.mxu0 %v5319_v59  ;;  %8856 = vrcp.f32 %v4324_v25 }
 0xbda   : > { %v8845_v12 = vpop.eup %8844  ;;  %6197 = vmatpush1.bf16.msra.mxu0 %v8633_v23  ;;  %v4727_v50 = vmul.f32 %v8843_v47, %v10876_v33 }
 0xbdb   : > { %v4650_v57 = vpop.xlane.xlu1 %4649  ;;  %5309 = vadd.xlane.f32.xlu1 %v8837_v55  ;;  %v4326_v7 = vpop.xlane.xlu0 %4325  ;;  %v5320_v9 = vpack.c.bf16 %v8845_v12, %v8841_v13  ;;  %6198 = vmatprep.subr.bf16.mxu0 %v8641_v8  ;;  %v8662_v8 = vld [vmem:[#allocation13 + $0x104] ss:$16 sps:$4 sm:$0xff]  }
 0xbdc   : > { %v8847_v49 = vpop.eup %8846  ;;  %8858 = vrcp.f32 %v4326_v7  ;;  %v8660_v7 = vld [vmem:[#allocation13 + $0x100] ss:$16 sps:$4 sm:$0xff]  }
 0xbdd   : > { %v8849_v40 = vpop.eup %8848  ;;  %5311 = vadd.xlane.f32.xlu0 %v8839_v14  ;;  %v4729_v37 = vmul.f32 %v8847_v49, %v10880_v60  ;;  %7950 = vmatmul.mubr.bf16.gmra.mrb[44].mxu0 %v5320_v9  ;;  %8860 = vrcp.f32 %v4650_v57  ;;  %v11375_v9 = vld [vmem:[#allocation43_spill] sm:$0xff] }
 0xbde   : > { %v8851_v63 = vpop.eup %8850  ;;  %6199 = vmatpush1.bf16.msra.mxu0 %v8639_v21  ;;  %v4405_v39 = vmul.f32 %v8849_v40, %v10715_v32 }
 0xbdf   : > { %v4328_v26 = vpop.xlane.xlu1 %4327  ;;  %4987 = vadd.xlane.f32.xlu1 %v10993_v29  ;;  %v4742_v3 = vpack.c.bf16 %v4729_v37, %v4727_v50  ;;  %v4652_v5 = vpop.xlane.xlu0 %4651  ;;  %v4407_v31 = vmul.f32 %v8851_v63, %v10719_v16  ;;  %6200 = vmatprep.subr.bf16.mxu0 %v8647_v24  ;;  %v11376_v24 = vld [vmem:[#allocation50_spill] sm:$0xff] }
 0xbe0   : > { %v8853_v4 = vpop.eup %8852  ;;  %8862 = vrcp.f32 %v4652_v5  ;;  %v8665_v50 = vld [vmem:[#allocation13 + $0x124] ss:$16 sps:$4 sm:$0xff]   ;;  %v8663_v5 = vld [vmem:[#allocation13 + $0x120] ss:$16 sps:$4 sm:$0xff]  }
 0xbe1   : > { %6226 = vmatprep.mubr.bf16.mxu0 %v4742_v3  ;;  %6372 = vmatprep.mubr.bf16.mxu1 %v4742_v3  ;;  %v11099_v33 = vpack.c.bf16 %v4407_v31, %v4405_v39  ;;  %8864 = vrcp.f32 %v4328_v26  ;;  %v4731_v32 = vmul.f32 %v8853_v4, %v10874_v2  ;;  %v8693_v26 = vld [vmem:[#allocation13 + $0x228] ss:$16 sps:$4 sm:$0xff]   ;;  %v8695_v3 = vld [vmem:[#allocation13 + $0x22c] ss:$16 sps:$4 sm:$0xff]   ;;  %v11378_v31 = vld [vmem:[#allocation48_spill] sm:$0xff] }
 0xbe2   : > { %4989 = vadd.xlane.f32.xlu0 %v10998_v19  ;;  %v8855_v60 = vpop.eup %8854  ;;  %6201 = vmatpush1.bf16.msra.mxu0 %v8645_v46  ;;  %v11377_v46 = vld [vmem:[#allocation46_spill] sm:$0xff] }
 0xbe3   : > { %v4654_v29 = vpop.xlane.xlu1 %4653  ;;  %5313 = vadd.xlane.f32.xlu1 %v8841_v13  ;;  %v4330_v62 = vpop.xlane.xlu0 %4329  ;;  %6373 = vmatmul.mubr.bf16.vlgmr.msra.gmra.mrb[48].mxu1 %v11099_v33  ;;  %v4733_v16 = vmul.f32 %v8855_v60, %v10878_v36  ;;  %v11374_v13 = vld [vmem:[#allocation49_spill] sm:$0xff]  ;;  %v8668_v4 = vld [vmem:[#allocation13 + $0x144] ss:$16 sps:$4 sm:$0xff]  }
 0xbe4   : > { %6202 = vmatprep.subr.bf16.mxu0 %v8650_v38  ;;  %v8857_v52 = vpop.eup %8856  ;;  %8866 = vrcp.f32 %v4330_v62  ;;  %v8699_v62 = vld [vmem:[#allocation13 + $0x248] ss:$16 sps:$4 sm:$0xff]  }
 0xbe5   : > { %v11104_v19 = vpack.c.bf16 %v4733_v16, %v4731_v32  ;;  %8868 = vrcp.f32 %v4654_v29  ;;  %v4409_v2 = vmul.f32 %v8857_v52, %v10713_v22  ;;  %v8701_v29 = vld [vmem:[#allocation13 + $0x24c] ss:$16 sps:$4 sm:$0xff]   ;;  %v8671_v16 = vld [vmem:[#allocation13 + $0x164] ss:$16 sps:$4 sm:$0xff]   ;;  %v8669_v52 = vld [vmem:[#allocation13 + $0x160] ss:$16 sps:$4 sm:$0xff]  }
 0xbe6   : > { %5315 = vadd.xlane.f32.xlu0 %v8845_v12  ;;  %v8859_v17 = vpop.eup %8858  ;;  %6203 = vmatpush1.bf16.msra.mxu0 %v8648_v6  ;;  %v8666_v6 = vld [vmem:[#allocation13 + $0x140] ss:$16 sps:$4 sm:$0xff]   ;;  %v8707_v32 = vld [vmem:[#allocation13 + $0x26c] ss:$16 sps:$4 sm:$0xff]  }
 0xbe7   : > { %v4332_v44 = vpop.xlane.xlu1 %4331  ;;  %4991 = vadd.xlane.f32.xlu1 %v11000_v42  ;;  %v4656_v51 = vpop.xlane.xlu0 %4655  ;;  %6382 = vmatprep.mubr.bf16.mxu1 %v11104_v19  ;;  %v4411_v36 = vmul.f32 %v8859_v17, %v10717_v27  ;;  %v8713_v17 = vld [vmem:[#allocation13 + $0x28c] ss:$16 sps:$4 sm:$0xff]  }
 0xbe8   : > { %6204 = vmatprep.subr.bf16.mxu0 %v8653_v41  ;;  %v8861_v58 = vpop.eup %8860  ;;  %8870 = vrcp.f32 %v4656_v51  ;;  %v8705_v41 = vld [vmem:[#allocation13 + $0x268] ss:$16 sps:$4 sm:$0xff]  }
 0xbe9   : > { %8872 = vrcp.f32 %v4332_v44  ;;  %v11111_v10 = vpack.c.bf16 %v4411_v36, %v4409_v2  ;;  %v4735_v22 = vmul.f32 %v8861_v58, %v10884_v61  ;;  %v8687_v61 = vld [vmem:[#allocation13 + $0x208] ss:$16 sps:$4 sm:$0xff]   ;;  %v8674_v44 = vld [vmem:[#allocation13 + $0x184] ss:$16 sps:$4 sm:$0xff]   ;;  %v8719_v2 = vld [vmem:[#allocation13 + $0x2ac] ss:$16 sps:$4 sm:$0xff]  }
 0xbea   : > { %4993 = vadd.xlane.f32.xlu0 %v10996_v34  ;;  %v8863_v20 = vpop.eup %8862  ;;  %6205 = vmatpush1.bf16.msra.mxu0 %v8651_v35  ;;  %v8657_v34 = vld [vmem:[#allocation13 + $0xe0] ss:$16 sps:$4 sm:$0xff]   ;;  %v8711_v51 = vld [vmem:[#allocation13 + $0x288] ss:$16 sps:$4 sm:$0xff]   ;;  %v8677_v36 = vld [vmem:[#allocation13 + $0x1a4] ss:$16 sps:$4 sm:$0xff]  }
 0xbeb   : > { %v4334_v42 = vpop.xlane.xlu0 %4333  ;;  %6383 = vmatmul.mubr.bf16.gmra.mrb[52].mxu1 %v11111_v10  ;;  %6206 = vmatprep.subr.bf16.mxu0 %v8656_v1  ;;  %v4737_v27 = vmul.f32 %v8863_v20, %v10888_v43  ;;  %v8865_v55 = vpop.eup %8864  ;;  %v8689_v43 = vld [vmem:[#allocation13 + $0x20c] ss:$16 sps:$4 sm:$0xff]   ;;  %v8672_v35 = vld [vmem:[#allocation13 + $0x180] ss:$16 sps:$4 sm:$0xff]   ;;  %v8717_v1 = vld [vmem:[#allocation13 + $0x2a8] ss:$16 sps:$4 sm:$0xff]  }
 0xbec   : > { %8874 = vrcp.f32 %v4334_v42  ;;  %v4413_v23 = vmul.f32 %v8865_v55, %v11373_v45  ;;  %6413 = vmatprep.subr.bf16.mxu1 %v8689_v43  ;;  %v8675_v58 = vld [vmem:[#allocation13 + $0x1a0] ss:$16 sps:$4 sm:$0xff]   ;;  %v8725_v20 = vld [vmem:[#allocation13 + $0x2cc] ss:$16 sps:$4 sm:$0xff]   ;;  %v8680_v42 = vld [vmem:[#allocation13 + $0x1c4] ss:$16 sps:$4 sm:$0xff]  }
 0xbed   : > { %v11116_v14 = vpack.c.bf16 %v4737_v27, %v4735_v22  ;;  %6414 = vmatpush1.bf16.msra.mxu1 %v8687_v61  ;;  %v8678_v22 = vld [vmem:[#allocation13 + $0x1c0] ss:$16 sps:$4 sm:$0xff]   ;;  %v8731_v27 = vld [vmem:[#allocation13 + $0x2ec] ss:$16 sps:$4 sm:$0xff]   ;;  %v8729_v55 = vld [vmem:[#allocation13 + $0x2e8] ss:$16 sps:$4 sm:$0xff]  }
 0xbee   : > { %v8867_v25 = vpop.eup %8866  ;;  %6207 = vmatpush1.bf16.msra.mxu0 %v8654_v15  ;;  %6415 = vmatprep.subr.bf16.mxu1 %v8695_v3  ;;  %v8723_v15 = vld [vmem:[#allocation13 + $0x2c8] ss:$16 sps:$4 sm:$0xff]   ;;  %v8686_v45 = vld [vmem:[#allocation13 + $0x204] ss:$16 sps:$4 sm:$0xff]   ;;  %v8690_v61 = vld [vmem:[#allocation13 + $0x220] ss:$16 sps:$4 sm:$0xff]  }
 0xbef   : > { %6392 = vmatprep.mubr.bf16.mxu1 %v11116_v14  ;;  %6208 = vmatprep.subr.bf16.mxu0 %v8659_v56  ;;  %v4415_v59 = vmul.f32 %v8867_v25, %v11374_v13  ;;  %v8869_v47 = vpop.eup %8868  ;;  %v8683_v56 = vld [vmem:[#allocation13 + $0x1e4] ss:$16 sps:$4 sm:$0xff]   ;;  %v8681_v25 = vld [vmem:[#allocation13 + $0x1e0] ss:$16 sps:$4 sm:$0xff]   ;;  %v8749_v43 = vld [vmem:[#allocation13 + $0x34c] ss:$16 sps:$4 sm:$0xff]  }
 0xbf0   : > { %v4739_v49 = vmul.f32 %v8869_v47, %v11375_v9  ;;  %v8684_v13 = vld [vmem:[#allocation13 + $0x200] ss:$16 sps:$4 sm:$0xff]   ;;  %v8741_v47 = vld [vmem:[#allocation13 + $0x328] ss:$16 sps:$4 sm:$0xff]   ;;  %v8704_v9 = vld [vmem:[#allocation13 + $0x264] ss:$16 sps:$4 sm:$0xff]  }
 0xbf1   : > { %v11121_v12 = vpack.c.bf16 %v4415_v59, %v4413_v23  ;;  %6416 = vmatpush1.bf16.msra.mxu1 %v8693_v26  ;;  %v8735_v23 = vld [vmem:[#allocation13 + $0x308] ss:$16 sps:$4 sm:$0xff]   ;;  %v8692_v59 = vld [vmem:[#allocation13 + $0x224] ss:$16 sps:$4 sm:$0xff]   ;;  %v8767_v3 = vld [vmem:[#allocation13 + $0x3ac] ss:$16 sps:$4 sm:$0xff]  }
 0xbf2   : > { %v8871_v57 = vpop.eup %8870  ;;  %6209 = vmatpush1.bf16.msra.mxu0 %v8657_v34  ;;  %6417 = vmatprep.subr.bf16.mxu1 %v8701_v29  ;;  %v8737_v34 = vld [vmem:[#allocation13 + $0x30c] ss:$16 sps:$4 sm:$0xff]   ;;  %v8716_v26 = vld [vmem:[#allocation13 + $0x2a4] ss:$16 sps:$4 sm:$0xff]  }
 0xbf3   : > { %v8873_v21 = vpop.eup %8872  ;;  %6393 = vmatmul.mubr.bf16.gmra.mrb[56].mxu1 %v11121_v12  ;;  %6210 = vmatprep.subr.bf16.mxu0 %v8662_v8  ;;  %v4741_v40 = vmul.f32 %v8871_v57, %v11376_v24  ;;  %v8743_v8 = vld [vmem:[#allocation13 + $0x32c] ss:$16 sps:$4 sm:$0xff]   ;;  %v8698_v57 = vld [vmem:[#allocation13 + $0x244] ss:$16 sps:$4 sm:$0xff]  }
 0xbf4   : > { %v4417_v39 = vmul.f32 %v8873_v21, %v11377_v46  ;;  %v8696_v21 = vld [vmem:[#allocation13 + $0x240] ss:$16 sps:$4 sm:$0xff]   ;;  %v8761_v24 = vld [vmem:[#allocation13 + $0x38c] ss:$16 sps:$4 sm:$0xff]   ;;  %v8734_v29 = vld [vmem:[#allocation13 + $0x304] ss:$16 sps:$4 sm:$0xff]  }
 0xbf5   : > { %v11126_v63 = vpack.c.bf16 %v4741_v40, %v4739_v49  ;;  %6418 = vmatpush1.bf16.msra.mxu1 %v8699_v62  ;;  %v8755_v49 = vld [vmem:[#allocation13 + $0x36c] ss:$16 sps:$4 sm:$0xff]   ;;  %v8710_v40 = vld [vmem:[#allocation13 + $0x284] ss:$16 sps:$4 sm:$0xff]   ;;  %v8732_v62 = vld [vmem:[#allocation13 + $0x300] ss:$16 sps:$4 sm:$0xff]  }
 0xbf6   : > { %v8875_v37 = vpop.eup %8874  ;;  %6211 = vmatpush1.bf16.msra.mxu0 %v8660_v7  ;;  %6419 = vmatprep.subr.bf16.mxu1 %v8707_v32  ;;  %v8747_v7 = vld [vmem:[#allocation13 + $0x348] ss:$16 sps:$4 sm:$0xff]   ;;  %v8773_v46 = vld [vmem:[#allocation13 + $0x3cc] ss:$16 sps:$4 sm:$0xff]   ;;  %v8738_v32 = vld [vmem:[#allocation13 + $0x320] ss:$16 sps:$4 sm:$0xff]  }
 0xbf7   : > { %v4419_v38 = vmul.f32 %v8875_v37, %v11378_v31  ;;  %6402 = vmatprep.mubr.bf16.mxu1 %v11126_v63  ;;  %6212 = vmatprep.subr.bf16.mxu0 %v8665_v50  ;;  %v8759_v50 = vld [vmem:[#allocation13 + $0x388] ss:$16 sps:$4 sm:$0xff]   ;;  %v8708_v37 = vld [vmem:[#allocation13 + $0x280] ss:$16 sps:$4 sm:$0xff]  }
 0xbf8   : > { %v8720_v31 = vld [vmem:[#allocation13 + $0x2c0] ss:$16 sps:$4 sm:$0xff]  }
 0xbf9   : > { %v11131_v60 = vpack.c.bf16 %v4419_v38, %v4417_v39  ;;  %6420 = vmatpush1.bf16.msra.mxu1 %v8705_v41  ;;  %v8771_v39 = vld [vmem:[#allocation13 + $0x3c8] ss:$16 sps:$4 sm:$0xff]   ;;  %v8728_v38 = vld [vmem:[#allocation13 + $0x2e4] ss:$16 sps:$4 sm:$0xff]   ;;  %v8744_v41 = vld [vmem:[#allocation13 + $0x340] ss:$16 sps:$4 sm:$0xff]  }
 0xbfa   : > { %6213 = vmatpush1.bf16.msra.mxu0 %v8663_v5  ;;  %6421 = vmatprep.subr.bf16.mxu1 %v8713_v17  ;;  %v8722_v5 = vld [vmem:[#allocation13 + $0x2c4] ss:$16 sps:$4 sm:$0xff]  }
 0xbfb   : > { %6403 = vmatmul.mubr.bf16.gmra.mrb[60].mxu1 %v11131_v60  ;;  %6214 = vmatprep.subr.bf16.mxu0 %v8668_v4  ;;  %v8779_v4 = vld [vmem:[#allocation13 + $0x3ec] ss:$16 sps:$4 sm:$0xff]   ;;  %v8758_v17 = vld [vmem:[#allocation13 + $0x384] ss:$16 sps:$4 sm:$0xff]  }
 0xbfd   : > { %6422 = vmatpush1.bf16.msra.mxu1 %v8711_v51  ;;  %v8764_v51 = vld [vmem:[#allocation13 + $0x3a4] ss:$16 sps:$4 sm:$0xff]  }
 0xbfe   : > { %6215 = vmatpush1.bf16.msra.mxu0 %v8666_v6  ;;  %6423 = vmatprep.subr.bf16.mxu1 %v8719_v2  ;;  %v8740_v6 = vld [vmem:[#allocation13 + $0x324] ss:$16 sps:$4 sm:$0xff]  }
 0xbff   : > { %6216 = vmatprep.subr.bf16.mxu0 %v8671_v16  ;;  %v8746_v16 = vld [vmem:[#allocation13 + $0x344] ss:$16 sps:$4 sm:$0xff]  }
 0xc00   : > { %v8770_v2 = vld [vmem:[#allocation13 + $0x3c4] ss:$16 sps:$4 sm:$0xff]  }
 0xc01   : > { %6424 = vmatpush1.bf16.msra.mxu1 %v8717_v1  ;;  %v8776_v1 = vld [vmem:[#allocation13 + $0x3e4] ss:$16 sps:$4 sm:$0xff]  }
 0xc02   : > { %6217 = vmatpush1.bf16.msra.mxu0 %v8669_v52  ;;  %6425 = vmatprep.subr.bf16.mxu1 %v8725_v20  ;;  %v8750_v52 = vld [vmem:[#allocation13 + $0x360] ss:$16 sps:$4 sm:$0xff]  }
 0xc03   : > { %6218 = vmatprep.subr.bf16.mxu0 %v8674_v44  ;;  %v8756_v44 = vld [vmem:[#allocation13 + $0x380] ss:$16 sps:$4 sm:$0xff]  }
 0xc05   : > { %6426 = vmatpush1.bf16.msra.mxu1 %v8723_v15 }
 0xc06   : > { %6219 = vmatpush1.bf16.msra.mxu0 %v8672_v35  ;;  %6427 = vmatprep.subr.bf16.mxu1 %v8731_v27  ;;  %v8762_v35 = vld [vmem:[#allocation13 + $0x3a0] ss:$16 sps:$4 sm:$0xff]  }
 0xc07   : > { %6220 = vmatprep.subr.bf16.mxu0 %v8677_v36  ;;  %v8768_v36 = vld [vmem:[#allocation13 + $0x3c0] ss:$16 sps:$4 sm:$0xff]  }
 0xc09   : > { %6428 = vmatpush1.bf16.msra.mxu1 %v8729_v55 }
 0xc0a   : > { %6221 = vmatpush1.bf16.msra.mxu0 %v8675_v58  ;;  %6429 = vmatprep.subr.bf16.mxu1 %v8737_v34  ;;  %v8774_v58 = vld [vmem:[#allocation13 + $0x3e0] ss:$16 sps:$4 sm:$0xff]  }
 0xc0b   : > { %6222 = vmatprep.subr.bf16.mxu0 %v8680_v42 }
 0xc0d   : > { %6430 = vmatpush1.bf16.msra.mxu1 %v8735_v23 }
 0xc0e   : > { %6223 = vmatpush1.bf16.msra.mxu0 %v8678_v22  ;;  %6431 = vmatprep.subr.bf16.mxu1 %v8743_v8 }
 0xc0f   : > { %6224 = vmatprep.subr.bf16.mxu0 %v8683_v56 }
 0xc11   : > { %6432 = vmatpush1.bf16.msra.mxu1 %v8741_v47 }
 0xc12   : > { %6225 = vmatpush1.bf16.msra.mxu0 %v8681_v25  ;;  %6433 = vmatprep.subr.bf16.mxu1 %v8749_v43 }
 0xc13   : > { %6267 = vmatprep.subr.bf16.mxu0 %v8686_v45 }
 0xc15   : > { %6227 = vmatmul.mubr.bf16.vlgmr.msra.gmra.mrb[48].mxu0 %v11099_v33  ;;  %6434 = vmatpush1.bf16.msra.mxu1 %v8747_v7  ;;  %v8753_v33 = vld [vmem:[#allocation13 + $0x368] ss:$16 sps:$4 sm:$0xff]  }
 0xc16   : > { %6236 = vmatprep.mubr.bf16.mxu0 %v11104_v19  ;;  %6268 = vmatpush1.bf16.msra.mxu0 %v8684_v13  ;;  %v8702_v19 = vld [vmem:[#allocation13 + $0x260] ss:$16 sps:$4 sm:$0xff]  }
 0xc17   : > { %6269 = vmatprep.subr.bf16.mxu0 %v8692_v59  ;;  %6435 = vmatprep.subr.bf16.mxu1 %v8755_v49 }
 0xc19   : > { %6436 = vmatpush1.bf16.msra.mxu1 %v8753_v33 }
 0xc1a   : > { %6270 = vmatpush1.bf16.msra.mxu0 %v8690_v61  ;;  %6437 = vmatprep.subr.bf16.mxu1 %v8761_v24 }
 0xc1b   : > { %6271 = vmatprep.subr.bf16.mxu0 %v8698_v57 }
 0xc1d   : > { %6237 = vmatmul.mubr.bf16.gmra.mrb[52].mxu0 %v11111_v10  ;;  %6438 = vmatpush1.bf16.msra.mxu1 %v8759_v50  ;;  %v8765_v10 = vld [vmem:[#allocation13 + $0x3a8] ss:$16 sps:$4 sm:$0xff]  }
 0xc1e   : > { %6246 = vmatprep.mubr.bf16.mxu0 %v11116_v14  ;;  %6272 = vmatpush1.bf16.msra.mxu0 %v8696_v21  ;;  %v8714_v14 = vld [vmem:[#allocation13 + $0x2a0] ss:$16 sps:$4 sm:$0xff]  }
 0xc1f   : > { %6273 = vmatprep.subr.bf16.mxu0 %v8704_v9  ;;  %6439 = vmatprep.subr.bf16.mxu1 %v8767_v3 }
 0xc21   : > { %6440 = vmatpush1.bf16.msra.mxu1 %v8765_v10 }
 0xc22   : > { %6274 = vmatpush1.bf16.msra.mxu0 %v8702_v19  ;;  %6441 = vmatprep.subr.bf16.mxu1 %v8773_v46 }
 0xc23   : > { %6275 = vmatprep.subr.bf16.mxu0 %v8710_v40 }
 0xc25   : > { %6247 = vmatmul.mubr.bf16.gmra.mrb[56].mxu0 %v11121_v12  ;;  %6442 = vmatpush1.bf16.msra.mxu1 %v8771_v39  ;;  %v8777_v12 = vld [vmem:[#allocation13 + $0x3e8] ss:$16 sps:$4 sm:$0xff]  }
 0xc26   : > { %6256 = vmatprep.mubr.bf16.mxu0 %v11126_v63  ;;  %6276 = vmatpush1.bf16.msra.mxu0 %v8708_v37  ;;  %v8726_v63 = vld [vmem:[#allocation13 + $0x2e0] ss:$16 sps:$4 sm:$0xff]  }
 0xc27   : > { %6277 = vmatprep.subr.bf16.mxu0 %v8716_v26  ;;  %6443 = vmatprep.subr.bf16.mxu1 %v8779_v4 }
 0xc29   : > { %6444 = vmatpush1.bf16.msra.mxu1 %v8777_v12 }
 0xc2a   : > { %6278 = vmatpush1.bf16.msra.mxu0 %v8714_v14 }
 0xc2b   : > { %6279 = vmatprep.subr.bf16.mxu0 %v8722_v5 }
 0xc2d   : > { %6257 = vmatmul.mubr.bf16.gmra.mrb[60].mxu0 %v11131_v60  ;;  %v8752_v60 = vld [vmem:[#allocation13 + $0x364] ss:$16 sps:$4 sm:$0xff]  }
 0xc2e   : > { %6280 = vmatpush1.bf16.msra.mxu0 %v8720_v31 }
 0xc2f   : > { %6281 = vmatprep.subr.bf16.mxu0 %v8728_v38 }
 0xc32   : > { %6282 = vmatpush1.bf16.msra.mxu0 %v8726_v63 }
 0xc33   : > { %6283 = vmatprep.subr.bf16.mxu0 %v8734_v29 }
 0xc36   : > { %6284 = vmatpush1.bf16.msra.mxu0 %v8732_v62 }
 0xc37   : > { %6285 = vmatprep.subr.bf16.mxu0 %v8740_v6 }
 0xc3a   : > { %6286 = vmatpush1.bf16.msra.mxu0 %v8738_v32 }
 0xc3b   : > { %6287 = vmatprep.subr.bf16.mxu0 %v8746_v16 }
 0xc3e   : > { %6288 = vmatpush1.bf16.msra.mxu0 %v8744_v41 }
 0xc3f   : > { %6289 = vmatprep.subr.bf16.mxu0 %v8752_v60 }
 0xc42   : > { %6290 = vmatpush1.bf16.msra.mxu0 %v8750_v52 }
 0xc43   : > { %6291 = vmatprep.subr.bf16.mxu0 %v8758_v17 }
 0xc46   : > { %6292 = vmatpush1.bf16.msra.mxu0 %v8756_v44 }
 0xc47   : > { %6293 = vmatprep.subr.bf16.mxu0 %v8764_v51 }
 0xc4a   : > { %6294 = vmatpush1.bf16.msra.mxu0 %v8762_v35 }
 0xc4b   : > { %6295 = vmatprep.subr.bf16.mxu0 %v8770_v2 }
 0xc4e   : > { %6296 = vmatpush1.bf16.msra.mxu0 %v8768_v36 }
 0xc4f   : > { %6297 = vmatprep.subr.bf16.mxu0 %v8776_v1 }
 0xc52   : > { %6298 = vmatpush1.bf16.msra.mxu0 %v8774_v58 }
 0xc58   : > { %v5302_v20 = vpop.xlane.xlu1 %5301 }
 0xc5a   : > { %v5304_v42 = vpop.xlane.xlu0 %5303 }
 0xc5c   : > { %v4980_v15 = vpop.xlane.xlu1 %4979 }
 0xc5d   : > { %8876 = vrcp.f32 %v4980_v15 }
 0xc5e   : > { %v4982_v22 = vpop.xlane.xlu0 %4981 }
 0xc5f   : > { %8878 = vrcp.f32 %v4982_v22 }
 0xc60   : > { %v5306_v27 = vpop.xlane.xlu1 %5305 }
 0xc62   : > { %v5308_v56 = vpop.xlane.xlu0 %5307 }
 0xc64   : > { %v4984_v55 = vpop.xlane.xlu1 %4983 }
 0xc65   : > { %8880 = vrcp.f32 %v4984_v55 }
 0xc66   : > { %v4986_v25 = vpop.xlane.xlu0 %4985 }
 0xc67   : > { %v8877_v34 = vpop.eup %8876  ;;  %8882 = vrcp.f32 %v4986_v25 }
 0xc68   : > { %v5310_v45 = vpop.xlane.xlu1 %5309  ;;  %v5065_v13 = vmul.f32 %v8877_v34, %v11027_v30 }
 0xc69   : > { %v8879_v23 = vpop.eup %8878 }
 0xc6a   : > { %v5067_v59 = vmul.f32 %v8879_v23, %v11031_v0  ;;  %v5312_v8 = vpop.xlane.xlu0 %5311 }
 0xc6c   : > { %v4988_v47 = vpop.xlane.xlu1 %4987  ;;  %v5080_v61 = vpack.c.bf16 %v5067_v59, %v5065_v13 }
 0xc6d   : > { %8884 = vrcp.f32 %v4988_v47 }
 0xc6f   : > { %v8881_v43 = vpop.eup %8880  ;;  %v4990_v57 = vpop.xlane.xlu0 %4989 }
 0xc70   : > { %8886 = vrcp.f32 %v4990_v57  ;;  %v5314_v7 = vpop.xlane.xlu1 %5313  ;;  %v5069_v9 = vmul.f32 %v8881_v43, %v11025_v18 }
 0xc71   : > { %v8883_v21 = vpop.eup %8882 }
 0xc72   : > { %v5071_v49 = vmul.f32 %v8883_v21, %v11029_v54 }
 0xc73   : > { %v5316_v33 = vpop.xlane.xlu0 %5315 }
 0xc74   : > { %v4992_v19 = vpop.xlane.xlu1 %4991  ;;  %v5081_v24 = vpack.c.bf16 %v5071_v49, %v5069_v9 }
 0xc75   : > { %8888 = vrcp.f32 %v4992_v19 }
 0xc77   : > { %v4994_v30 = vpop.xlane.xlu0 %4993  ;;  %v8885_v40 = vpop.eup %8884 }
 0xc78   : > { %8890 = vrcp.f32 %v4994_v30  ;;  %v5073_v50 = vmul.f32 %v8885_v40, %v11035_v28 }
 0xc79   : > { %8892 = vrcp.f32 %v5302_v20 }
 0xc7a   : > { %v8887_v0 = vpop.eup %8886  ;;  %8894 = vrcp.f32 %v5306_v27 }
 0xc7b   : > { %v5075_v37 = vmul.f32 %v8887_v0, %v11039_v48  ;;  %8896 = vrcp.f32 %v5308_v56 }
 0xc7c   : > { %8898 = vrcp.f32 %v5304_v42 }
 0xc7d   : > { %v5082_v26 = vpack.c.bf16 %v5075_v37, %v5073_v50  ;;  %8900 = vrcp.f32 %v5310_v45 }
 0xc7e   : > { %8902 = vrcp.f32 %v5314_v7 }
 0xc7f   : > { %v8889_v3 = vpop.eup %8888  ;;  %8904 = vrcp.f32 %v5316_v33 }
 0xc80   : > { %v5077_v14 = vmul.f32 %v8889_v3, %v11033_v11  ;;  %8906 = vrcp.f32 %v5312_v8 }
 0xc82   : > { %v8891_v10 = vpop.eup %8890 }
 0xc83   : > { %v5079_v18 = vmul.f32 %v8891_v10, %v11037_v53  ;;  %v8893_v5 = vpop.eup %8892 }
 0xc84   : > { %v8895_v28 = vpop.eup %8894 }
 0xc85   : > { %v5083_v54 = vpack.c.bf16 %v5079_v18, %v5077_v14  ;;  %v8897_v39 = vpop.eup %8896 }
 0xc86   : > { %v8899_v38 = vpop.eup %8898 }
 0xc87   : > { %v8901_v6 = vpop.eup %8900 }
 0xc88   : > { %v8903_v16 = vpop.eup %8902 }
 0xc89   : > { %v8905_v60 = vpop.eup %8904 }
 0xc8a   : > { %v8907_v17 = vpop.eup %8906 }
 0xca8   : > { %v7947_v46 = vpop.f32.mrb[40].mxu0 }
 0xca9   : > { %v5355_v48 = vpop.f32.mrb[41].mxu0  ;;  %v5391_v4 = vmul.f32 %v8895_v28, %v7947_v46 }
 0xcaa   : > { %v7948_v31 = vpop.f32.mrb[42].mxu0  ;;  %v5387_v53 = vmul.f32 %v8893_v5, %v5355_v48 }
 0xcab   : > { %v5393_v11 = vmul.f32 %v8897_v39, %v7948_v31  ;;  %v5358_v12 = vpop.f32.mrb[43].mxu0 }
 0xcac   : > { %v5389_v63 = vmul.f32 %v8899_v38, %v5358_v12 }
 0xcad   : > { %v5403_v29 = vpack.c.bf16 %v5393_v11, %v5391_v4 }
 0xcae   : > { %v5402_v62 = vpack.c.bf16 %v5389_v63, %v5387_v53 }
 0xcb0   : > { %v7951_v32 = vpop.f32.mrb[44].mxu0  ;;  %6299 = vmatprep.mubr.bf16.mxu0 %v5402_v62  ;;  %6445 = vmatprep.mubr.bf16.mxu1 %v5402_v62 }
 0xcb1   : > { %v5371_v41 = vpop.f32.mrb[45].mxu0  ;;  %6300 = vmatmul.mubr.bf16.vlgmr.msra.gmra.mrb[48].mxu0 %v5080_v61  ;;  %6446 = vmatmul.mubr.bf16.vlgmr.msra.gmra.mrb[48].mxu1 %v5080_v61  ;;  %v5399_v44 = vmul.f32 %v8903_v16, %v7951_v32 }
 0xcb2   : > { %v7952_v52 = vpop.f32.mrb[46].mxu0  ;;  %6309 = vmatprep.mubr.bf16.mxu0 %v5403_v29  ;;  %6455 = vmatprep.mubr.bf16.mxu1 %v5403_v29  ;;  %v5395_v2 = vmul.f32 %v8901_v6, %v5371_v41 }
 0xcb3   : > { %v5401_v51 = vmul.f32 %v8905_v60, %v7952_v52  ;;  %v5374_v35 = vpop.f32.mrb[47].mxu0 }
 0xcb4   : > { %v5397_v36 = vmul.f32 %v8907_v17, %v5374_v35 }
 0xcb5   : > { %v5405_v1 = vpack.c.bf16 %v5401_v51, %v5399_v44 }
 0xcb6   : > { %v5404_v58 = vpack.c.bf16 %v5397_v36, %v5395_v2 }
 0xcb9   : > { %6310 = vmatmul.mubr.bf16.gmra.mrb[52].mxu0 %v5081_v24  ;;  %6456 = vmatmul.mubr.bf16.gmra.mrb[52].mxu1 %v5081_v24 }
 0xcba   : > { %6319 = vmatprep.mubr.bf16.mxu0 %v5404_v58  ;;  %6465 = vmatprep.mubr.bf16.mxu1 %v5404_v58 }
 0xcc1   : > { %6320 = vmatmul.mubr.bf16.gmra.mrb[56].mxu0 %v5082_v26  ;;  %6466 = vmatmul.mubr.bf16.gmra.mrb[56].mxu1 %v5082_v26 }
 0xcc2   : > { %6329 = vmatprep.mubr.bf16.mxu0 %v5405_v1  ;;  %6475 = vmatprep.mubr.bf16.mxu1 %v5405_v1 }
 0xcc9   : > { %6330 = vmatmul.mubr.bf16.gmra.mrb[60].mxu0 %v5083_v54  ;;  %6476 = vmatmul.mubr.bf16.gmra.mrb[60].mxu1 %v5083_v54 }
 0xd84   : > { %v6301_v20 = vpop.f32.mrb[48].mxu0  ;;  %v6447_v42 = vpop.f32.mrb[48].mxu1 }
 0xd85   : > { %6486 = vst [vmem:[%s9650_s25] sm:$0xff] %v6301_v20  ;;  %6488 = vst [vmem:[%s9650_s25 + $0x10] sm:$0xff] %v6447_v42  ;;  %v6303_v15 = vpop.f32.mrb[49].mxu0  ;;  %v6449_v22 = vpop.f32.mrb[49].mxu1 }
 0xd86   : > { %6487 = vst [vmem:[%s9650_s25 + $0x8] sm:$0xff] %v6303_v15  ;;  %6489 = vst [vmem:[%s9650_s25 + $0x18] sm:$0xff] %v6449_v22  ;;  %v6305_v27 = vpop.f32.mrb[50].mxu0  ;;  %v6451_v56 = vpop.f32.mrb[50].mxu1 }
 0xd87   : > { %6490 = vst [vmem:[%s9650_s25 + $0x20] sm:$0xff] %v6305_v27  ;;  %6492 = vst [vmem:[%s9650_s25 + $0x30] sm:$0xff] %v6451_v56  ;;  %v6307_v55 = vpop.f32.mrb[51].mxu0  ;;  %v6453_v25 = vpop.f32.mrb[51].mxu1 }
 0xd88   : > { %6491 = vst [vmem:[%s9650_s25 + $0x28] sm:$0xff] %v6307_v55  ;;  %6493 = vst [vmem:[%s9650_s25 + $0x38] sm:$0xff] %v6453_v25 }
 0xd8c   : > { %v6311_v34 = vpop.f32.mrb[52].mxu0  ;;  %v6457_v45 = vpop.f32.mrb[52].mxu1 }
 0xd8d   : > { %6494 = vst [vmem:[%s9650_s25 + $0x40] sm:$0xff] %v6311_v34  ;;  %6496 = vst [vmem:[%s9650_s25 + $0x50] sm:$0xff] %v6457_v45  ;;  %v6313_v23 = vpop.f32.mrb[53].mxu0  ;;  %v6459_v13 = vpop.f32.mrb[53].mxu1 }
 0xd8e   : > { %6495 = vst [vmem:[%s9650_s25 + $0x48] sm:$0xff] %v6313_v23  ;;  %6497 = vst [vmem:[%s9650_s25 + $0x58] sm:$0xff] %v6459_v13  ;;  %v6315_v59 = vpop.f32.mrb[54].mxu0  ;;  %v6461_v8 = vpop.f32.mrb[54].mxu1 }
 0xd8f   : > { %6498 = vst [vmem:[%s9650_s25 + $0x60] sm:$0xff] %v6315_v59  ;;  %6500 = vst [vmem:[%s9650_s25 + $0x70] sm:$0xff] %v6461_v8  ;;  %v6317_v47 = vpop.f32.mrb[55].mxu0  ;;  %v6463_v61 = vpop.f32.mrb[55].mxu1 }
 0xd90   : > { %6499 = vst [vmem:[%s9650_s25 + $0x68] sm:$0xff] %v6317_v47  ;;  %6501 = vst [vmem:[%s9650_s25 + $0x78] sm:$0xff] %v6463_v61 }
 0xd94   : > { %v6321_v43 = vpop.f32.mrb[56].mxu0  ;;  %v6467_v57 = vpop.f32.mrb[56].mxu1 }
 0xd95   : > { %6502 = vst [vmem:[%s9650_s25 + $0x80] sm:$0xff] %v6321_v43  ;;  %6504 = vst [vmem:[%s9650_s25 + $0x90] sm:$0xff] %v6467_v57  ;;  %v6323_v7 = vpop.f32.mrb[57].mxu0  ;;  %v6469_v21 = vpop.f32.mrb[57].mxu1 }
 0xd96   : > { %6503 = vst [vmem:[%s9650_s25 + $0x88] sm:$0xff] %v6323_v7  ;;  %6505 = vst [vmem:[%s9650_s25 + $0x98] sm:$0xff] %v6469_v21  ;;  %v6325_v9 = vpop.f32.mrb[58].mxu0  ;;  %v6471_v49 = vpop.f32.mrb[58].mxu1 }
 0xd97   : > { %6506 = vst [vmem:[%s9650_s25 + $0xa0] sm:$0xff] %v6325_v9  ;;  %6508 = vst [vmem:[%s9650_s25 + $0xb0] sm:$0xff] %v6471_v49  ;;  %v6327_v33 = vpop.f32.mrb[59].mxu0  ;;  %v6473_v19 = vpop.f32.mrb[59].mxu1 }
 0xd98   : > { %6507 = vst [vmem:[%s9650_s25 + $0xa8] sm:$0xff] %v6327_v33  ;;  %6509 = vst [vmem:[%s9650_s25 + $0xb8] sm:$0xff] %v6473_v19 }
 0xd9c   : > { %v6331_v24 = vpop.f32.mrb[60].mxu0  ;;  %v6477_v30 = vpop.f32.mrb[60].mxu1 }
 0xd9d   : > { %6510 = vst [vmem:[%s9650_s25 + $0xc0] sm:$0xff] %v6331_v24  ;;  %6512 = vst [vmem:[%s9650_s25 + $0xd0] sm:$0xff] %v6477_v30  ;;  %v6333_v40 = vpop.f32.mrb[61].mxu0  ;;  %v6479_v0 = vpop.f32.mrb[61].mxu1 }
 0xd9e   : > { %6511 = vst [vmem:[%s9650_s25 + $0xc8] sm:$0xff] %v6333_v40  ;;  %6513 = vst [vmem:[%s9650_s25 + $0xd8] sm:$0xff] %v6479_v0  ;;  %v6335_v50 = vpop.f32.mrb[62].mxu0  ;;  %v6481_v37 = vpop.f32.mrb[62].mxu1 }
 0xd9f   : > { %6514 = vst [vmem:[%s9650_s25 + $0xe0] sm:$0xff] %v6335_v50  ;;  %6516 = vst [vmem:[%s9650_s25 + $0xf0] sm:$0xff] %v6481_v37  ;;  %v6337_v26 = vpop.f32.mrb[63].mxu0  ;;  %v6483_v3 = vpop.f32.mrb[63].mxu1 }
 0xda0   : > { %6515 = vst [vmem:[%s9650_s25 + $0xe8] sm:$0xff] %v6337_v26  ;;  %6517 = vst [vmem:[%s9650_s25 + $0xf8] sm:$0xff] %v6483_v3 }
 0xda1   : > { %9134 = shalt.err (!%p9131_p11)
}
 0xda2   : > { %s9135_s23 = scalar_lea.hbm %s11181_s18, 4096  ;;  %s9139_s13 = scalar_lea.hbm %s11381_s2, 16384 }
 0xda3   : > { %p9136_p4 = scmp.ne.s32.totalorder %s11181_s18, %s9135_s23  ;;  %p9140_p9 = scmp.lt.u32.totalorder %s11181_s18, %s11381_s2 }
 0xda4   : > { %p9141_p8 = scmp.lt.u32.totalorder %s9139_s13, %s9135_s23  ;;  %p9143_p1 = scmp.lt.u32.totalorder %s9135_s23, %s11181_s18 }
 0xda5   : > { %p9137_p13 = pnand %p9136_p4, %p11382_p6 }
 0xda6   : > { %p9142_p10 = por %p9141_p8, %p9140_p9 }
 0xda7   : > { %p9138_p0 = pneg %p9137_p13 }
 0xda8   : > { %p9144_p12 = por %p9143_p1, %p9142_p10 }
 0xdaa   : > { %p9145_p3 = pnand %p9144_p12, %p9138_p0 }
 0xdac   : > { %9148 = shalt.err (!%p9145_p3)
}
 0xdad   : > { %s9271_s0 = smov 512   ;;  %s9272_s16 = smov 32  }
 0xdae   : > { %8043 = dma.vmem_to_hbm [thread:$0]  (%p11382_p6), %s11183_s8, 4096, %s11181_s18, %s11193_s30, %s9271_s0, %s9271_s0, %s9272_s16  }
 0xdaf PF: > { %s11383_s7 = sld [smem:[#allocation23_spill]]  ;;  %p8085_p5 = scmp.ge.s32.totalorder %s9255_s11, 2 }
 0xdb0   : > { %p11384_p2 = scmp.ne.s32.totalorder %s11323_s20, 0 }
 0xdb2   : > { %p8069_p7 = pnand %p8085_p5, %p11384_p2 }
 0xdb5   : > { %s6550_s3 = sand.u32 1, %s11383_s7  }
 0xdb6   : > { %s6551_s17 = scalar_lea.sflag [#allocation7], %s6550_s3 }
 0xdb7   : > { %9210 = dma.done.wait (!%p8069_p7), %s6551_s17, 4096  }
 0xdb8   : > { %9212 = vsyncadd (!%p8069_p7), %s6551_s17, 4294963200  ;;  %s26_s11 = sadd.s32 1, %s9255_s11   ;;  %s11385_s23 = sld [smem:[#allocation24_spill]] }
 0xdb9   : > { %p23_p11 = scmp.ge.s32.totalorder %s26_s11, 6   ;;  %s11386_s21 = smov %s11398_s24 }
 0xdba   : > { %s11388_s25 = smov %s9223_s26  ;;  %s11389_s26 = smov %s9573_s1 }
 0xdbb   : > { %s11390_s27 = smov %s9231_s28  ;;  %s11391_s28 = smov %s9235_s29 }
 0xdbc   : > { %s11392_s29 = smov %s9570_s19  ;;  %s11393_s30 = smov %s9247_s9 }
 0xdbd   : > { %s11394_s8 = smov %s9251_s10  ;;  %s11395_s9 = smov %s11386_s21 }
 0xdbe   : > { %s11387_s24 = smov %s11385_s23  ;;  %s11396_s10 = smov %s11402_s22 }
 0xdbf   :  { %25 = sbr.rel (!%p23_p11) target bundleno = 18 (0x12), region = 124 }
 0xdc6   :  { %6556 = vsyncpa [#allocation6], 1 }
 0xdc7   :  { %6558 = vsyncpa [#allocation6 + $0x1], 1 }
 0xdc8   :  { %6559 = vsyncpa [#allocation9], 1 }
 0xdc9   :  { %6560 = vsyncpa [#allocation12], 1 }
 0xdca   :  { %6561 = vsyncpa [#allocation15], 1 }
 0xdcb   :  { %6562 = vsyncpa [#allocation7], 1 }
 0xdcc   :  { %6564 = vsyncpa [#allocation7 + $0x1], 1 }

</bundles_post_ra>
